<compile_context>
chip_gen: v7x
topology: tpu7x:2x2x1
jax: 0.10.0
libtpu: 0.0.40
codegen_flags: <defaults>
</compile_context>

<pallas_src>
import functools
import math

import jax
import jax.numpy as jnp
from jax import lax
from jax.experimental import pallas as pl
from jax.experimental.pallas import tpu as pltpu

_MiB = 1024 * 1024


def _vmem_limit_bytes(S, D, H, csize, osize, single_buffer_weights):
    """Rough VMEM budget for one grid step, clamped to a cross-generation safe cap."""
    d_pad = max(128, D // H)                       # per-head slabs are lane-padded
    wbuf = 1 if single_buffer_weights else 2
    est = (2 * S * D * csize                       # x block (double-buffered)
           + 2 * S * D * osize                     # out block (double-buffered)
           + wbuf * 4 * D * D * csize              # resident w_qkv (3D*D) + w_o (D*D)
           + 3 * H * S * d_pad * csize             # per-head q/k/v scratch
           + S * D * csize                         # values scratch
           + 6 * S * S * 4)                        # per-head logits/exp temporaries (f32)
    # >= 32 MiB headroom; <= 48 MiB so it stays inside v7x's 64 MiB/TC VMEM.
    # TODO(synk): on v5e/v6e (128 MiB physical) this ceiling can be raised to
    #             ~100 MiB for bigger S / kv tiles.
    return int(max(32 * _MiB, min(48 * _MiB, 1.5 * est)))


def _resident_spec(shape, single_buffer):
    """BlockSpec for a weight that never changes across the grid."""
    index_map = lambda b: (0,) * len(shape)
    if single_buffer:
        # Constant index_map -> never re-fetched; default double-buffering would
        # waste a full extra VMEM copy of the weight.
        return pl.BlockSpec(shape, index_map, pipeline_mode=pl.Buffered(1))
    return pl.BlockSpec(shape, index_map)


# ---------------------------------------------------------------------------
# Fused kernel: QKV projection -> per-head attention -> module reshape -> o_proj
# ---------------------------------------------------------------------------
def _fused_mha_kernel(x_ref, wqkv_ref, wo_ref, out_ref, qkv_scr, vals_scr, *,
                      num_heads, head_dim, compute_dtype, vals_packed,
                      approx_recip):
    # x_ref:    (1, S, D)        current batch element (compute dtype)
    # wqkv_ref: (3*D, D)         permuted qkv weight, resident across the grid
    # wo_ref:   (D, D)           o_proj weight, resident across the grid
    # out_ref:  (1, S, D)        final output (lane-dense store)
    # qkv_scr:  (3*H, S, d)      per-head Q/K/V slabs (leading-axis indexed)
    # vals_scr: (S, D) if vals_packed else (H, S, d)
    H, d = num_heads, head_dim
    S = x_ref.shape[1]
    D = H * d
    scale = 1.0 / math.sqrt(d)

    # ---- QKV projection: one lane-dense MXU matmul (S, D) x (3D, D)^T ----
    x = x_ref[0]                                                   # (S, D)
    qkv = lax.dot_general(x, wqkv_ref[...],
                          dimension_numbers=(((1,), (1,)), ((), ())),
                          preferred_element_type=jnp.float32)      # (S, 3D) f32

    # Static (trace-time) split into per-head slabs on the scratch's leading
    # axis: the head loop below then only does leading-dim dynamic indexing
    # (always aligned), never unaligned lane slices.  1/sqrt(d) folded into Q.
    for h in range(H):
        q_cols = qkv[:, h * d:(h + 1) * d]
        k_cols = qkv[:, D + h * d:D + (h + 1) * d]
        v_cols = qkv[:, 2 * D + h * d:2 * D + (h + 1) * d]
        qkv_scr[h] = (q_cols * scale).astype(compute_dtype)
        qkv_scr[H + h] = k_cols.astype(compute_dtype)
        qkv_scr[2 * H + h] = v_cols.astype(compute_dtype)

    S_per = S // H if vals_packed else 0

    def head_body(h, carry):
        q = qkv_scr[h]                                             # (S, d), scaled
        k = qkv_scr[H + h]
        v = qkv_scr[2 * H + h]

        # logits = q @ k^T: contraction on the shared last dim, no transpose.
        logits = lax.dot_general(q, k,
                                 dimension_numbers=(((1,), (1,)), ((), ())),
                                 preferred_element_type=jnp.float32)  # (S, S)

        # Stable softmax; normalization deferred to the (S, d) PV result.
        m = jnp.max(logits, axis=-1, keepdims=True)
        e = jnp.exp(logits - m)                                    # (S, S) f32
        l = jnp.sum(e, axis=-1, keepdims=True)                     # (S, 1) f32
        pv = jnp.dot(e.astype(compute_dtype), v,
                     preferred_element_type=jnp.float32)           # (S, d) f32
        vals_h = (pv * pl.reciprocal(l, approx=approx_recip)
                  ).astype(compute_dtype)                          # (S, d)

        if vals_packed:
            # The module reshapes values (B,H,S,d) -> (B,S,H*d) row-major with
            # NO transpose, so head h's (S, d) block occupies output rows
            # [h*S/H, (h+1)*S/H) as vals_h.reshape(S/H, H*d).  Built here with
            # a last-dim-preserving reshape + lane concat (safe Mosaic ops).
            vh = vals_h.reshape(S_per, H, d)
            bh = jnp.concatenate([vh[:, r, :] for r in range(H)], axis=-1)
            vals_scr[pl.ds(h * S_per, S_per), :] = bh
        else:
            vals_scr[h] = vals_h
        return carry

    lax.fori_loop(0, H, head_body, 0, unroll=(H <= 8))

    if vals_packed:
        vflat = vals_scr[...]                                      # (S, D)
    else:
        # TODO(synk): only taken when S % H != 0; relies on a general Mosaic
        #             relayout for the row-major (H,S,d)->(S,H*d) reshape.
        vflat = vals_scr[...].reshape(S, D)

    # ---- o_proj: values @ Wo^T, single lane-dense (1, S, D) store ----
    out = lax.dot_general(vflat, wo_ref[...],
                          dimension_numbers=(((1,), (1,)), ((), ())),
                          preferred_element_type=jnp.float32)
    out_ref[0] = out.astype(out_ref.dtype)


def _mha_fused(x, w_qkv_perm, w_o, num_heads, out_dtype, *, single_buffer_weights):
    B, S, D = x.shape
    d = D // num_heads
    cdt = jnp.dtype(x.dtype)
    vals_packed = (S % num_heads == 0)
    approx_recip = (cdt == jnp.dtype(jnp.bfloat16))

    kernel = functools.partial(
        _fused_mha_kernel, num_heads=num_heads, head_dim=d, compute_dtype=cdt,
        vals_packed=vals_packed, approx_recip=approx_recip)

    vals_scratch = (pltpu.VMEM((S, D), cdt) if vals_packed
                    else pltpu.VMEM((num_heads, S, d), cdt))

    return pl.pallas_call(
        kernel,
        out_shape=jax.ShapeDtypeStruct((B, S, D), out_dtype),
        grid_spec=pltpu.PrefetchScalarGridSpec(
            num_scalar_prefetch=0,
            grid=(B,),
            in_specs=[
                pl.BlockSpec((1, S, D), lambda b: (b, 0, 0)),
                _resident_spec((3 * D, D), single_buffer_weights),
                _resident_spec((D, D), single_buffer_weights),
            ],
            out_specs=pl.BlockSpec((1, S, D), lambda b: (b, 0, 0)),
            scratch_shapes=[pltpu.VMEM((3 * num_heads, S, d), cdt), vals_scratch],
        ),
        compiler_params=pltpu.CompilerParams(
            dimension_semantics=("parallel",),
            vmem_limit_bytes=_vmem_limit_bytes(
                S, D, num_heads, cdt.itemsize, jnp.dtype(out_dtype).itemsize,
                single_buffer_weights),
        ),
    )(x, w_qkv_perm, w_o)


# ---------------------------------------------------------------------------
# Conservative two-kernel fallback (v2 structure, known-good lowering).
# ---------------------------------------------------------------------------
def _attn_kernel_unfused(x_ref, wqkv_ref, vals_ref, *, num_heads, head_dim):
    H, d = num_heads, head_dim
    D = H * d
    x = x_ref[0]
    qkv = lax.dot_general(x, wqkv_ref[...],
                          dimension_numbers=(((1,), (1,)), ((), ())),
                          preferred_element_type=jnp.float32)
    scale = 1.0 / math.sqrt(d)
    for h in range(H):
        q = qkv[:, h * d:(h + 1) * d] * scale
        k = qkv[:, D + h * d:D + (h + 1) * d]
        v = qkv[:, 2 * D + h * d:2 * D + (h + 1) * d]
        logits = lax.dot_general(q, k,
                                 dimension_numbers=(((1,), (1,)), ((), ())),
                                 preferred_element_type=jnp.float32)
        m = jnp.max(logits, axis=-1, keepdims=True)
        e = jnp.exp(logits - m)
        l = jnp.sum(e, axis=-1, keepdims=True)
        pv = jnp.dot(e.astype(vals_ref.dtype), v.astype(vals_ref.dtype),
                     preferred_element_type=jnp.float32)
        vals_ref[0, h] = (pv * pl.reciprocal(l, approx=False)).astype(vals_ref.dtype)


def _o_proj_kernel(v_ref, wo_ref, out_ref):
    out = lax.dot_general(v_ref[0], wo_ref[...],
                          dimension_numbers=(((1,), (1,)), ((), ())),
                          preferred_element_type=jnp.float32)
    out_ref[0] = out.astype(out_ref.dtype)


def _mha_unfused(x, w_qkv_perm, w_o, num_heads, out_dtype):
    B, S, D = x.shape
    d = D // num_heads
    cdt = jnp.dtype(x.dtype)
    vmem = _vmem_limit_bytes(S, D, num_heads, cdt.itemsize,
                             jnp.dtype(out_dtype).itemsize, False)

    vals = pl.pallas_call(
        functools.partial(_attn_kernel_unfused, num_heads=num_heads, head_dim=d),
        out_shape=jax.ShapeDtypeStruct((B, num_heads, S, d), cdt),
        grid_spec=pltpu.PrefetchScalarGridSpec(
            num_scalar_prefetch=0, grid=(B,),
            in_specs=[pl.BlockSpec((1, S, D), lambda b: (b, 0, 0)),
                      pl.BlockSpec((3 * D, D), lambda b: (0, 0))],
            out_specs=pl.BlockSpec((1, num_heads, S, d), lambda b: (b, 0, 0, 0)),
        ),
        compiler_params=pltpu.CompilerParams(
            dimension_semantics=("parallel",), vmem_limit_bytes=vmem),
    )(x, w_qkv_perm)

    vals_flat = vals.reshape(B, S, D)   # module's no-transpose, row-major reshape

    return pl.pallas_call(
        _o_proj_kernel,
        out_shape=jax.ShapeDtypeStruct((B, S, D), out_dtype),
        grid_spec=pltpu.PrefetchScalarGridSpec(
            num_scalar_prefetch=0, grid=(B,),
            in_specs=[pl.BlockSpec((1, S, D), lambda b: (b, 0, 0)),
                      pl.BlockSpec((D, D), lambda b: (0, 0))],
            out_specs=pl.BlockSpec((1, S, D), lambda b: (b, 0, 0)),
        ),
        compiler_params=pltpu.CompilerParams(
            dimension_semantics=("parallel",), vmem_limit_bytes=vmem),
    )(vals_flat, w_o)


# ---------------------------------------------------------------------------
# Wrapper
# ---------------------------------------------------------------------------
def multi_head_attention(x, w_qkv, w_o, num_heads, compute_dtype=None):
    """Self-attention forward matching the PyTorch module.

    compute_dtype=None -> exact path in x.dtype; jnp.bfloat16 -> bf16 MXU path
    (f32 accumulation), ~1e-2-level differences vs the f32 reference.
    """
    B, S, D = x.shape
    assert D % num_heads == 0
    d = D // num_heads
    out_dtype = x.dtype
    cdt = jnp.dtype(out_dtype if compute_dtype is None else compute_dtype)

    # One-time weight permutation (exact: pure row reorder).  PyTorch layout is
    # [q_h0|k_h0|v_h0 | q_h1|k_h1|v_h1 | ...]; regroup to [Q_all | K_all | V_all]
    # (head-major inside each block) so per-head slices of the projection live
    # at h*d offsets inside D-wide macro blocks.
    w_qkv_perm = (w_qkv.reshape(num_heads, 3, d, D)
                  .transpose(1, 0, 2, 3).reshape(3 * D, D))

    x_c = x.astype(cdt)
    wqkv_c = w_qkv_perm.astype(cdt)
    wo_c = w_o.astype(cdt)

    # Primary: fully fused kernel with single-buffered resident weights.
    # Fallback ladder only exists so the script still runs if a Mosaic feature
    # (Buffered(1) / in-kernel relayout) is unavailable on this build.
    attempts = (
        lambda: _mha_fused(x_c, wqkv_c, wo_c, num_heads, out_dtype,
                           single_buffer_weights=True),
        lambda: _mha_fused(x_c, wqkv_c, wo_c, num_heads, out_dtype,
                           single_buffer_weights=False),
        lambda: _mha_unfused(x_c, wqkv_c, wo_c, num_heads, out_dtype),
    )
    last_err = None
    for attempt in attempts:
        try:
            return jax.block_until_ready(attempt())
        except Exception as err:  # noqa: BLE001 — deliberate graceful degradation
            last_err = err
    raise last_err


# ---------------------------------------------------------------------------
# Pure-JAX reference (mirrors the PyTorch code path), used for validation.
# ---------------------------------------------------------------------------
def _reference(x, w_qkv, w_o, num_heads):
    B, S, D = x.shape
    d = D // num_heads
    qkv = x @ w_qkv.T                               # (B, S, 3*H*d)
    qkv = qkv.reshape(B, S, num_heads, 3 * d)
    q, k, v = qkv[..., :d], qkv[..., d:2 * d], qkv[..., 2 * d:]
    q = q.transpose(0, 2, 1, 3)
    k = k.transpose(0, 2, 1, 3)
    v = v.transpose(0, 2, 1, 3)
    logits = jnp.einsum("bhqd,bhkd->bhqk", q, k) / math.sqrt(d)
    attn = jax.nn.softmax(logits, axis=-1)
    vals = jnp.einsum("bhqk,bhkd->bhqd", attn, v)   # (B, H, S, d)
    vals = vals.reshape(B, S, D)                    # same (no-transpose) reshape
    return vals @ w_o.T


def _xavier_uniform(key, shape):
    fan_out, fan_in = shape                         # nn.Linear weight: (out, in)
    bound = math.sqrt(6.0 / (fan_in + fan_out))
    return jax.random.uniform(key, shape, jnp.float32, minval=-bound, maxval=bound)


if __name__ == "__main__":
    # Small shapes consistent with the module: batch=2, seq=8, hidden=32, heads=4
    B, S, D, H = 2, 8, 32, 4

    key = jax.random.PRNGKey(0)
    kx, kqkv, ko = jax.random.split(key, 3)

    x = jax.random.normal(kx, (B, S, D), dtype=jnp.float32)
    w_qkv = _xavier_uniform(kqkv, (3 * D, D))       # qkv_proj.weight
    w_o = _xavier_uniform(ko, (D, D))               # o_proj.weight

    ref = _reference(x, w_qkv, w_o, H)

    # Exact (f32) path.
    out = multi_head_attention(x, w_qkv, w_o, H)
    out = jax.block_until_ready(out)
    assert out.shape == (B, S, D)
    assert jnp.allclose(out, ref, atol=1e-5, rtol=1e-5), "f32 path mismatch vs reference"

    # bf16 MXU path (per perf review); looser tolerance by construction.
    out_bf16 = multi_head_attention(x, w_qkv, w_o, H, compute_dtype=jnp.bfloat16)
    out_bf16 = jax.block_until_ready(out_bf16)
    assert jnp.allclose(out_bf16, ref, atol=5e-2, rtol=5e-2), "bf16 path mismatch vs reference"

    print("KERNEL_OK")
</pallas_src>

<mosaic_0001>
module attributes {stable_mosaic.version = 11 : i64} {
  func.func @_fused_mha_kernel(%arg0: i32, %arg1: memref<1x8x32xf32, #tpu.memory_space<vmem>>, %arg2: memref<96x32xf32, #tpu.memory_space<vmem>>, %arg3: memref<32x32xf32, #tpu.memory_space<vmem>>, %arg4: memref<1x8x32xf32, #tpu.memory_space<vmem>>, %arg5: memref<12x8x8xf32, #tpu.memory_space<vmem>>, %arg6: memref<8x32xf32, #tpu.memory_space<vmem>>) attributes {dimension_semantics = [#tpu.dimension_semantics<parallel>], iteration_bounds = array<i64: 2>, scalar_prefetch = 0 : i64, scratch_operands = 2 : i64, tpu.core_type = #tpu.core_type<tc>, window_params = [{transform_indices = @transform_0, window_bounds = array<i64: 1, 8, 32>}, {pipeline_mode = #tpu.pipeline_mode<synchronous>, transform_indices = @transform_1, window_bounds = array<i64: 96, 32>}, {pipeline_mode = #tpu.pipeline_mode<synchronous>, transform_indices = @transform_2, window_bounds = array<i64: 32, 32>}, {transform_indices = @transform_3, window_bounds = array<i64: 1, 8, 32>}]} {
    %c0 = arith.constant 0 : index
    %c0_0 = arith.constant 0 : index
    %c0_1 = arith.constant 0 : index
    %0 = vector.load %arg1[%c0, %c0_0, %c0_1] : memref<1x8x32xf32, #tpu.memory_space<vmem>>, vector<1x8x32xf32>
    %1 = vector.shape_cast %0 : vector<1x8x32xf32> to vector<8x32xf32>
    %c0_2 = arith.constant 0 : index
    %c0_3 = arith.constant 0 : index
    %2 = vector.load %arg2[%c0_2, %c0_3] : memref<96x32xf32, #tpu.memory_space<vmem>>, vector<96x32xf32>
    %cst = arith.constant dense<0.000000e+00> : vector<8x96xf32>
    %3 = tpu.matmul %1, %2, %cst {dimension_numbers = #tpu.dot_dimension_numbers<[1], [1], [0], [0], [0, 0, 1, 0], [], []>} : vector<8x32xf32>, vector<96x32xf32>, vector<8x96xf32> -> vector<8x96xf32>
    %4 = vector.extract_strided_slice %3 {offsets = [0, 0], sizes = [8, 8], strides = [1, 1]} : vector<8x96xf32> to vector<8x8xf32>
    %5 = vector.extract_strided_slice %3 {offsets = [0, 32], sizes = [8, 8], strides = [1, 1]} : vector<8x96xf32> to vector<8x8xf32>
    %6 = vector.extract_strided_slice %3 {offsets = [0, 64], sizes = [8, 8], strides = [1, 1]} : vector<8x96xf32> to vector<8x8xf32>
    %cst_4 = arith.constant 0.353553385 : f32
    %7 = vector.broadcast %cst_4 : f32 to vector<8x8xf32>
    %8 = arith.mulf %4, %7 : vector<8x8xf32>
    %c0_5 = arith.constant 0 : index
    %c0_6 = arith.constant 0 : index
    %c0_7 = arith.constant 0 : index
    %9 = vector.load %arg5[%c0_5, %c0_6, %c0_7] : memref<12x8x8xf32, #tpu.memory_space<vmem>>, vector<1x8x8xf32>
    %10 = vector.shape_cast %9 : vector<1x8x8xf32> to vector<8x8xf32>
    %11 = vector.shape_cast %8 : vector<8x8xf32> to vector<1x8x8xf32>
    tpu.vector_store %arg5[%c0_5, %c0_6, %c0_7], %11 {strides = array<i32>} : memref<12x8x8xf32, #tpu.memory_space<vmem>>, vector<1x8x8xf32>,
    %c4 = arith.constant 4 : index
    %c0_8 = arith.constant 0 : index
    %c0_9 = arith.constant 0 : index
    %12 = vector.load %arg5[%c4, %c0_8, %c0_9] : memref<12x8x8xf32, #tpu.memory_space<vmem>>, vector<1x8x8xf32>
    %13 = vector.shape_cast %12 : vector<1x8x8xf32> to vector<8x8xf32>
    %14 = vector.shape_cast %5 : vector<8x8xf32> to vector<1x8x8xf32>
    tpu.vector_store %arg5[%c4, %c0_8, %c0_9], %14 {strides = array<i32>} : memref<12x8x8xf32, #tpu.memory_space<vmem>>, vector<1x8x8xf32>,
    %c8 = arith.constant 8 : index
    %c0_10 = arith.constant 0 : index
    %c0_11 = arith.constant 0 : index
    %15 = vector.load %arg5[%c8, %c0_10, %c0_11] : memref<12x8x8xf32, #tpu.memory_space<vmem>>, vector<1x8x8xf32>
    %16 = vector.shape_cast %15 : vector<1x8x8xf32> to vector<8x8xf32>
    %17 = vector.shape_cast %6 : vector<8x8xf32> to vector<1x8x8xf32>
    tpu.vector_store %arg5[%c8, %c0_10, %c0_11], %17 {strides = array<i32>} : memref<12x8x8xf32, #tpu.memory_space<vmem>>, vector<1x8x8xf32>,
    %18 = vector.extract_strided_slice %3 {offsets = [0, 8], sizes = [8, 8], strides = [1, 1]} : vector<8x96xf32> to vector<8x8xf32>
    %19 = vector.extract_strided_slice %3 {offsets = [0, 40], sizes = [8, 8], strides = [1, 1]} : vector<8x96xf32> to vector<8x8xf32>
    %20 = vector.extract_strided_slice %3 {offsets = [0, 72], sizes = [8, 8], strides = [1, 1]} : vector<8x96xf32> to vector<8x8xf32>
    %cst_12 = arith.constant 0.353553385 : f32
    %21 = vector.broadcast %cst_12 : f32 to vector<8x8xf32>
    %22 = arith.mulf %18, %21 : vector<8x8xf32>
    %c1 = arith.constant 1 : index
    %c0_13 = arith.constant 0 : index
    %c0_14 = arith.constant 0 : index
    %23 = vector.load %arg5[%c1, %c0_13, %c0_14] : memref<12x8x8xf32, #tpu.memory_space<vmem>>, vector<1x8x8xf32>
    %24 = vector.shape_cast %23 : vector<1x8x8xf32> to vector<8x8xf32>
    %25 = vector.shape_cast %22 : vector<8x8xf32> to vector<1x8x8xf32>
    tpu.vector_store %arg5[%c1, %c0_13, %c0_14], %25 {strides = array<i32>} : memref<12x8x8xf32, #tpu.memory_space<vmem>>, vector<1x8x8xf32>,
    %c5 = arith.constant 5 : index
    %c0_15 = arith.constant 0 : index
    %c0_16 = arith.constant 0 : index
    %26 = vector.load %arg5[%c5, %c0_15, %c0_16] : memref<12x8x8xf32, #tpu.memory_space<vmem>>, vector<1x8x8xf32>
    %27 = vector.shape_cast %26 : vector<1x8x8xf32> to vector<8x8xf32>
    %28 = vector.shape_cast %19 : vector<8x8xf32> to vector<1x8x8xf32>
    tpu.vector_store %arg5[%c5, %c0_15, %c0_16], %28 {strides = array<i32>} : memref<12x8x8xf32, #tpu.memory_space<vmem>>, vector<1x8x8xf32>,
    %c9 = arith.constant 9 : index
    %c0_17 = arith.constant 0 : index
    %c0_18 = arith.constant 0 : index
    %29 = vector.load %arg5[%c9, %c0_17, %c0_18] : memref<12x8x8xf32, #tpu.memory_space<vmem>>, vector<1x8x8xf32>
    %30 = vector.shape_cast %29 : vector<1x8x8xf32> to vector<8x8xf32>
    %31 = vector.shape_cast %20 : vector<8x8xf32> to vector<1x8x8xf32>
    tpu.vector_store %arg5[%c9, %c0_17, %c0_18], %31 {strides = array<i32>} : memref<12x8x8xf32, #tpu.memory_space<vmem>>, vector<1x8x8xf32>,
    %32 = vector.extract_strided_slice %3 {offsets = [0, 16], sizes = [8, 8], strides = [1, 1]} : vector<8x96xf32> to vector<8x8xf32>
    %33 = vector.extract_strided_slice %3 {offsets = [0, 48], sizes = [8, 8], strides = [1, 1]} : vector<8x96xf32> to vector<8x8xf32>
    %34 = vector.extract_strided_slice %3 {offsets = [0, 80], sizes = [8, 8], strides = [1, 1]} : vector<8x96xf32> to vector<8x8xf32>
    %cst_19 = arith.constant 0.353553385 : f32
    %35 = vector.broadcast %cst_19 : f32 to vector<8x8xf32>
    %36 = arith.mulf %32, %35 : vector<8x8xf32>
    %c2 = arith.constant 2 : index
    %c0_20 = arith.constant 0 : index
    %c0_21 = arith.constant 0 : index
    %37 = vector.load %arg5[%c2, %c0_20, %c0_21] : memref<12x8x8xf32, #tpu.memory_space<vmem>>, vector<1x8x8xf32>
    %38 = vector.shape_cast %37 : vector<1x8x8xf32> to vector<8x8xf32>
    %39 = vector.shape_cast %36 : vector<8x8xf32> to vector<1x8x8xf32>
    tpu.vector_store %arg5[%c2, %c0_20, %c0_21], %39 {strides = array<i32>} : memref<12x8x8xf32, #tpu.memory_space<vmem>>, vector<1x8x8xf32>,
    %c6 = arith.constant 6 : index
    %c0_22 = arith.constant 0 : index
    %c0_23 = arith.constant 0 : index
    %40 = vector.load %arg5[%c6, %c0_22, %c0_23] : memref<12x8x8xf32, #tpu.memory_space<vmem>>, vector<1x8x8xf32>
    %41 = vector.shape_cast %40 : vector<1x8x8xf32> to vector<8x8xf32>
    %42 = vector.shape_cast %33 : vector<8x8xf32> to vector<1x8x8xf32>
    tpu.vector_store %arg5[%c6, %c0_22, %c0_23], %42 {strides = array<i32>} : memref<12x8x8xf32, #tpu.memory_space<vmem>>, vector<1x8x8xf32>,
    %c10 = arith.constant 10 : index
    %c0_24 = arith.constant 0 : index
    %c0_25 = arith.constant 0 : index
    %43 = vector.load %arg5[%c10, %c0_24, %c0_25] : memref<12x8x8xf32, #tpu.memory_space<vmem>>, vector<1x8x8xf32>
    %44 = vector.shape_cast %43 : vector<1x8x8xf32> to vector<8x8xf32>
    %45 = vector.shape_cast %34 : vector<8x8xf32> to vector<1x8x8xf32>
    tpu.vector_store %arg5[%c10, %c0_24, %c0_25], %45 {strides = array<i32>} : memref<12x8x8xf32, #tpu.memory_space<vmem>>, vector<1x8x8xf32>,
    %46 = vector.extract_strided_slice %3 {offsets = [0, 24], sizes = [8, 8], strides = [1, 1]} : vector<8x96xf32> to vector<8x8xf32>
    %47 = vector.extract_strided_slice %3 {offsets = [0, 56], sizes = [8, 8], strides = [1, 1]} : vector<8x96xf32> to vector<8x8xf32>
    %48 = vector.extract_strided_slice %3 {offsets = [0, 88], sizes = [8, 8], strides = [1, 1]} : vector<8x96xf32> to vector<8x8xf32>
    %cst_26 = arith.constant 0.353553385 : f32
    %49 = vector.broadcast %cst_26 : f32 to vector<8x8xf32>
    %50 = arith.mulf %46, %49 : vector<8x8xf32>
    %c3 = arith.constant 3 : index
    %c0_27 = arith.constant 0 : index
    %c0_28 = arith.constant 0 : index
    %51 = vector.load %arg5[%c3, %c0_27, %c0_28] : memref<12x8x8xf32, #tpu.memory_space<vmem>>, vector<1x8x8xf32>
    %52 = vector.shape_cast %51 : vector<1x8x8xf32> to vector<8x8xf32>
    %53 = vector.shape_cast %50 : vector<8x8xf32> to vector<1x8x8xf32>
    tpu.vector_store %arg5[%c3, %c0_27, %c0_28], %53 {strides = array<i32>} : memref<12x8x8xf32, #tpu.memory_space<vmem>>, vector<1x8x8xf32>,
    %c7 = arith.constant 7 : index
    %c0_29 = arith.constant 0 : index
    %c0_30 = arith.constant 0 : index
    %54 = vector.load %arg5[%c7, %c0_29, %c0_30] : memref<12x8x8xf32, #tpu.memory_space<vmem>>, vector<1x8x8xf32>
    %55 = vector.shape_cast %54 : vector<1x8x8xf32> to vector<8x8xf32>
    %56 = vector.shape_cast %47 : vector<8x8xf32> to vector<1x8x8xf32>
    tpu.vector_store %arg5[%c7, %c0_29, %c0_30], %56 {strides = array<i32>} : memref<12x8x8xf32, #tpu.memory_space<vmem>>, vector<1x8x8xf32>,
    %c11 = arith.constant 11 : index
    %c0_31 = arith.constant 0 : index
    %c0_32 = arith.constant 0 : index
    %57 = vector.load %arg5[%c11, %c0_31, %c0_32] : memref<12x8x8xf32, #tpu.memory_space<vmem>>, vector<1x8x8xf32>
    %58 = vector.shape_cast %57 : vector<1x8x8xf32> to vector<8x8xf32>
    %59 = vector.shape_cast %48 : vector<8x8xf32> to vector<1x8x8xf32>
    tpu.vector_store %arg5[%c11, %c0_31, %c0_32], %59 {strides = array<i32>} : memref<12x8x8xf32, #tpu.memory_space<vmem>>, vector<1x8x8xf32>,
    %c0_i32 = arith.constant 0 : i32
    %60 = arith.index_cast %c0_i32 : i32 to index
    %c0_33 = arith.constant 0 : index
    %c0_34 = arith.constant 0 : index
    %61 = vector.load %arg5[%60, %c0_33, %c0_34] : memref<12x8x8xf32, #tpu.memory_space<vmem>>, vector<1x8x8xf32>
    %62 = vector.shape_cast %61 : vector<1x8x8xf32> to vector<8x8xf32>
    %c4_i32 = arith.constant 4 : i32
    %63 = arith.addi %c4_i32, %c0_i32 : i32
    %64 = arith.index_cast %63 : i32 to index
    %c0_35 = arith.constant 0 : index
    %c0_36 = arith.constant 0 : index
    %65 = vector.load %arg5[%64, %c0_35, %c0_36] : memref<12x8x8xf32, #tpu.memory_space<vmem>>, vector<1x8x8xf32>
    %66 = vector.shape_cast %65 : vector<1x8x8xf32> to vector<8x8xf32>
    %c8_i32 = arith.constant 8 : i32
    %67 = arith.addi %c8_i32, %c0_i32 : i32
    %68 = arith.index_cast %67 : i32 to index
    %c0_37 = arith.constant 0 : index
    %c0_38 = arith.constant 0 : index
    %69 = vector.load %arg5[%68, %c0_37, %c0_38] : memref<12x8x8xf32, #tpu.memory_space<vmem>>, vector<1x8x8xf32>
    %70 = vector.shape_cast %69 : vector<1x8x8xf32> to vector<8x8xf32>
    %cst_39 = arith.constant dense<0.000000e+00> : vector<8x8xf32>
    %71 = tpu.matmul %62, %66, %cst_39 {dimension_numbers = #tpu.dot_dimension_numbers<[1], [1], [0], [0], [0, 0, 1, 0], [], []>} : vector<8x8xf32>, vector<8x8xf32>, vector<8x8xf32> -> vector<8x8xf32>
    %cst_40 = arith.constant dense<0xFF800000> : vector<8xf32>
    %72 = vector.multi_reduction <maximumf>, %71, %cst_40 [1] : vector<8x8xf32> to vector<8xf32>
    %73 = vector.shape_cast %72 : vector<8xf32> to vector<8x1xf32>
    %74 = vector.broadcast %73 : vector<8x1xf32> to vector<8x8xf32>
    %75 = arith.subf %71, %74 : vector<8x8xf32>
    %76 = math.exp %75 : vector<8x8xf32>
    %cst_41 = arith.constant dense<0.000000e+00> : vector<8xf32>
    %77 = vector.multi_reduction <add>, %76, %cst_41 [1] : vector<8x8xf32> to vector<8xf32>
    %78 = vector.shape_cast %77 : vector<8xf32> to vector<8x1xf32>
    %cst_42 = arith.constant dense<0.000000e+00> : vector<8x8xf32>
    %79 = tpu.matmul %76, %70, %cst_42 {dimension_numbers = #tpu.dot_dimension_numbers<[1], [0], [0], [1], [0, 0, 1, 1], [], []>} : vector<8x8xf32>, vector<8x8xf32>, vector<8x8xf32> -> vector<8x8xf32>
    %80 = tpu.reciprocal %78 : vector<8x1xf32> -> vector<8x1xf32>
    %81 = vector.broadcast %80 : vector<8x1xf32> to vector<8x8xf32>
    %82 = arith.mulf %79, %81 : vector<8x8xf32>
    %83 = vector.shape_cast %82 : vector<8x8xf32> to vector<2x4x8xf32>
    %84 = vector.extract_strided_slice %83 {offsets = [0, 0, 0], sizes = [2, 1, 8], strides = [1, 1, 1]} : vector<2x4x8xf32> to vector<2x1x8xf32>
    %85 = vector.shape_cast %84 : vector<2x1x8xf32> to vector<2x8xf32>
    %86 = vector.extract_strided_slice %83 {offsets = [0, 1, 0], sizes = [2, 1, 8], strides = [1, 1, 1]} : vector<2x4x8xf32> to vector<2x1x8xf32>
    %87 = vector.shape_cast %86 : vector<2x1x8xf32> to vector<2x8xf32>
    %88 = vector.extract_strided_slice %83 {offsets = [0, 2, 0], sizes = [2, 1, 8], strides = [1, 1, 1]} : vector<2x4x8xf32> to vector<2x1x8xf32>
    %89 = vector.shape_cast %88 : vector<2x1x8xf32> to vector<2x8xf32>
    %90 = vector.extract_strided_slice %83 {offsets = [0, 3, 0], sizes = [2, 1, 8], strides = [1, 1, 1]} : vector<2x4x8xf32> to vector<2x1x8xf32>
    %91 = vector.shape_cast %90 : vector<2x1x8xf32> to vector<2x8xf32>
    %92 = tpu.concatenate %85, %87, %89, %91 in 1 : vector<2x8xf32>, vector<2x8xf32>, vector<2x8xf32>, vector<2x8xf32> -> vector<2x32xf32>
    %c2_i32 = arith.constant 2 : i32
    %93 = arith.muli %c0_i32, %c2_i32 : i32
    %94 = arith.index_cast %93 : i32 to index
    %c0_43 = arith.constant 0 : index
    %95 = vector.load %arg6[%94, %c0_43] : memref<8x32xf32, #tpu.memory_space<vmem>>, vector<2x32xf32>
    tpu.vector_store %arg6[%94, %c0_43], %92 {strides = array<i32>} : memref<8x32xf32, #tpu.memory_space<vmem>>, vector<2x32xf32>,
    %c1_i32 = arith.constant 1 : i32
    %96 = arith.index_cast %c1_i32 : i32 to index
    %c0_44 = arith.constant 0 : index
    %c0_45 = arith.constant 0 : index
    %97 = vector.load %arg5[%96, %c0_44, %c0_45] : memref<12x8x8xf32, #tpu.memory_space<vmem>>, vector<1x8x8xf32>
    %98 = vector.shape_cast %97 : vector<1x8x8xf32> to vector<8x8xf32>
    %c4_i32_46 = arith.constant 4 : i32
    %99 = arith.addi %c4_i32_46, %c1_i32 : i32
    %100 = arith.index_cast %99 : i32 to index
    %c0_47 = arith.constant 0 : index
    %c0_48 = arith.constant 0 : index
    %101 = vector.load %arg5[%100, %c0_47, %c0_48] : memref<12x8x8xf32, #tpu.memory_space<vmem>>, vector<1x8x8xf32>
    %102 = vector.shape_cast %101 : vector<1x8x8xf32> to vector<8x8xf32>
    %c8_i32_49 = arith.constant 8 : i32
    %103 = arith.addi %c8_i32_49, %c1_i32 : i32
    %104 = arith.index_cast %103 : i32 to index
    %c0_50 = arith.constant 0 : index
    %c0_51 = arith.constant 0 : index
    %105 = vector.load %arg5[%104, %c0_50, %c0_51] : memref<12x8x8xf32, #tpu.memory_space<vmem>>, vector<1x8x8xf32>
    %106 = vector.shape_cast %105 : vector<1x8x8xf32> to vector<8x8xf32>
    %cst_52 = arith.constant dense<0.000000e+00> : vector<8x8xf32>
    %107 = tpu.matmul %98, %102, %cst_52 {dimension_numbers = #tpu.dot_dimension_numbers<[1], [1], [0], [0], [0, 0, 1, 0], [], []>} : vector<8x8xf32>, vector<8x8xf32>, vector<8x8xf32> -> vector<8x8xf32>
    %cst_53 = arith.constant dense<0xFF800000> : vector<8xf32>
    %108 = vector.multi_reduction <maximumf>, %107, %cst_53 [1] : vector<8x8xf32> to vector<8xf32>
    %109 = vector.shape_cast %108 : vector<8xf32> to vector<8x1xf32>
    %110 = vector.broadcast %109 : vector<8x1xf32> to vector<8x8xf32>
    %111 = arith.subf %107, %110 : vector<8x8xf32>
    %112 = math.exp %111 : vector<8x8xf32>
    %cst_54 = arith.constant dense<0.000000e+00> : vector<8xf32>
    %113 = vector.multi_reduction <add>, %112, %cst_54 [1] : vector<8x8xf32> to vector<8xf32>
    %114 = vector.shape_cast %113 : vector<8xf32> to vector<8x1xf32>
    %cst_55 = arith.constant dense<0.000000e+00> : vector<8x8xf32>
    %115 = tpu.matmul %112, %106, %cst_55 {dimension_numbers = #tpu.dot_dimension_numbers<[1], [0], [0], [1], [0, 0, 1, 1], [], []>} : vector<8x8xf32>, vector<8x8xf32>, vector<8x8xf32> -> vector<8x8xf32>
    %116 = tpu.reciprocal %114 : vector<8x1xf32> -> vector<8x1xf32>
    %117 = vector.broadcast %116 : vector<8x1xf32> to vector<8x8xf32>
    %118 = arith.mulf %115, %117 : vector<8x8xf32>
    %119 = vector.shape_cast %118 : vector<8x8xf32> to vector<2x4x8xf32>
    %120 = vector.extract_strided_slice %119 {offsets = [0, 0, 0], sizes = [2, 1, 8], strides = [1, 1, 1]} : vector<2x4x8xf32> to vector<2x1x8xf32>
    %121 = vector.shape_cast %120 : vector<2x1x8xf32> to vector<2x8xf32>
    %122 = vector.extract_strided_slice %119 {offsets = [0, 1, 0], sizes = [2, 1, 8], strides = [1, 1, 1]} : vector<2x4x8xf32> to vector<2x1x8xf32>
    %123 = vector.shape_cast %122 : vector<2x1x8xf32> to vector<2x8xf32>
    %124 = vector.extract_strided_slice %119 {offsets = [0, 2, 0], sizes = [2, 1, 8], strides = [1, 1, 1]} : vector<2x4x8xf32> to vector<2x1x8xf32>
    %125 = vector.shape_cast %124 : vector<2x1x8xf32> to vector<2x8xf32>
    %126 = vector.extract_strided_slice %119 {offsets = [0, 3, 0], sizes = [2, 1, 8], strides = [1, 1, 1]} : vector<2x4x8xf32> to vector<2x1x8xf32>
    %127 = vector.shape_cast %126 : vector<2x1x8xf32> to vector<2x8xf32>
    %128 = tpu.concatenate %121, %123, %125, %127 in 1 : vector<2x8xf32>, vector<2x8xf32>, vector<2x8xf32>, vector<2x8xf32> -> vector<2x32xf32>
    %c2_i32_56 = arith.constant 2 : i32
    %129 = arith.muli %c1_i32, %c2_i32_56 : i32
    %130 = arith.index_cast %129 : i32 to index
    %c0_57 = arith.constant 0 : index
    %131 = vector.load %arg6[%130, %c0_57] : memref<8x32xf32, #tpu.memory_space<vmem>>, vector<2x32xf32>
    tpu.vector_store %arg6[%130, %c0_57], %128 {strides = array<i32>} : memref<8x32xf32, #tpu.memory_space<vmem>>, vector<2x32xf32>,
    %c2_i32_58 = arith.constant 2 : i32
    %132 = arith.index_cast %c2_i32_58 : i32 to index
    %c0_59 = arith.constant 0 : index
    %c0_60 = arith.constant 0 : index
    %133 = vector.load %arg5[%132, %c0_59, %c0_60] : memref<12x8x8xf32, #tpu.memory_space<vmem>>, vector<1x8x8xf32>
    %134 = vector.shape_cast %133 : vector<1x8x8xf32> to vector<8x8xf32>
    %c4_i32_61 = arith.constant 4 : i32
    %135 = arith.addi %c4_i32_61, %c2_i32_58 : i32
    %136 = arith.index_cast %135 : i32 to index
    %c0_62 = arith.constant 0 : index
    %c0_63 = arith.constant 0 : index
    %137 = vector.load %arg5[%136, %c0_62, %c0_63] : memref<12x8x8xf32, #tpu.memory_space<vmem>>, vector<1x8x8xf32>
    %138 = vector.shape_cast %137 : vector<1x8x8xf32> to vector<8x8xf32>
    %c8_i32_64 = arith.constant 8 : i32
    %139 = arith.addi %c8_i32_64, %c2_i32_58 : i32
    %140 = arith.index_cast %139 : i32 to index
    %c0_65 = arith.constant 0 : index
    %c0_66 = arith.constant 0 : index
    %141 = vector.load %arg5[%140, %c0_65, %c0_66] : memref<12x8x8xf32, #tpu.memory_space<vmem>>, vector<1x8x8xf32>
    %142 = vector.shape_cast %141 : vector<1x8x8xf32> to vector<8x8xf32>
    %cst_67 = arith.constant dense<0.000000e+00> : vector<8x8xf32>
    %143 = tpu.matmul %134, %138, %cst_67 {dimension_numbers = #tpu.dot_dimension_numbers<[1], [1], [0], [0], [0, 0, 1, 0], [], []>} : vector<8x8xf32>, vector<8x8xf32>, vector<8x8xf32> -> vector<8x8xf32>
    %cst_68 = arith.constant dense<0xFF800000> : vector<8xf32>
    %144 = vector.multi_reduction <maximumf>, %143, %cst_68 [1] : vector<8x8xf32> to vector<8xf32>
    %145 = vector.shape_cast %144 : vector<8xf32> to vector<8x1xf32>
    %146 = vector.broadcast %145 : vector<8x1xf32> to vector<8x8xf32>
    %147 = arith.subf %143, %146 : vector<8x8xf32>
    %148 = math.exp %147 : vector<8x8xf32>
    %cst_69 = arith.constant dense<0.000000e+00> : vector<8xf32>
    %149 = vector.multi_reduction <add>, %148, %cst_69 [1] : vector<8x8xf32> to vector<8xf32>
    %150 = vector.shape_cast %149 : vector<8xf32> to vector<8x1xf32>
    %cst_70 = arith.constant dense<0.000000e+00> : vector<8x8xf32>
    %151 = tpu.matmul %148, %142, %cst_70 {dimension_numbers = #tpu.dot_dimension_numbers<[1], [0], [0], [1], [0, 0, 1, 1], [], []>} : vector<8x8xf32>, vector<8x8xf32>, vector<8x8xf32> -> vector<8x8xf32>
    %152 = tpu.reciprocal %150 : vector<8x1xf32> -> vector<8x1xf32>
    %153 = vector.broadcast %152 : vector<8x1xf32> to vector<8x8xf32>
    %154 = arith.mulf %151, %153 : vector<8x8xf32>
    %155 = vector.shape_cast %154 : vector<8x8xf32> to vector<2x4x8xf32>
    %156 = vector.extract_strided_slice %155 {offsets = [0, 0, 0], sizes = [2, 1, 8], strides = [1, 1, 1]} : vector<2x4x8xf32> to vector<2x1x8xf32>
    %157 = vector.shape_cast %156 : vector<2x1x8xf32> to vector<2x8xf32>
    %158 = vector.extract_strided_slice %155 {offsets = [0, 1, 0], sizes = [2, 1, 8], strides = [1, 1, 1]} : vector<2x4x8xf32> to vector<2x1x8xf32>
    %159 = vector.shape_cast %158 : vector<2x1x8xf32> to vector<2x8xf32>
    %160 = vector.extract_strided_slice %155 {offsets = [0, 2, 0], sizes = [2, 1, 8], strides = [1, 1, 1]} : vector<2x4x8xf32> to vector<2x1x8xf32>
    %161 = vector.shape_cast %160 : vector<2x1x8xf32> to vector<2x8xf32>
    %162 = vector.extract_strided_slice %155 {offsets = [0, 3, 0], sizes = [2, 1, 8], strides = [1, 1, 1]} : vector<2x4x8xf32> to vector<2x1x8xf32>
    %163 = vector.shape_cast %162 : vector<2x1x8xf32> to vector<2x8xf32>
    %164 = tpu.concatenate %157, %159, %161, %163 in 1 : vector<2x8xf32>, vector<2x8xf32>, vector<2x8xf32>, vector<2x8xf32> -> vector<2x32xf32>
    %c2_i32_71 = arith.constant 2 : i32
    %165 = arith.muli %c2_i32_58, %c2_i32_71 : i32
    %166 = arith.index_cast %165 : i32 to index
    %c0_72 = arith.constant 0 : index
    %167 = vector.load %arg6[%166, %c0_72] : memref<8x32xf32, #tpu.memory_space<vmem>>, vector<2x32xf32>
    tpu.vector_store %arg6[%166, %c0_72], %164 {strides = array<i32>} : memref<8x32xf32, #tpu.memory_space<vmem>>, vector<2x32xf32>,
    %c3_i32 = arith.constant 3 : i32
    %168 = arith.index_cast %c3_i32 : i32 to index
    %c0_73 = arith.constant 0 : index
    %c0_74 = arith.constant 0 : index
    %169 = vector.load %arg5[%168, %c0_73, %c0_74] : memref<12x8x8xf32, #tpu.memory_space<vmem>>, vector<1x8x8xf32>
    %170 = vector.shape_cast %169 : vector<1x8x8xf32> to vector<8x8xf32>
    %c4_i32_75 = arith.constant 4 : i32
    %171 = arith.addi %c4_i32_75, %c3_i32 : i32
    %172 = arith.index_cast %171 : i32 to index
    %c0_76 = arith.constant 0 : index
    %c0_77 = arith.constant 0 : index
    %173 = vector.load %arg5[%172, %c0_76, %c0_77] : memref<12x8x8xf32, #tpu.memory_space<vmem>>, vector<1x8x8xf32>
    %174 = vector.shape_cast %173 : vector<1x8x8xf32> to vector<8x8xf32>
    %c8_i32_78 = arith.constant 8 : i32
    %175 = arith.addi %c8_i32_78, %c3_i32 : i32
    %176 = arith.index_cast %175 : i32 to index
    %c0_79 = arith.constant 0 : index
    %c0_80 = arith.constant 0 : index
    %177 = vector.load %arg5[%176, %c0_79, %c0_80] : memref<12x8x8xf32, #tpu.memory_space<vmem>>, vector<1x8x8xf32>
    %178 = vector.shape_cast %177 : vector<1x8x8xf32> to vector<8x8xf32>
    %cst_81 = arith.constant dense<0.000000e+00> : vector<8x8xf32>
    %179 = tpu.matmul %170, %174, %cst_81 {dimension_numbers = #tpu.dot_dimension_numbers<[1], [1], [0], [0], [0, 0, 1, 0], [], []>} : vector<8x8xf32>, vector<8x8xf32>, vector<8x8xf32> -> vector<8x8xf32>
    %cst_82 = arith.constant dense<0xFF800000> : vector<8xf32>
    %180 = vector.multi_reduction <maximumf>, %179, %cst_82 [1] : vector<8x8xf32> to vector<8xf32>
    %181 = vector.shape_cast %180 : vector<8xf32> to vector<8x1xf32>
    %182 = vector.broadcast %181 : vector<8x1xf32> to vector<8x8xf32>
    %183 = arith.subf %179, %182 : vector<8x8xf32>
    %184 = math.exp %183 : vector<8x8xf32>
    %cst_83 = arith.constant dense<0.000000e+00> : vector<8xf32>
    %185 = vector.multi_reduction <add>, %184, %cst_83 [1] : vector<8x8xf32> to vector<8xf32>
    %186 = vector.shape_cast %185 : vector<8xf32> to vector<8x1xf32>
    %cst_84 = arith.constant dense<0.000000e+00> : vector<8x8xf32>
    %187 = tpu.matmul %184, %178, %cst_84 {dimension_numbers = #tpu.dot_dimension_numbers<[1], [0], [0], [1], [0, 0, 1, 1], [], []>} : vector<8x8xf32>, vector<8x8xf32>, vector<8x8xf32> -> vector<8x8xf32>
    %188 = tpu.reciprocal %186 : vector<8x1xf32> -> vector<8x1xf32>
    %189 = vector.broadcast %188 : vector<8x1xf32> to vector<8x8xf32>
    %190 = arith.mulf %187, %189 : vector<8x8xf32>
    %191 = vector.shape_cast %190 : vector<8x8xf32> to vector<2x4x8xf32>
    %192 = vector.extract_strided_slice %191 {offsets = [0, 0, 0], sizes = [2, 1, 8], strides = [1, 1, 1]} : vector<2x4x8xf32> to vector<2x1x8xf32>
    %193 = vector.shape_cast %192 : vector<2x1x8xf32> to vector<2x8xf32>
    %194 = vector.extract_strided_slice %191 {offsets = [0, 1, 0], sizes = [2, 1, 8], strides = [1, 1, 1]} : vector<2x4x8xf32> to vector<2x1x8xf32>
    %195 = vector.shape_cast %194 : vector<2x1x8xf32> to vector<2x8xf32>
    %196 = vector.extract_strided_slice %191 {offsets = [0, 2, 0], sizes = [2, 1, 8], strides = [1, 1, 1]} : vector<2x4x8xf32> to vector<2x1x8xf32>
    %197 = vector.shape_cast %196 : vector<2x1x8xf32> to vector<2x8xf32>
    %198 = vector.extract_strided_slice %191 {offsets = [0, 3, 0], sizes = [2, 1, 8], strides = [1, 1, 1]} : vector<2x4x8xf32> to vector<2x1x8xf32>
    %199 = vector.shape_cast %198 : vector<2x1x8xf32> to vector<2x8xf32>
    %200 = tpu.concatenate %193, %195, %197, %199 in 1 : vector<2x8xf32>, vector<2x8xf32>, vector<2x8xf32>, vector<2x8xf32> -> vector<2x32xf32>
    %c2_i32_85 = arith.constant 2 : i32
    %201 = arith.muli %c3_i32, %c2_i32_85 : i32
    %202 = arith.index_cast %201 : i32 to index
    %c0_86 = arith.constant 0 : index
    %203 = vector.load %arg6[%202, %c0_86] : memref<8x32xf32, #tpu.memory_space<vmem>>, vector<2x32xf32>
    tpu.vector_store %arg6[%202, %c0_86], %200 {strides = array<i32>} : memref<8x32xf32, #tpu.memory_space<vmem>>, vector<2x32xf32>,
    %c4_i32_87 = arith.constant 4 : i32
    %c0_88 = arith.constant 0 : index
    %c0_89 = arith.constant 0 : index
    %204 = vector.load %arg6[%c0_88, %c0_89] : memref<8x32xf32, #tpu.memory_space<vmem>>, vector<8x32xf32>
    %c0_90 = arith.constant 0 : index
    %c0_91 = arith.constant 0 : index
    %205 = vector.load %arg3[%c0_90, %c0_91] : memref<32x32xf32, #tpu.memory_space<vmem>>, vector<32x32xf32>
    %cst_92 = arith.constant dense<0.000000e+00> : vector<8x32xf32>
    %206 = tpu.matmul %204, %205, %cst_92 {dimension_numbers = #tpu.dot_dimension_numbers<[1], [1], [0], [0], [0, 0, 1, 0], [], []>} : vector<8x32xf32>, vector<32x32xf32>, vector<8x32xf32> -> vector<8x32xf32>
    %c0_93 = arith.constant 0 : index
    %c0_94 = arith.constant 0 : index
    %c0_95 = arith.constant 0 : index
    %207 = vector.load %arg4[%c0_93, %c0_94, %c0_95] : memref<1x8x32xf32, #tpu.memory_space<vmem>>, vector<1x8x32xf32>
    %208 = vector.shape_cast %207 : vector<1x8x32xf32> to vector<8x32xf32>
    %209 = vector.shape_cast %206 : vector<8x32xf32> to vector<1x8x32xf32>
    tpu.vector_store %arg4[%c0_93, %c0_94, %c0_95], %209 {strides = array<i32>} : memref<1x8x32xf32, #tpu.memory_space<vmem>>, vector<1x8x32xf32>,
    return
  }
  func.func @transform_0(%arg0: i32) -> (i32, i32, i32) {
    %c0_i32 = arith.constant 0 : i32
    %c0_i32_0 = arith.constant 0 : i32
    %c0_i32_1 = arith.constant 0 : i32
    return %arg0, %c0_i32, %c0_i32_0 : i32, i32, i32
  }
  func.func @transform_1(%arg0: i32) -> (i32, i32) {
    %c0_i32 = arith.constant 0 : i32
    %c0_i32_0 = arith.constant 0 : i32
    %c0_i32_1 = arith.constant 0 : i32
    return %c0_i32, %c0_i32_0 : i32, i32
  }
  func.func @transform_2(%arg0: i32) -> (i32, i32) {
    %c0_i32 = arith.constant 0 : i32
    %c0_i32_0 = arith.constant 0 : i32
    %c0_i32_1 = arith.constant 0 : i32
    return %c0_i32, %c0_i32_0 : i32, i32
  }
  func.func @transform_3(%arg0: i32) -> (i32, i32, i32) {
    %c0_i32 = arith.constant 0 : i32
    %c0_i32_0 = arith.constant 0 : i32
    %c0_i32_1 = arith.constant 0 : i32
    return %arg0, %c0_i32, %c0_i32_0 : i32, i32, i32
  }
}

module attributes {stable_mosaic.version = 11 : i64} {
  func.func @_fused_mha_kernel(%arg0: i32, %arg1: memref<1x8x32xf32, #tpu.memory_space<vmem>>, %arg2: memref<96x32xf32, #tpu.memory_space<vmem>>, %arg3: memref<32x32xf32, #tpu.memory_space<vmem>>, %arg4: memref<1x8x32xf32, #tpu.memory_space<vmem>>, %arg5: memref<12x8x8xf32, #tpu.memory_space<vmem>>, %arg6: memref<8x32xf32, #tpu.memory_space<vmem>>) attributes {dimension_semantics = [#tpu.dimension_semantics<parallel>], iteration_bounds = array<i64: 2>, scalar_prefetch = 0 : i64, scratch_operands = 2 : i64, tpu.core_type = #tpu.core_type<tc>, window_params = [{transform_indices = @transform_0, window_bounds = array<i64: 1, 8, 32>}, {pipeline_mode = #tpu.pipeline_mode<synchronous>, transform_indices = @transform_1, window_bounds = array<i64: 96, 32>}, {pipeline_mode = #tpu.pipeline_mode<synchronous>, transform_indices = @transform_2, window_bounds = array<i64: 32, 32>}, {transform_indices = @transform_3, window_bounds = array<i64: 1, 8, 32>}]} {
    %c0 = arith.constant 0 : index
    %c0_0 = arith.constant 0 : index
    %c0_1 = arith.constant 0 : index
    %0 = vector.load %arg1[%c0, %c0_0, %c0_1] : memref<1x8x32xf32, #tpu.memory_space<vmem>>, vector<1x8x32xf32>
    %1 = vector.shape_cast %0 : vector<1x8x32xf32> to vector<8x32xf32>
    %c0_2 = arith.constant 0 : index
    %c0_3 = arith.constant 0 : index
    %2 = vector.load %arg2[%c0_2, %c0_3] : memref<96x32xf32, #tpu.memory_space<vmem>>, vector<96x32xf32>
    %cst = arith.constant dense<0.000000e+00> : vector<8x96xf32>
    %3 = tpu.matmul %1, %2, %cst {dimension_numbers = #tpu.dot_dimension_numbers<[1], [1], [0], [0], [0, 0, 1, 0], [], []>} : vector<8x32xf32>, vector<96x32xf32>, vector<8x96xf32> -> vector<8x96xf32>
    %4 = vector.extract_strided_slice %3 {offsets = [0, 0], sizes = [8, 8], strides = [1, 1]} : vector<8x96xf32> to vector<8x8xf32>
    %5 = vector.extract_strided_slice %3 {offsets = [0, 32], sizes = [8, 8], strides = [1, 1]} : vector<8x96xf32> to vector<8x8xf32>
    %6 = vector.extract_strided_slice %3 {offsets = [0, 64], sizes = [8, 8], strides = [1, 1]} : vector<8x96xf32> to vector<8x8xf32>
    %cst_4 = arith.constant 0.353553385 : f32
    %7 = vector.broadcast %cst_4 : f32 to vector<8x8xf32>
    %8 = arith.mulf %4, %7 : vector<8x8xf32>
    %c0_5 = arith.constant 0 : index
    %c0_6 = arith.constant 0 : index
    %c0_7 = arith.constant 0 : index
    %9 = vector.load %arg5[%c0_5, %c0_6, %c0_7] : memref<12x8x8xf32, #tpu.memory_space<vmem>>, vector<1x8x8xf32>
    %10 = vector.shape_cast %9 : vector<1x8x8xf32> to vector<8x8xf32>
    %11 = vector.shape_cast %8 : vector<8x8xf32> to vector<1x8x8xf32>
    tpu.vector_store %arg5[%c0_5, %c0_6, %c0_7], %11 {strides = array<i32>} : memref<12x8x8xf32, #tpu.memory_space<vmem>>, vector<1x8x8xf32>,
    %c4 = arith.constant 4 : index
    %c0_8 = arith.constant 0 : index
    %c0_9 = arith.constant 0 : index
    %12 = vector.load %arg5[%c4, %c0_8, %c0_9] : memref<12x8x8xf32, #tpu.memory_space<vmem>>, vector<1x8x8xf32>
    %13 = vector.shape_cast %12 : vector<1x8x8xf32> to vector<8x8xf32>
    %14 = vector.shape_cast %5 : vector<8x8xf32> to vector<1x8x8xf32>
    tpu.vector_store %arg5[%c4, %c0_8, %c0_9], %14 {strides = array<i32>} : memref<12x8x8xf32, #tpu.memory_space<vmem>>, vector<1x8x8xf32>,
    %c8 = arith.constant 8 : index
    %c0_10 = arith.constant 0 : index
    %c0_11 = arith.constant 0 : index
    %15 = vector.load %arg5[%c8, %c0_10, %c0_11] : memref<12x8x8xf32, #tpu.memory_space<vmem>>, vector<1x8x8xf32>
    %16 = vector.shape_cast %15 : vector<1x8x8xf32> to vector<8x8xf32>
    %17 = vector.shape_cast %6 : vector<8x8xf32> to vector<1x8x8xf32>
    tpu.vector_store %arg5[%c8, %c0_10, %c0_11], %17 {strides = array<i32>} : memref<12x8x8xf32, #tpu.memory_space<vmem>>, vector<1x8x8xf32>,
    %18 = vector.extract_strided_slice %3 {offsets = [0, 8], sizes = [8, 8], strides = [1, 1]} : vector<8x96xf32> to vector<8x8xf32>
    %19 = vector.extract_strided_slice %3 {offsets = [0, 40], sizes = [8, 8], strides = [1, 1]} : vector<8x96xf32> to vector<8x8xf32>
    %20 = vector.extract_strided_slice %3 {offsets = [0, 72], sizes = [8, 8], strides = [1, 1]} : vector<8x96xf32> to vector<8x8xf32>
    %cst_12 = arith.constant 0.353553385 : f32
    %21 = vector.broadcast %cst_12 : f32 to vector<8x8xf32>
    %22 = arith.mulf %18, %21 : vector<8x8xf32>
    %c1 = arith.constant 1 : index
    %c0_13 = arith.constant 0 : index
    %c0_14 = arith.constant 0 : index
    %23 = vector.load %arg5[%c1, %c0_13, %c0_14] : memref<12x8x8xf32, #tpu.memory_space<vmem>>, vector<1x8x8xf32>
    %24 = vector.shape_cast %23 : vector<1x8x8xf32> to vector<8x8xf32>
    %25 = vector.shape_cast %22 : vector<8x8xf32> to vector<1x8x8xf32>
    tpu.vector_store %arg5[%c1, %c0_13, %c0_14], %25 {strides = array<i32>} : memref<12x8x8xf32, #tpu.memory_space<vmem>>, vector<1x8x8xf32>,
    %c5 = arith.constant 5 : index
    %c0_15 = arith.constant 0 : index
    %c0_16 = arith.constant 0 : index
    %26 = vector.load %arg5[%c5, %c0_15, %c0_16] : memref<12x8x8xf32, #tpu.memory_space<vmem>>, vector<1x8x8xf32>
    %27 = vector.shape_cast %26 : vector<1x8x8xf32> to vector<8x8xf32>
    %28 = vector.shape_cast %19 : vector<8x8xf32> to vector<1x8x8xf32>
    tpu.vector_store %arg5[%c5, %c0_15, %c0_16], %28 {strides = array<i32>} : memref<12x8x8xf32, #tpu.memory_space<vmem>>, vector<1x8x8xf32>,
    %c9 = arith.constant 9 : index
    %c0_17 = arith.constant 0 : index
    %c0_18 = arith.constant 0 : index
    %29 = vector.load %arg5[%c9, %c0_17, %c0_18] : memref<12x8x8xf32, #tpu.memory_space<vmem>>, vector<1x8x8xf32>
    %30 = vector.shape_cast %29 : vector<1x8x8xf32> to vector<8x8xf32>
    %31 = vector.shape_cast %20 : vector<8x8xf32> to vector<1x8x8xf32>
    tpu.vector_store %arg5[%c9, %c0_17, %c0_18], %31 {strides = array<i32>} : memref<12x8x8xf32, #tpu.memory_space<vmem>>, vector<1x8x8xf32>,
    %32 = vector.extract_strided_slice %3 {offsets = [0, 16], sizes = [8, 8], strides = [1, 1]} : vector<8x96xf32> to vector<8x8xf32>
    %33 = vector.extract_strided_slice %3 {offsets = [0, 48], sizes = [8, 8], strides = [1, 1]} : vector<8x96xf32> to vector<8x8xf32>
    %34 = vector.extract_strided_slice %3 {offsets = [0, 80], sizes = [8, 8], strides = [1, 1]} : vector<8x96xf32> to vector<8x8xf32>
    %cst_19 = arith.constant 0.353553385 : f32
    %35 = vector.broadcast %cst_19 : f32 to vector<8x8xf32>
    %36 = arith.mulf %32, %35 : vector<8x8xf32>
    %c2 = arith.constant 2 : index
    %c0_20 = arith.constant 0 : index
    %c0_21 = arith.constant 0 : index
    %37 = vector.load %arg5[%c2, %c0_20, %c0_21] : memref<12x8x8xf32, #tpu.memory_space<vmem>>, vector<1x8x8xf32>
    %38 = vector.shape_cast %37 : vector<1x8x8xf32> to vector<8x8xf32>
    %39 = vector.shape_cast %36 : vector<8x8xf32> to vector<1x8x8xf32>
    tpu.vector_store %arg5[%c2, %c0_20, %c0_21], %39 {strides = array<i32>} : memref<12x8x8xf32, #tpu.memory_space<vmem>>, vector<1x8x8xf32>,
    %c6 = arith.constant 6 : index
    %c0_22 = arith.constant 0 : index
    %c0_23 = arith.constant 0 : index
    %40 = vector.load %arg5[%c6, %c0_22, %c0_23] : memref<12x8x8xf32, #tpu.memory_space<vmem>>, vector<1x8x8xf32>
    %41 = vector.shape_cast %40 : vector<1x8x8xf32> to vector<8x8xf32>
    %42 = vector.shape_cast %33 : vector<8x8xf32> to vector<1x8x8xf32>
    tpu.vector_store %arg5[%c6, %c0_22, %c0_23], %42 {strides = array<i32>} : memref<12x8x8xf32, #tpu.memory_space<vmem>>, vector<1x8x8xf32>,
    %c10 = arith.constant 10 : index
    %c0_24 = arith.constant 0 : index
    %c0_25 = arith.constant 0 : index
    %43 = vector.load %arg5[%c10, %c0_24, %c0_25] : memref<12x8x8xf32, #tpu.memory_space<vmem>>, vector<1x8x8xf32>
    %44 = vector.shape_cast %43 : vector<1x8x8xf32> to vector<8x8xf32>
    %45 = vector.shape_cast %34 : vector<8x8xf32> to vector<1x8x8xf32>
    tpu.vector_store %arg5[%c10, %c0_24, %c0_25], %45 {strides = array<i32>} : memref<12x8x8xf32, #tpu.memory_space<vmem>>, vector<1x8x8xf32>,
    %46 = vector.extract_strided_slice %3 {offsets = [0, 24], sizes = [8, 8], strides = [1, 1]} : vector<8x96xf32> to vector<8x8xf32>
    %47 = vector.extract_strided_slice %3 {offsets = [0, 56], sizes = [8, 8], strides = [1, 1]} : vector<8x96xf32> to vector<8x8xf32>
    %48 = vector.extract_strided_slice %3 {offsets = [0, 88], sizes = [8, 8], strides = [1, 1]} : vector<8x96xf32> to vector<8x8xf32>
    %cst_26 = arith.constant 0.353553385 : f32
    %49 = vector.broadcast %cst_26 : f32 to vector<8x8xf32>
    %50 = arith.mulf %46, %49 : vector<8x8xf32>
    %c3 = arith.constant 3 : index
    %c0_27 = arith.constant 0 : index
    %c0_28 = arith.constant 0 : index
    %51 = vector.load %arg5[%c3, %c0_27, %c0_28] : memref<12x8x8xf32, #tpu.memory_space<vmem>>, vector<1x8x8xf32>
    %52 = vector.shape_cast %51 : vector<1x8x8xf32> to vector<8x8xf32>
    %53 = vector.shape_cast %50 : vector<8x8xf32> to vector<1x8x8xf32>
    tpu.vector_store %arg5[%c3, %c0_27, %c0_28], %53 {strides = array<i32>} : memref<12x8x8xf32, #tpu.memory_space<vmem>>, vector<1x8x8xf32>,
    %c7 = arith.constant 7 : index
    %c0_29 = arith.constant 0 : index
    %c0_30 = arith.constant 0 : index
    %54 = vector.load %arg5[%c7, %c0_29, %c0_30] : memref<12x8x8xf32, #tpu.memory_space<vmem>>, vector<1x8x8xf32>
    %55 = vector.shape_cast %54 : vector<1x8x8xf32> to vector<8x8xf32>
    %56 = vector.shape_cast %47 : vector<8x8xf32> to vector<1x8x8xf32>
    tpu.vector_store %arg5[%c7, %c0_29, %c0_30], %56 {strides = array<i32>} : memref<12x8x8xf32, #tpu.memory_space<vmem>>, vector<1x8x8xf32>,
    %c11 = arith.constant 11 : index
    %c0_31 = arith.constant 0 : index
    %c0_32 = arith.constant 0 : index
    %57 = vector.load %arg5[%c11, %c0_31, %c0_32] : memref<12x8x8xf32, #tpu.memory_space<vmem>>, vector<1x8x8xf32>
    %58 = vector.shape_cast %57 : vector<1x8x8xf32> to vector<8x8xf32>
    %59 = vector.shape_cast %48 : vector<8x8xf32> to vector<1x8x8xf32>
    tpu.vector_store %arg5[%c11, %c0_31, %c0_32], %59 {strides = array<i32>} : memref<12x8x8xf32, #tpu.memory_space<vmem>>, vector<1x8x8xf32>,
    %c0_i32 = arith.constant 0 : i32
    %60 = arith.index_cast %c0_i32 : i32 to index
    %c0_33 = arith.constant 0 : index
    %c0_34 = arith.constant 0 : index
    %61 = vector.load %arg5[%60, %c0_33, %c0_34] : memref<12x8x8xf32, #tpu.memory_space<vmem>>, vector<1x8x8xf32>
    %62 = vector.shape_cast %61 : vector<1x8x8xf32> to vector<8x8xf32>
    %c4_i32 = arith.constant 4 : i32
    %63 = arith.addi %c4_i32, %c0_i32 : i32
    %64 = arith.index_cast %63 : i32 to index
    %c0_35 = arith.constant 0 : index
    %c0_36 = arith.constant 0 : index
    %65 = vector.load %arg5[%64, %c0_35, %c0_36] : memref<12x8x8xf32, #tpu.memory_space<vmem>>, vector<1x8x8xf32>
    %66 = vector.shape_cast %65 : vector<1x8x8xf32> to vector<8x8xf32>
    %c8_i32 = arith.constant 8 : i32
    %67 = arith.addi %c8_i32, %c0_i32 : i32
    %68 = arith.index_cast %67 : i32 to index
    %c0_37 = arith.constant 0 : index
    %c0_38 = arith.constant 0 : index
    %69 = vector.load %arg5[%68, %c0_37, %c0_38] : memref<12x8x8xf32, #tpu.memory_space<vmem>>, vector<1x8x8xf32>
    %70 = vector.shape_cast %69 : vector<1x8x8xf32> to vector<8x8xf32>
    %cst_39 = arith.constant dense<0.000000e+00> : vector<8x8xf32>
    %71 = tpu.matmul %62, %66, %cst_39 {dimension_numbers = #tpu.dot_dimension_numbers<[1], [1], [0], [0], [0, 0, 1, 0], [], []>} : vector<8x8xf32>, vector<8x8xf32>, vector<8x8xf32> -> vector<8x8xf32>
    %cst_40 = arith.constant dense<0xFF800000> : vector<8xf32>
    %72 = vector.multi_reduction <maximumf>, %71, %cst_40 [1] : vector<8x8xf32> to vector<8xf32>
    %73 = vector.shape_cast %72 : vector<8xf32> to vector<8x1xf32>
    %74 = vector.broadcast %73 : vector<8x1xf32> to vector<8x8xf32>
    %75 = arith.subf %71, %74 : vector<8x8xf32>
    %76 = math.exp %75 : vector<8x8xf32>
    %cst_41 = arith.constant dense<0.000000e+00> : vector<8xf32>
    %77 = vector.multi_reduction <add>, %76, %cst_41 [1] : vector<8x8xf32> to vector<8xf32>
    %78 = vector.shape_cast %77 : vector<8xf32> to vector<8x1xf32>
    %cst_42 = arith.constant dense<0.000000e+00> : vector<8x8xf32>
    %79 = tpu.matmul %76, %70, %cst_42 {dimension_numbers = #tpu.dot_dimension_numbers<[1], [0], [0], [1], [0, 0, 1, 1], [], []>} : vector<8x8xf32>, vector<8x8xf32>, vector<8x8xf32> -> vector<8x8xf32>
    %80 = tpu.reciprocal %78 : vector<8x1xf32> -> vector<8x1xf32>
    %81 = vector.broadcast %80 : vector<8x1xf32> to vector<8x8xf32>
    %82 = arith.mulf %79, %81 : vector<8x8xf32>
    %83 = vector.shape_cast %82 : vector<8x8xf32> to vector<2x4x8xf32>
    %84 = vector.extract_strided_slice %83 {offsets = [0, 0, 0], sizes = [2, 1, 8], strides = [1, 1, 1]} : vector<2x4x8xf32> to vector<2x1x8xf32>
    %85 = vector.shape_cast %84 : vector<2x1x8xf32> to vector<2x8xf32>
    %86 = vector.extract_strided_slice %83 {offsets = [0, 1, 0], sizes = [2, 1, 8], strides = [1, 1, 1]} : vector<2x4x8xf32> to vector<2x1x8xf32>
    %87 = vector.shape_cast %86 : vector<2x1x8xf32> to vector<2x8xf32>
    %88 = vector.extract_strided_slice %83 {offsets = [0, 2, 0], sizes = [2, 1, 8], strides = [1, 1, 1]} : vector<2x4x8xf32> to vector<2x1x8xf32>
    %89 = vector.shape_cast %88 : vector<2x1x8xf32> to vector<2x8xf32>
    %90 = vector.extract_strided_slice %83 {offsets = [0, 3, 0], sizes = [2, 1, 8], strides = [1, 1, 1]} : vector<2x4x8xf32> to vector<2x1x8xf32>
    %91 = vector.shape_cast %90 : vector<2x1x8xf32> to vector<2x8xf32>
    %92 = tpu.concatenate %85, %87, %89, %91 in 1 : vector<2x8xf32>, vector<2x8xf32>, vector<2x8xf32>, vector<2x8xf32> -> vector<2x32xf32>
    %c2_i32 = arith.constant 2 : i32
    %93 = arith.muli %c0_i32, %c2_i32 : i32
    %94 = arith.index_cast %93 : i32 to index
    %c0_43 = arith.constant 0 : index
    %95 = vector.load %arg6[%94, %c0_43] : memref<8x32xf32, #tpu.memory_space<vmem>>, vector<2x32xf32>
    tpu.vector_store %arg6[%94, %c0_43], %92 {strides = array<i32>} : memref<8x32xf32, #tpu.memory_space<vmem>>, vector<2x32xf32>,
    %c1_i32 = arith.constant 1 : i32
    %96 = arith.index_cast %c1_i32 : i32 to index
    %c0_44 = arith.constant 0 : index
    %c0_45 = arith.constant 0 : index
    %97 = vector.load %arg5[%96, %c0_44, %c0_45] : memref<12x8x8xf32, #tpu.memory_space<vmem>>, vector<1x8x8xf32>
    %98 = vector.shape_cast %97 : vector<1x8x8xf32> to vector<8x8xf32>
    %c4_i32_46 = arith.constant 4 : i32
    %99 = arith.addi %c4_i32_46, %c1_i32 : i32
    %100 = arith.index_cast %99 : i32 to index
    %c0_47 = arith.constant 0 : index
    %c0_48 = arith.constant 0 : index
    %101 = vector.load %arg5[%100, %c0_47, %c0_48] : memref<12x8x8xf32, #tpu.memory_space<vmem>>, vector<1x8x8xf32>
    %102 = vector.shape_cast %101 : vector<1x8x8xf32> to vector<8x8xf32>
    %c8_i32_49 = arith.constant 8 : i32
    %103 = arith.addi %c8_i32_49, %c1_i32 : i32
    %104 = arith.index_cast %103 : i32 to index
    %c0_50 = arith.constant 0 : index
    %c0_51 = arith.constant 0 : index
    %105 = vector.load %arg5[%104, %c0_50, %c0_51] : memref<12x8x8xf32, #tpu.memory_space<vmem>>, vector<1x8x8xf32>
    %106 = vector.shape_cast %105 : vector<1x8x8xf32> to vector<8x8xf32>
    %cst_52 = arith.constant dense<0.000000e+00> : vector<8x8xf32>
    %107 = tpu.matmul %98, %102, %cst_52 {dimension_numbers = #tpu.dot_dimension_numbers<[1], [1], [0], [0], [0, 0, 1, 0], [], []>} : vector<8x8xf32>, vector<8x8xf32>, vector<8x8xf32> -> vector<8x8xf32>
    %cst_53 = arith.constant dense<0xFF800000> : vector<8xf32>
    %108 = vector.multi_reduction <maximumf>, %107, %cst_53 [1] : vector<8x8xf32> to vector<8xf32>
    %109 = vector.shape_cast %108 : vector<8xf32> to vector<8x1xf32>
    %110 = vector.broadcast %109 : vector<8x1xf32> to vector<8x8xf32>
    %111 = arith.subf %107, %110 : vector<8x8xf32>
    %112 = math.exp %111 : vector<8x8xf32>
    %cst_54 = arith.constant dense<0.000000e+00> : vector<8xf32>
    %113 = vector.multi_reduction <add>, %112, %cst_54 [1] : vector<8x8xf32> to vector<8xf32>
    %114 = vector.shape_cast %113 : vector<8xf32> to vector<8x1xf32>
    %cst_55 = arith.constant dense<0.000000e+00> : vector<8x8xf32>
    %115 = tpu.matmul %112, %106, %cst_55 {dimension_numbers = #tpu.dot_dimension_numbers<[1], [0], [0], [1], [0, 0, 1, 1], [], []>} : vector<8x8xf32>, vector<8x8xf32>, vector<8x8xf32> -> vector<8x8xf32>
    %116 = tpu.reciprocal %114 : vector<8x1xf32> -> vector<8x1xf32>
    %117 = vector.broadcast %116 : vector<8x1xf32> to vector<8x8xf32>
    %118 = arith.mulf %115, %117 : vector<8x8xf32>
    %119 = vector.shape_cast %118 : vector<8x8xf32> to vector<2x4x8xf32>
    %120 = vector.extract_strided_slice %119 {offsets = [0, 0, 0], sizes = [2, 1, 8], strides = [1, 1, 1]} : vector<2x4x8xf32> to vector<2x1x8xf32>
    %121 = vector.shape_cast %120 : vector<2x1x8xf32> to vector<2x8xf32>
    %122 = vector.extract_strided_slice %119 {offsets = [0, 1, 0], sizes = [2, 1, 8], strides = [1, 1, 1]} : vector<2x4x8xf32> to vector<2x1x8xf32>
    %123 = vector.shape_cast %122 : vector<2x1x8xf32> to vector<2x8xf32>
    %124 = vector.extract_strided_slice %119 {offsets = [0, 2, 0], sizes = [2, 1, 8], strides = [1, 1, 1]} : vector<2x4x8xf32> to vector<2x1x8xf32>
    %125 = vector.shape_cast %124 : vector<2x1x8xf32> to vector<2x8xf32>
    %126 = vector.extract_strided_slice %119 {offsets = [0, 3, 0], sizes = [2, 1, 8], strides = [1, 1, 1]} : vector<2x4x8xf32> to vector<2x1x8xf32>
    %127 = vector.shape_cast %126 : vector<2x1x8xf32> to vector<2x8xf32>
    %128 = tpu.concatenate %121, %123, %125, %127 in 1 : vector<2x8xf32>, vector<2x8xf32>, vector<2x8xf32>, vector<2x8xf32> -> vector<2x32xf32>
    %c2_i32_56 = arith.constant 2 : i32
    %129 = arith.muli %c1_i32, %c2_i32_56 : i32
    %130 = arith.index_cast %129 : i32 to index
    %c0_57 = arith.constant 0 : index
    %131 = vector.load %arg6[%130, %c0_57] : memref<8x32xf32, #tpu.memory_space<vmem>>, vector<2x32xf32>
    tpu.vector_store %arg6[%130, %c0_57], %128 {strides = array<i32>} : memref<8x32xf32, #tpu.memory_space<vmem>>, vector<2x32xf32>,
    %c2_i32_58 = arith.constant 2 : i32
    %132 = arith.index_cast %c2_i32_58 : i32 to index
    %c0_59 = arith.constant 0 : index
    %c0_60 = arith.constant 0 : index
    %133 = vector.load %arg5[%132, %c0_59, %c0_60] : memref<12x8x8xf32, #tpu.memory_space<vmem>>, vector<1x8x8xf32>
    %134 = vector.shape_cast %133 : vector<1x8x8xf32> to vector<8x8xf32>
    %c4_i32_61 = arith.constant 4 : i32
    %135 = arith.addi %c4_i32_61, %c2_i32_58 : i32
    %136 = arith.index_cast %135 : i32 to index
    %c0_62 = arith.constant 0 : index
    %c0_63 = arith.constant 0 : index
    %137 = vector.load %arg5[%136, %c0_62, %c0_63] : memref<12x8x8xf32, #tpu.memory_space<vmem>>, vector<1x8x8xf32>
    %138 = vector.shape_cast %137 : vector<1x8x8xf32> to vector<8x8xf32>
    %c8_i32_64 = arith.constant 8 : i32
    %139 = arith.addi %c8_i32_64, %c2_i32_58 : i32
    %140 = arith.index_cast %139 : i32 to index
    %c0_65 = arith.constant 0 : index
    %c0_66 = arith.constant 0 : index
    %141 = vector.load %arg5[%140, %c0_65, %c0_66] : memref<12x8x8xf32, #tpu.memory_space<vmem>>, vector<1x8x8xf32>
    %142 = vector.shape_cast %141 : vector<1x8x8xf32> to vector<8x8xf32>
    %cst_67 = arith.constant dense<0.000000e+00> : vector<8x8xf32>
    %143 = tpu.matmul %134, %138, %cst_67 {dimension_numbers = #tpu.dot_dimension_numbers<[1], [1], [0], [0], [0, 0, 1, 0], [], []>} : vector<8x8xf32>, vector<8x8xf32>, vector<8x8xf32> -> vector<8x8xf32>
    %cst_68 = arith.constant dense<0xFF800000> : vector<8xf32>
    %144 = vector.multi_reduction <maximumf>, %143, %cst_68 [1] : vector<8x8xf32> to vector<8xf32>
    %145 = vector.shape_cast %144 : vector<8xf32> to vector<8x1xf32>
    %146 = vector.broadcast %145 : vector<8x1xf32> to vector<8x8xf32>
    %147 = arith.subf %143, %146 : vector<8x8xf32>
    %148 = math.exp %147 : vector<8x8xf32>
    %cst_69 = arith.constant dense<0.000000e+00> : vector<8xf32>
    %149 = vector.multi_reduction <add>, %148, %cst_69 [1] : vector<8x8xf32> to vector<8xf32>
    %150 = vector.shape_cast %149 : vector<8xf32> to vector<8x1xf32>
    %cst_70 = arith.constant dense<0.000000e+00> : vector<8x8xf32>
    %151 = tpu.matmul %148, %142, %cst_70 {dimension_numbers = #tpu.dot_dimension_numbers<[1], [0], [0], [1], [0, 0, 1, 1], [], []>} : vector<8x8xf32>, vector<8x8xf32>, vector<8x8xf32> -> vector<8x8xf32>
    %152 = tpu.reciprocal %150 : vector<8x1xf32> -> vector<8x1xf32>
    %153 = vector.broadcast %152 : vector<8x1xf32> to vector<8x8xf32>
    %154 = arith.mulf %151, %153 : vector<8x8xf32>
    %155 = vector.shape_cast %154 : vector<8x8xf32> to vector<2x4x8xf32>
    %156 = vector.extract_strided_slice %155 {offsets = [0, 0, 0], sizes = [2, 1, 8], strides = [1, 1, 1]} : vector<2x4x8xf32> to vector<2x1x8xf32>
    %157 = vector.shape_cast %156 : vector<2x1x8xf32> to vector<2x8xf32>
    %158 = vector.extract_strided_slice %155 {offsets = [0, 1, 0], sizes = [2, 1, 8], strides = [1, 1, 1]} : vector<2x4x8xf32> to vector<2x1x8xf32>
    %159 = vector.shape_cast %158 : vector<2x1x8xf32> to vector<2x8xf32>
    %160 = vector.extract_strided_slice %155 {offsets = [0, 2, 0], sizes = [2, 1, 8], strides = [1, 1, 1]} : vector<2x4x8xf32> to vector<2x1x8xf32>
    %161 = vector.shape_cast %160 : vector<2x1x8xf32> to vector<2x8xf32>
    %162 = vector.extract_strided_slice %155 {offsets = [0, 3, 0], sizes = [2, 1, 8], strides = [1, 1, 1]} : vector<2x4x8xf32> to vector<2x1x8xf32>
    %163 = vector.shape_cast %162 : vector<2x1x8xf32> to vector<2x8xf32>
    %164 = tpu.concatenate %157, %159, %161, %163 in 1 : vector<2x8xf32>, vector<2x8xf32>, vector<2x8xf32>, vector<2x8xf32> -> vector<2x32xf32>
    %c2_i32_71 = arith.constant 2 : i32
    %165 = arith.muli %c2_i32_58, %c2_i32_71 : i32
    %166 = arith.index_cast %165 : i32 to index
    %c0_72 = arith.constant 0 : index
    %167 = vector.load %arg6[%166, %c0_72] : memref<8x32xf32, #tpu.memory_space<vmem>>, vector<2x32xf32>
    tpu.vector_store %arg6[%166, %c0_72], %164 {strides = array<i32>} : memref<8x32xf32, #tpu.memory_space<vmem>>, vector<2x32xf32>,
    %c3_i32 = arith.constant 3 : i32
    %168 = arith.index_cast %c3_i32 : i32 to index
    %c0_73 = arith.constant 0 : index
    %c0_74 = arith.constant 0 : index
    %169 = vector.load %arg5[%168, %c0_73, %c0_74] : memref<12x8x8xf32, #tpu.memory_space<vmem>>, vector<1x8x8xf32>
    %170 = vector.shape_cast %169 : vector<1x8x8xf32> to vector<8x8xf32>
    %c4_i32_75 = arith.constant 4 : i32
    %171 = arith.addi %c4_i32_75, %c3_i32 : i32
    %172 = arith.index_cast %171 : i32 to index
    %c0_76 = arith.constant 0 : index
    %c0_77 = arith.constant 0 : index
    %173 = vector.load %arg5[%172, %c0_76, %c0_77] : memref<12x8x8xf32, #tpu.memory_space<vmem>>, vector<1x8x8xf32>
    %174 = vector.shape_cast %173 : vector<1x8x8xf32> to vector<8x8xf32>
    %c8_i32_78 = arith.constant 8 : i32
    %175 = arith.addi %c8_i32_78, %c3_i32 : i32
    %176 = arith.index_cast %175 : i32 to index
    %c0_79 = arith.constant 0 : index
    %c0_80 = arith.constant 0 : index
    %177 = vector.load %arg5[%176, %c0_79, %c0_80] : memref<12x8x8xf32, #tpu.memory_space<vmem>>, vector<1x8x8xf32>
    %178 = vector.shape_cast %177 : vector<1x8x8xf32> to vector<8x8xf32>
    %cst_81 = arith.constant dense<0.000000e+00> : vector<8x8xf32>
    %179 = tpu.matmul %170, %174, %cst_81 {dimension_numbers = #tpu.dot_dimension_numbers<[1], [1], [0], [0], [0, 0, 1, 0], [], []>} : vector<8x8xf32>, vector<8x8xf32>, vector<8x8xf32> -> vector<8x8xf32>
    %cst_82 = arith.constant dense<0xFF800000> : vector<8xf32>
    %180 = vector.multi_reduction <maximumf>, %179, %cst_82 [1] : vector<8x8xf32> to vector<8xf32>
    %181 = vector.shape_cast %180 : vector<8xf32> to vector<8x1xf32>
    %182 = vector.broadcast %181 : vector<8x1xf32> to vector<8x8xf32>
    %183 = arith.subf %179, %182 : vector<8x8xf32>
    %184 = math.exp %183 : vector<8x8xf32>
    %cst_83 = arith.constant dense<0.000000e+00> : vector<8xf32>
    %185 = vector.multi_reduction <add>, %184, %cst_83 [1] : vector<8x8xf32> to vector<8xf32>
    %186 = vector.shape_cast %185 : vector<8xf32> to vector<8x1xf32>
    %cst_84 = arith.constant dense<0.000000e+00> : vector<8x8xf32>
    %187 = tpu.matmul %184, %178, %cst_84 {dimension_numbers = #tpu.dot_dimension_numbers<[1], [0], [0], [1], [0, 0, 1, 1], [], []>} : vector<8x8xf32>, vector<8x8xf32>, vector<8x8xf32> -> vector<8x8xf32>
    %188 = tpu.reciprocal %186 : vector<8x1xf32> -> vector<8x1xf32>
    %189 = vector.broadcast %188 : vector<8x1xf32> to vector<8x8xf32>
    %190 = arith.mulf %187, %189 : vector<8x8xf32>
    %191 = vector.shape_cast %190 : vector<8x8xf32> to vector<2x4x8xf32>
    %192 = vector.extract_strided_slice %191 {offsets = [0, 0, 0], sizes = [2, 1, 8], strides = [1, 1, 1]} : vector<2x4x8xf32> to vector<2x1x8xf32>
    %193 = vector.shape_cast %192 : vector<2x1x8xf32> to vector<2x8xf32>
    %194 = vector.extract_strided_slice %191 {offsets = [0, 1, 0], sizes = [2, 1, 8], strides = [1, 1, 1]} : vector<2x4x8xf32> to vector<2x1x8xf32>
    %195 = vector.shape_cast %194 : vector<2x1x8xf32> to vector<2x8xf32>
    %196 = vector.extract_strided_slice %191 {offsets = [0, 2, 0], sizes = [2, 1, 8], strides = [1, 1, 1]} : vector<2x4x8xf32> to vector<2x1x8xf32>
    %197 = vector.shape_cast %196 : vector<2x1x8xf32> to vector<2x8xf32>
    %198 = vector.extract_strided_slice %191 {offsets = [0, 3, 0], sizes = [2, 1, 8], strides = [1, 1, 1]} : vector<2x4x8xf32> to vector<2x1x8xf32>
    %199 = vector.shape_cast %198 : vector<2x1x8xf32> to vector<2x8xf32>
    %200 = tpu.concatenate %193, %195, %197, %199 in 1 : vector<2x8xf32>, vector<2x8xf32>, vector<2x8xf32>, vector<2x8xf32> -> vector<2x32xf32>
    %c2_i32_85 = arith.constant 2 : i32
    %201 = arith.muli %c3_i32, %c2_i32_85 : i32
    %202 = arith.index_cast %201 : i32 to index
    %c0_86 = arith.constant 0 : index
    %203 = vector.load %arg6[%202, %c0_86] : memref<8x32xf32, #tpu.memory_space<vmem>>, vector<2x32xf32>
    tpu.vector_store %arg6[%202, %c0_86], %200 {strides = array<i32>} : memref<8x32xf32, #tpu.memory_space<vmem>>, vector<2x32xf32>,
    %c4_i32_87 = arith.constant 4 : i32
    %c0_88 = arith.constant 0 : index
    %c0_89 = arith.constant 0 : index
    %204 = vector.load %arg6[%c0_88, %c0_89] : memref<8x32xf32, #tpu.memory_space<vmem>>, vector<8x32xf32>
    %c0_90 = arith.constant 0 : index
    %c0_91 = arith.constant 0 : index
    %205 = vector.load %arg3[%c0_90, %c0_91] : memref<32x32xf32, #tpu.memory_space<vmem>>, vector<32x32xf32>
    %cst_92 = arith.constant dense<0.000000e+00> : vector<8x32xf32>
    %206 = tpu.matmul %204, %205, %cst_92 {dimension_numbers = #tpu.dot_dimension_numbers<[1], [1], [0], [0], [0, 0, 1, 0], [], []>} : vector<8x32xf32>, vector<32x32xf32>, vector<8x32xf32> -> vector<8x32xf32>
    %c0_93 = arith.constant 0 : index
    %c0_94 = arith.constant 0 : index
    %c0_95 = arith.constant 0 : index
    %207 = vector.load %arg4[%c0_93, %c0_94, %c0_95] : memref<1x8x32xf32, #tpu.memory_space<vmem>>, vector<1x8x32xf32>
    %208 = vector.shape_cast %207 : vector<1x8x32xf32> to vector<8x32xf32>
    %209 = vector.shape_cast %206 : vector<8x32xf32> to vector<1x8x32xf32>
    tpu.vector_store %arg4[%c0_93, %c0_94, %c0_95], %209 {strides = array<i32>} : memref<1x8x32xf32, #tpu.memory_space<vmem>>, vector<1x8x32xf32>,
    return
  }
  func.func @transform_0(%arg0: i32) -> (i32, i32, i32) {
    %c0_i32 = arith.constant 0 : i32
    %c0_i32_0 = arith.constant 0 : i32
    %c0_i32_1 = arith.constant 0 : i32
    return %arg0, %c0_i32, %c0_i32_0 : i32, i32, i32
  }
  func.func @transform_1(%arg0: i32) -> (i32, i32) {
    %c0_i32 = arith.constant 0 : i32
    %c0_i32_0 = arith.constant 0 : i32
    %c0_i32_1 = arith.constant 0 : i32
    return %c0_i32, %c0_i32_0 : i32, i32
  }
  func.func @transform_2(%arg0: i32) -> (i32, i32) {
    %c0_i32 = arith.constant 0 : i32
    %c0_i32_0 = arith.constant 0 : i32
    %c0_i32_1 = arith.constant 0 : i32
    return %c0_i32, %c0_i32_0 : i32, i32
  }
  func.func @transform_3(%arg0: i32) -> (i32, i32, i32) {
    %c0_i32 = arith.constant 0 : i32
    %c0_i32_0 = arith.constant 0 : i32
    %c0_i32_1 = arith.constant 0 : i32
    return %arg0, %c0_i32, %c0_i32_0 : i32, i32, i32
  }
}

module attributes {stable_mosaic.version = 11 : i64} {
  func.func @_attn_kernel_unfused(%arg0: i32, %arg1: memref<1x8x32xf32, #tpu.memory_space<vmem>>, %arg2: memref<96x32xf32, #tpu.memory_space<vmem>>, %arg3: memref<1x4x8x8xf32, #tpu.memory_space<vmem>>) attributes {dimension_semantics = [#tpu.dimension_semantics<parallel>], iteration_bounds = array<i64: 2>, scalar_prefetch = 0 : i64, scratch_operands = 0 : i64, tpu.core_type = #tpu.core_type<tc>, window_params = [{transform_indices = @transform_0, window_bounds = array<i64: 1, 8, 32>}, {pipeline_mode = #tpu.pipeline_mode<synchronous>, transform_indices = @transform_1, window_bounds = array<i64: 96, 32>}, {transform_indices = @transform_2, window_bounds = array<i64: 1, 4, 8, 8>}]} {
    %c0 = arith.constant 0 : index
    %c0_0 = arith.constant 0 : index
    %c0_1 = arith.constant 0 : index
    %0 = vector.load %arg1[%c0, %c0_0, %c0_1] : memref<1x8x32xf32, #tpu.memory_space<vmem>>, vector<1x8x32xf32>
    %1 = vector.shape_cast %0 : vector<1x8x32xf32> to vector<8x32xf32>
    %c0_2 = arith.constant 0 : index
    %c0_3 = arith.constant 0 : index
    %2 = vector.load %arg2[%c0_2, %c0_3] : memref<96x32xf32, #tpu.memory_space<vmem>>, vector<96x32xf32>
    %cst = arith.constant dense<0.000000e+00> : vector<8x96xf32>
    %3 = tpu.matmul %1, %2, %cst {dimension_numbers = #tpu.dot_dimension_numbers<[1], [1], [0], [0], [0, 0, 1, 0], [], []>} : vector<8x32xf32>, vector<96x32xf32>, vector<8x96xf32> -> vector<8x96xf32>
    %4 = vector.extract_strided_slice %3 {offsets = [0, 0], sizes = [8, 8], strides = [1, 1]} : vector<8x96xf32> to vector<8x8xf32>
    %cst_4 = arith.constant 0.353553385 : f32
    %5 = vector.broadcast %cst_4 : f32 to vector<8x8xf32>
    %6 = arith.mulf %4, %5 : vector<8x8xf32>
    %7 = vector.extract_strided_slice %3 {offsets = [0, 32], sizes = [8, 8], strides = [1, 1]} : vector<8x96xf32> to vector<8x8xf32>
    %8 = vector.extract_strided_slice %3 {offsets = [0, 64], sizes = [8, 8], strides = [1, 1]} : vector<8x96xf32> to vector<8x8xf32>
    %cst_5 = arith.constant dense<0.000000e+00> : vector<8x8xf32>
    %9 = tpu.matmul %6, %7, %cst_5 {dimension_numbers = #tpu.dot_dimension_numbers<[1], [1], [0], [0], [0, 0, 1, 0], [], []>} : vector<8x8xf32>, vector<8x8xf32>, vector<8x8xf32> -> vector<8x8xf32>
    %cst_6 = arith.constant dense<0xFF800000> : vector<8xf32>
    %10 = vector.multi_reduction <maximumf>, %9, %cst_6 [1] : vector<8x8xf32> to vector<8xf32>
    %11 = vector.shape_cast %10 : vector<8xf32> to vector<8x1xf32>
    %12 = vector.broadcast %11 : vector<8x1xf32> to vector<8x8xf32>
    %13 = arith.subf %9, %12 : vector<8x8xf32>
    %14 = math.exp %13 : vector<8x8xf32>
    %cst_7 = arith.constant dense<0.000000e+00> : vector<8xf32>
    %15 = vector.multi_reduction <add>, %14, %cst_7 [1] : vector<8x8xf32> to vector<8xf32>
    %16 = vector.shape_cast %15 : vector<8xf32> to vector<8x1xf32>
    %cst_8 = arith.constant dense<0.000000e+00> : vector<8x8xf32>
    %17 = tpu.matmul %14, %8, %cst_8 {dimension_numbers = #tpu.dot_dimension_numbers<[1], [0], [0], [1], [0, 0, 1, 1], [], []>} : vector<8x8xf32>, vector<8x8xf32>, vector<8x8xf32> -> vector<8x8xf32>
    %18 = tpu.reciprocal %16 : vector<8x1xf32> -> vector<8x1xf32>
    %19 = vector.broadcast %18 : vector<8x1xf32> to vector<8x8xf32>
    %20 = arith.mulf %17, %19 : vector<8x8xf32>
    %c0_9 = arith.constant 0 : index
    %c0_10 = arith.constant 0 : index
    %c0_11 = arith.constant 0 : index
    %c0_12 = arith.constant 0 : index
    %21 = vector.load %arg3[%c0_9, %c0_10, %c0_11, %c0_12] : memref<1x4x8x8xf32, #tpu.memory_space<vmem>>, vector<1x1x8x8xf32>
    %22 = vector.shape_cast %21 : vector<1x1x8x8xf32> to vector<8x8xf32>
    %23 = vector.shape_cast %20 : vector<8x8xf32> to vector<1x1x8x8xf32>
    tpu.vector_store %arg3[%c0_9, %c0_10, %c0_11, %c0_12], %23 {strides = array<i32>} : memref<1x4x8x8xf32, #tpu.memory_space<vmem>>, vector<1x1x8x8xf32>,
    %24 = vector.extract_strided_slice %3 {offsets = [0, 8], sizes = [8, 8], strides = [1, 1]} : vector<8x96xf32> to vector<8x8xf32>
    %cst_13 = arith.constant 0.353553385 : f32
    %25 = vector.broadcast %cst_13 : f32 to vector<8x8xf32>
    %26 = arith.mulf %24, %25 : vector<8x8xf32>
    %27 = vector.extract_strided_slice %3 {offsets = [0, 40], sizes = [8, 8], strides = [1, 1]} : vector<8x96xf32> to vector<8x8xf32>
    %28 = vector.extract_strided_slice %3 {offsets = [0, 72], sizes = [8, 8], strides = [1, 1]} : vector<8x96xf32> to vector<8x8xf32>
    %cst_14 = arith.constant dense<0.000000e+00> : vector<8x8xf32>
    %29 = tpu.matmul %26, %27, %cst_14 {dimension_numbers = #tpu.dot_dimension_numbers<[1], [1], [0], [0], [0, 0, 1, 0], [], []>} : vector<8x8xf32>, vector<8x8xf32>, vector<8x8xf32> -> vector<8x8xf32>
    %cst_15 = arith.constant dense<0xFF800000> : vector<8xf32>
    %30 = vector.multi_reduction <maximumf>, %29, %cst_15 [1] : vector<8x8xf32> to vector<8xf32>
    %31 = vector.shape_cast %30 : vector<8xf32> to vector<8x1xf32>
    %32 = vector.broadcast %31 : vector<8x1xf32> to vector<8x8xf32>
    %33 = arith.subf %29, %32 : vector<8x8xf32>
    %34 = math.exp %33 : vector<8x8xf32>
    %cst_16 = arith.constant dense<0.000000e+00> : vector<8xf32>
    %35 = vector.multi_reduction <add>, %34, %cst_16 [1] : vector<8x8xf32> to vector<8xf32>
    %36 = vector.shape_cast %35 : vector<8xf32> to vector<8x1xf32>
    %cst_17 = arith.constant dense<0.000000e+00> : vector<8x8xf32>
    %37 = tpu.matmul %34, %28, %cst_17 {dimension_numbers = #tpu.dot_dimension_numbers<[1], [0], [0], [1], [0, 0, 1, 1], [], []>} : vector<8x8xf32>, vector<8x8xf32>, vector<8x8xf32> -> vector<8x8xf32>
    %38 = tpu.reciprocal %36 : vector<8x1xf32> -> vector<8x1xf32>
    %39 = vector.broadcast %38 : vector<8x1xf32> to vector<8x8xf32>
    %40 = arith.mulf %37, %39 : vector<8x8xf32>
    %c0_18 = arith.constant 0 : index
    %c1 = arith.constant 1 : index
    %c0_19 = arith.constant 0 : index
    %c0_20 = arith.constant 0 : index
    %41 = vector.load %arg3[%c0_18, %c1, %c0_19, %c0_20] : memref<1x4x8x8xf32, #tpu.memory_space<vmem>>, vector<1x1x8x8xf32>
    %42 = vector.shape_cast %41 : vector<1x1x8x8xf32> to vector<8x8xf32>
    %43 = vector.shape_cast %40 : vector<8x8xf32> to vector<1x1x8x8xf32>
    tpu.vector_store %arg3[%c0_18, %c1, %c0_19, %c0_20], %43 {strides = array<i32>} : memref<1x4x8x8xf32, #tpu.memory_space<vmem>>, vector<1x1x8x8xf32>,
    %44 = vector.extract_strided_slice %3 {offsets = [0, 16], sizes = [8, 8], strides = [1, 1]} : vector<8x96xf32> to vector<8x8xf32>
    %cst_21 = arith.constant 0.353553385 : f32
    %45 = vector.broadcast %cst_21 : f32 to vector<8x8xf32>
    %46 = arith.mulf %44, %45 : vector<8x8xf32>
    %47 = vector.extract_strided_slice %3 {offsets = [0, 48], sizes = [8, 8], strides = [1, 1]} : vector<8x96xf32> to vector<8x8xf32>
    %48 = vector.extract_strided_slice %3 {offsets = [0, 80], sizes = [8, 8], strides = [1, 1]} : vector<8x96xf32> to vector<8x8xf32>
    %cst_22 = arith.constant dense<0.000000e+00> : vector<8x8xf32>
    %49 = tpu.matmul %46, %47, %cst_22 {dimension_numbers = #tpu.dot_dimension_numbers<[1], [1], [0], [0], [0, 0, 1, 0], [], []>} : vector<8x8xf32>, vector<8x8xf32>, vector<8x8xf32> -> vector<8x8xf32>
    %cst_23 = arith.constant dense<0xFF800000> : vector<8xf32>
    %50 = vector.multi_reduction <maximumf>, %49, %cst_23 [1] : vector<8x8xf32> to vector<8xf32>
    %51 = vector.shape_cast %50 : vector<8xf32> to vector<8x1xf32>
    %52 = vector.broadcast %51 : vector<8x1xf32> to vector<8x8xf32>
    %53 = arith.subf %49, %52 : vector<8x8xf32>
    %54 = math.exp %53 : vector<8x8xf32>
    %cst_24 = arith.constant dense<0.000000e+00> : vector<8xf32>
    %55 = vector.multi_reduction <add>, %54, %cst_24 [1] : vector<8x8xf32> to vector<8xf32>
    %56 = vector.shape_cast %55 : vector<8xf32> to vector<8x1xf32>
    %cst_25 = arith.constant dense<0.000000e+00> : vector<8x8xf32>
    %57 = tpu.matmul %54, %48, %cst_25 {dimension_numbers = #tpu.dot_dimension_numbers<[1], [0], [0], [1], [0, 0, 1, 1], [], []>} : vector<8x8xf32>, vector<8x8xf32>, vector<8x8xf32> -> vector<8x8xf32>
    %58 = tpu.reciprocal %56 : vector<8x1xf32> -> vector<8x1xf32>
    %59 = vector.broadcast %58 : vector<8x1xf32> to vector<8x8xf32>
    %60 = arith.mulf %57, %59 : vector<8x8xf32>
    %c0_26 = arith.constant 0 : index
    %c2 = arith.constant 2 : index
    %c0_27 = arith.constant 0 : index
    %c0_28 = arith.constant 0 : index
    %61 = vector.load %arg3[%c0_26, %c2, %c0_27, %c0_28] : memref<1x4x8x8xf32, #tpu.memory_space<vmem>>, vector<1x1x8x8xf32>
    %62 = vector.shape_cast %61 : vector<1x1x8x8xf32> to vector<8x8xf32>
    %63 = vector.shape_cast %60 : vector<8x8xf32> to vector<1x1x8x8xf32>
    tpu.vector_store %arg3[%c0_26, %c2, %c0_27, %c0_28], %63 {strides = array<i32>} : memref<1x4x8x8xf32, #tpu.memory_space<vmem>>, vector<1x1x8x8xf32>,
    %64 = vector.extract_strided_slice %3 {offsets = [0, 24], sizes = [8, 8], strides = [1, 1]} : vector<8x96xf32> to vector<8x8xf32>
    %cst_29 = arith.constant 0.353553385 : f32
    %65 = vector.broadcast %cst_29 : f32 to vector<8x8xf32>
    %66 = arith.mulf %64, %65 : vector<8x8xf32>
    %67 = vector.extract_strided_slice %3 {offsets = [0, 56], sizes = [8, 8], strides = [1, 1]} : vector<8x96xf32> to vector<8x8xf32>
    %68 = vector.extract_strided_slice %3 {offsets = [0, 88], sizes = [8, 8], strides = [1, 1]} : vector<8x96xf32> to vector<8x8xf32>
    %cst_30 = arith.constant dense<0.000000e+00> : vector<8x8xf32>
    %69 = tpu.matmul %66, %67, %cst_30 {dimension_numbers = #tpu.dot_dimension_numbers<[1], [1], [0], [0], [0, 0, 1, 0], [], []>} : vector<8x8xf32>, vector<8x8xf32>, vector<8x8xf32> -> vector<8x8xf32>
    %cst_31 = arith.constant dense<0xFF800000> : vector<8xf32>
    %70 = vector.multi_reduction <maximumf>, %69, %cst_31 [1] : vector<8x8xf32> to vector<8xf32>
    %71 = vector.shape_cast %70 : vector<8xf32> to vector<8x1xf32>
    %72 = vector.broadcast %71 : vector<8x1xf32> to vector<8x8xf32>
    %73 = arith.subf %69, %72 : vector<8x8xf32>
    %74 = math.exp %73 : vector<8x8xf32>
    %cst_32 = arith.constant dense<0.000000e+00> : vector<8xf32>
    %75 = vector.multi_reduction <add>, %74, %cst_32 [1] : vector<8x8xf32> to vector<8xf32>
    %76 = vector.shape_cast %75 : vector<8xf32> to vector<8x1xf32>
    %cst_33 = arith.constant dense<0.000000e+00> : vector<8x8xf32>
    %77 = tpu.matmul %74, %68, %cst_33 {dimension_numbers = #tpu.dot_dimension_numbers<[1], [0], [0], [1], [0, 0, 1, 1], [], []>} : vector<8x8xf32>, vector<8x8xf32>, vector<8x8xf32> -> vector<8x8xf32>
    %78 = tpu.reciprocal %76 : vector<8x1xf32> -> vector<8x1xf32>
    %79 = vector.broadcast %78 : vector<8x1xf32> to vector<8x8xf32>
    %80 = arith.mulf %77, %79 : vector<8x8xf32>
    %c0_34 = arith.constant 0 : index
    %c3 = arith.constant 3 : index
    %c0_35 = arith.constant 0 : index
    %c0_36 = arith.constant 0 : index
    %81 = vector.load %arg3[%c0_34, %c3, %c0_35, %c0_36] : memref<1x4x8x8xf32, #tpu.memory_space<vmem>>, vector<1x1x8x8xf32>
    %82 = vector.shape_cast %81 : vector<1x1x8x8xf32> to vector<8x8xf32>
    %83 = vector.shape_cast %80 : vector<8x8xf32> to vector<1x1x8x8xf32>
    tpu.vector_store %arg3[%c0_34, %c3, %c0_35, %c0_36], %83 {strides = array<i32>} : memref<1x4x8x8xf32, #tpu.memory_space<vmem>>, vector<1x1x8x8xf32>,
    return
  }
  func.func @transform_0(%arg0: i32) -> (i32, i32, i32) {
    %c0_i32 = arith.constant 0 : i32
    %c0_i32_0 = arith.constant 0 : i32
    %c0_i32_1 = arith.constant 0 : i32
    return %arg0, %c0_i32, %c0_i32_0 : i32, i32, i32
  }
  func.func @transform_1(%arg0: i32) -> (i32, i32) {
    %c0_i32 = arith.constant 0 : i32
    %c0_i32_0 = arith.constant 0 : i32
    %c0_i32_1 = arith.constant 0 : i32
    return %c0_i32, %c0_i32_0 : i32, i32
  }
  func.func @transform_2(%arg0: i32) -> (i32, i32, i32, i32) {
    %c0_i32 = arith.constant 0 : i32
    %c0_i32_0 = arith.constant 0 : i32
    %c0_i32_1 = arith.constant 0 : i32
    %c0_i32_2 = arith.constant 0 : i32
    return %arg0, %c0_i32, %c0_i32_0, %c0_i32_1 : i32, i32, i32, i32
  }
}

</mosaic_0001>

<bundles_post_ra>
// kernel: tpu_custom_call.1
= control target key start
LH: loop header
LB: loop body
LE: loop exit
PB: predicated region body
PF: predicated region fallthrough
CT: control target
= control target key end

     0   :  { %8 = vsyncpa [#allocation5], 0  ;;  %s2110_s0 = inlined_call_operand.vmem [shape: f32[2,8,32], index: 0, kind: input, shape index: {}]   ;;  %s2111_s1 = inlined_call_operand.vmem [shape: f32[96,32], index: 1, kind: input, shape index: {}]   ;;  %s2112_s2 = inlined_call_operand.vmem [shape: f32[32,32], index: 2, kind: input, shape index: {}]   ;;  %s2113_s3 = inlined_call_operand.hbm [shape: f32[2,8,32], index: 3, kind: output, shape index: {}]  }
   0x1   :  { %10 = vsyncpa [#allocation5 + $0x1], 0  ;;  %s1735_s12 = smov 0   ;;  %s1737_s13 = smov 0  }
   0x2   :  { %s1739_s14 = smov 0   ;;  %s1741_s15 = smov 0  }
   0x3 LB: > { %s1756_s16 = sadd.s32 4294967295, %s1695_s15   ;;  %s1377_s17 = sadd.s32 4294967294, %s1695_s15   ;;  %s1695_s15 = sphi %s1741_s15, %s2121_s15   ;;  %s1691_s14 = sphi %s1739_s14, %s2120_s14   ;;  %s1687_s13 = sphi %s1737_s13, %s2119_s13   ;;  %s1683_s12 = sphi %s1735_s12, %s2118_s12  }
   0x4   : > { %s1760_s18 = sadd.s32 1, %s1695_s15   ;;  %s91_s19 = sadd.s32 1, %s1691_s14 }
   0x5   : > { %s88_s20 = ssub.s32 %s1695_s15, %s1760_s18  ;;  %p101_p0 = scmp.ne.s32.totalorder %s1691_s14, %s1687_s13 }
   0x6   : > { %p89_p1 = scmp.eq.s32.totalorder %s88_s20, 0  ;;  %p102_p2 = scmp.eq.s32.totalorder %s1756_s16, 1 }
   0x7   : > { %p107_p3 = scmp.ne.s32.totalorder %s1687_s13, %s1683_s12  ;;  %p108_p4 = scmp.eq.s32.totalorder %s1377_s17, 1 }
   0x8   : > { %s1771_s21 = scalar_select %p89_p1, %s1691_s14, %s91_s19  }
   0x9   : > { %p1773_p5 = por %p102_p2, %p101_p0  ;;  %p1777_p6 = por %p108_p4, %p107_p3 }
   0xa   : > { %p1380_p7 = scmp.ge.s32.totalorder %s1695_s15, 1  ;;  %p139_p8 = scmp.lt.s32.totalorder %s1695_s15, 3 }
   0xc   : > { %p140_p9 = pnand %p1380_p7, %p139_p8 }
   0xd   : > { %v167_v0 = vld [vmem:[%s2111_s1] sm:$0xff] (!%p140_p9)  ;;  %v168_v1 = vld [vmem:[%s2111_s1 + $0x8] sm:$0xff] (!%p140_p9)  ;;  %vm179_vm0 = vcmask (!%p140_p9), 261120   ;;  %v1697_v2 = vmov (!%p140_p9), 0.0|0.0   ;;  %vm1698_vm2 = vmmov (!%p140_p9), 0   ;;  %v1699_v5 = vmov (!%p140_p9), 0.0  }
   0xe   : > { %143 = sbr.rel (%p140_p9) target bundleno = 2470 (0x9a6), region = 32  ;;  %1529 = vmatprep.subr.bf16.mxu0 (!%p140_p9), %v1697_v2  ;;  %v1530_v3 = vpack.c.bf16 (!%p140_p9), %v168_v1, %v167_v0  ;;  %vm1792_vm1 = vmpackc.low (!%p140_p9), %vm179_vm0, %vm179_vm0  ;;  %1475 = vmatprep.mubr.msk.f32.mxu0 (!%p140_p9), %vm1698_vm2, %v1699_v5  ;;  %v169_v6 = vld [vmem:[%s2111_s1 + $0x10] sm:$0xff] (!%p140_p9)  ;;  %v170_v7 = vld [vmem:[%s2111_s1 + $0x18] sm:$0xff] (!%p140_p9)  ;;  %p162_p10 = scmp.lt.s32.totalorder (!%p140_p9), %s1756_s16, 1  ;;  %vm290_vm3 = vcmask (!%p140_p9), 64512   ;;  %vm522_vm4 = vcmask (!%p140_p9), 1041409  }
   0xf   : > { %1478 = vmatprep.subr.mxu1 (!%p140_p9), %v1699_v5  ;;  %1480 = vmatprep.mubr.msk.f32.mxu1 (!%p140_p9), %vm1698_vm2, %v1699_v5  ;;  %v1534_v8 = vpack.c.bf16 (!%p140_p9), %v170_v7, %v169_v6  ;;  %v171_v9 = vld [vmem:[%s2111_s1 + $0x20] sm:$0xff] (!%p140_p9)  ;;  %v172_v10 = vld [vmem:[%s2111_s1 + $0x28] sm:$0xff] (!%p140_p9)  ;;  %v173_v12 = vld [vmem:[%s2111_s1 + $0x30] sm:$0xff] (!%p140_p9)  ;;  %s1700_s8 = smov (!%p140_p9), 64   ;;  %s1701_s9 = smov (!%p140_p9), 96   ;;  %vm564_vm5 = vcmask (!%p140_p9), 195584  }
  0x10   : > { %1532 = vmatpush3.bf16.xpose.msk.msra.mxu0 (!%p140_p9), %vm1792_vm1, %v1530_v3  ;;  %v1538_v11 = vpack.c.bf16 (!%p140_p9), %v172_v10, %v171_v9  ;;  %v174_v13 = vld [vmem:[%s2111_s1 + $0x38] sm:$0xff] (!%p140_p9)  ;;  %v175_v15 = vld [vmem:[%s2111_s1 + $0x40] sm:$0xff] (!%p140_p9)  ;;  %v176_v16 = vld [vmem:[%s2111_s1 + $0x48] sm:$0xff] (!%p140_p9)  ;;  %s1702_s10 = smov (!%p140_p9), 88   ;;  %s1703_s11 = smov (!%p140_p9), 120   ;;  %vm562_vm6 = vcmask (!%p140_p9), 130048  }
  0x11   : > { %1533 = vmatprep.subr.bf16.mxu0 (!%p140_p9), %v1697_v2  ;;  %v1542_v14 = vpack.c.bf16 (!%p140_p9), %v174_v13, %v173_v12  ;;  %v1546_v17 = vpack.c.bf16 (!%p140_p9), %v176_v16, %v175_v15  ;;  %v177_v18 = vld [vmem:[%s2111_s1 + $0x50] sm:$0xff] (!%p140_p9)  ;;  %v178_v19 = vld [vmem:[%s2111_s1 + $0x58] sm:$0xff] (!%p140_p9)  ;;  %s1704_s17 = smov (!%p140_p9), 56   ;;  %s1705_s19 = smov (!%p140_p9), 112   ;;  %vm566_vm7 = vcmask (!%p140_p9), 254976  }
  0x12   : > { %v1550_v20 = vpack.c.bf16 (!%p140_p9), %v178_v19, %v177_v18  ;;  %s1706_s20 = smov (!%p140_p9), 80   ;;  %s1707_s24 = smov (!%p140_p9), 48  }
  0x13   : > { %s1708_s25 = smov (!%p140_p9), 72   ;;  %s1709_s26 = smov (!%p140_p9), 104  }
  0x14   : > { %s1710_s27 = smov (!%p140_p9), 40   ;;  %s1711_s28 = smov (!%p140_p9), 8  }
  0x15   : > { %s163_s30 = scalar_select %p162_p10, %s1756_s16, 1 }
  0x16   : > { %s1712_s29 = smov 24  }
  0x17   : > { %s1382_s4 = sshll.u32 %s163_s30, 3  ;;  %s1713_s30 = smov 16  }
  0x18   : > { %1536 = vmatpush3.bf16.xpose.msk.msra.mxu0 %vm1792_vm1, %v1534_v8  ;;  %s165_s7 = scalar_lea.vmem %s2110_s0, %s1382_s4 }
  0x19   : > { %1537 = vmatprep.subr.bf16.mxu0 %v1697_v2  ;;  %v166_v21 = vld [vmem:[%s165_s7] sm:$0xff] }
  0x20   : > { %1540 = vmatpush3.bf16.xpose.msk.msra.mxu0 %vm1792_vm1, %v1538_v11 }
  0x21   : > { %1541 = vmatprep.subr.bf16.mxu0 %v1697_v2 }
  0x28   : > { %1544 = vmatpush3.bf16.xpose.msk.msra.mxu0 %vm1792_vm1, %v1542_v14  ;;  %v514_v14 = vlaneseq }
  0x29   : > { %1545 = vmatprep.subr.bf16.mxu0 %v1697_v2 }
  0x2a   : > { %v1925_v15 = vshrl.u32 %v514_v14, 7 }
  0x2c   : > { %v1930_v18 = vsub.s32 0, %v1925_v15 }
  0x30   : > { %1548 = vmatpush3.bf16.xpose.msk.msra.mxu0 %vm1792_vm1, %v1546_v17 }
  0x31   : > { %1549 = vmatprep.subr.bf16.mxu0 %v1697_v2 }
  0x38   : > { %1552 = vmatpush3.bf16.xpose.msk.msra.mxu0 %vm1792_vm1, %v1550_v20 }
  0x3f   : > { %1476 = vmatmul.mubr.msk.f32.vlgmr.msra.gmra.mrb[0].mxu0 %vm179_vm0, %v166_v21 }
 0x112   : > { %v1854_v22 = vpop.f32.mrb[0].mxu0 }
 0x113   : > { %298 = vrot.lane.b32.xlu1 %v1854_v22, %s1700_s8  ;;  %293 = vrot.lane.b32.xlu0 %v1854_v22, %s1701_s9  ;;  %v1477_v23 = vpop.f32.mrb[1].mxu0  ;;  %v1859_v24 = vmul.f32 0.35355338, %v1854_v22 }
 0x115   : > { %291 = vst.msk [vmem:[#allocation2] sm:$0xff] %vm290_vm3, %v1859_v24 }
 0x117   : > { %309 = vrot.lane.b32.xlu1 %v1854_v22, %s1702_s10 }
 0x11b   : > { %304 = vrot.lane.b32.xlu1 %v1859_v24, %s1703_s11 }
 0x11c   : > { %v349_v30 = vld [vmem:[#allocation2] sm:$0xff] }
 0x185   : > { %v299_v25 = vpop.permute.xlu1 %298  ;;  %v294_v26 = vpop.permute.xlu0 %293 }
 0x186   : > { %302 = vst.msk [vmem:[#allocation2 + $0x40] sm:$0xff] %vm290_vm3, %v299_v25  ;;  %297 = vst.msk [vmem:[#allocation2 + $0x20] sm:$0xff] %vm290_vm3, %v294_v26 }
 0x189   : > { %v310_v27 = vpop.permute.xlu1 %309 }
 0x18a   : > { %313 = vst.msk [vmem:[#allocation2 + $0x28] sm:$0xff] %vm290_vm3, %v310_v27 }
 0x18d   : > { %v305_v28 = vpop.permute.xlu1 %304  ;;  %v350_v29 = vld [vmem:[#allocation2 + $0x20] sm:$0xff] }
 0x18e   : > { %308 = vst.msk [vmem:[#allocation2 + $0x8] sm:$0xff] %vm290_vm3, %v305_v28  ;;  %1479 = vmatpush3.xpose.msk.msra.mxu1 %vm290_vm3, %v350_v29  ;;  %v351_v31 = vld [vmem:[#allocation2 + $0x40] sm:$0xff] }
 0x18f   : > { %1483 = vmatprep.subr.mxu1 %v1699_v5 }
 0x191   : > { %1481 = vmatmul.mubr.msk.f32.vlgmr.msra.gmra.mrb[0].mxu1 %vm290_vm3, %v349_v30  ;;  %v569_v41 = vld [vmem:[#allocation2 + $0x28] sm:$0xff] }
 0x192   : > { %1484 = vmatpush3.msra.mxu1 %v351_v31  ;;  %1485 = vmatprep.mubr.msk.f32.mxu1 %vm1698_vm2, %v1699_v5 }
 0x193   : > { %1488 = vmatprep.subr.mxu1 %v1699_v5 }
 0x195   : > { %v568_v42 = vld [vmem:[#allocation2 + $0x8] sm:$0xff] }
 0x264   : > { %v424_v32 = vpop.f32.mrb[0].mxu1 }
 0x265   : > { %v1482_v33 = vpop.f32.mrb[1].mxu1  ;;  %v428_v34 = vsel %vm290_vm3, %v424_v32, -inf }
 0x266   : > { %429 = vmax.xlane.f32.xlu0 %v428_v34 }
 0x27c   : > { %314 = vrot.lane.b32.xlu0 %v1854_v22, %s1704_s17  ;;  %s159_s17 = sand.u32 1, %s1687_s13  }
 0x280   : > { %319 = vrot.lane.b32.xlu0 %v1859_v24, %s1705_s19  ;;  %s1381_s19 = sshll.u32 %s159_s17, 3 }
 0x2f3   : > { %v430_v35 = vpop.xlane.xlu0 %429 }
 0x2f4   : > { %v431_v36 = vsub.f32 %v424_v32, %v430_v35 }
 0x2f6   : > { %v432_v37 = vmul.f32 1.442695, %v431_v36 }
 0x2f7   : > { %v315_v38 = vpop.permute.xlu0 %314 }
 0x2f8   : > { %1617 = vpow2.f32 %v432_v37  ;;  %318 = vst.msk [vmem:[#allocation2 + $0x48] sm:$0xff] %vm290_vm3, %v315_v38 }
 0x2fb   : > { %v320_v39 = vpop.permute.xlu0 %319 }
 0x2fc   : > { %323 = vst.msk [vmem:[#allocation2 + $0x10] sm:$0xff] %vm290_vm3, %v320_v39 }
 0x2ff   : > { %v570_v43 = vld [vmem:[#allocation2 + $0x48] sm:$0xff] }
 0x302   : > { %v1880_v40 = vpop.eup %1617 }
 0x303   : > { %1486 = vmatmul.mubr.msk.f32.vlgmr.msra.gmra.mrb[2].mxu1 %vm290_vm3, %v1880_v40  ;;  %v783_v58 = vld [vmem:[#allocation2 + $0x10] sm:$0xff]  ;;  %v434_v28 = vsel %vm290_vm3, %v1880_v40, 0.0 }
 0x304   : > { %1489 = vmatpush3.xpose.msk.msra.mxu1 %vm290_vm3, %v569_v41  ;;  %1490 = vmatprep.mubr.msk.f32.mxu1 %vm1698_vm2, %v1699_v5 }
 0x305   : > { %1493 = vmatprep.subr.mxu1 %v1699_v5 }
 0x307   : > { %1491 = vmatmul.mubr.msk.f32.vlgmr.msra.gmra.mrb[4].mxu1 %vm290_vm3, %v568_v42 }
 0x308   : > { %1494 = vmatpush3.msra.mxu1 %v570_v43  ;;  %1495 = vmatprep.mubr.msk.f32.mxu1 %vm1698_vm2, %v1699_v5 }
 0x309   : > { %1498 = vmatprep.subr.mxu1 %v1699_v5 }
 0x3d6   : > { %v1892_v44 = vpop.f32.mrb[2].mxu1 }
 0x3d7   : > { %v1487_v45 = vpop.f32.mrb[3].mxu1 }
 0x3d8   : > { %v1955_v45 = vsub.s32 1, %v1925_v15 }
 0x3da   : > { %v643_v46 = vpop.f32.mrb[4].mxu1 }
 0x3db   : > { %v1492_v47 = vpop.f32.mrb[5].mxu1  ;;  %v647_v48 = vsel %vm290_vm3, %v643_v46, -inf }
 0x3dc   : > { %648 = vmax.xlane.f32.xlu1 %v647_v48  ;;  %v1958_v47 = vsub.s32 3, %v1925_v15 }
 0x3ed   : > { %324 = vrot.lane.b32.xlu1 %v1854_v22, %s1706_s20  ;;  %s1414_s20 = sshll.u32 %s1756_s16, 7  ;;  %s1714_s16 = smov [#allocation4]  }
 0x3ee   : > { %s1637_s4 = sshll.u32 %s1714_s16, 4  ;;  %s1638_s4 = int_to_ptr.vmem [resolvable:$false] %s1637_s4 }
 0x3ef   : > { %s1639_s5 = scalar_lea.vmem %s1638_s4, 256 }
 0x3f1   : > { %329 = vrot.lane.b32.xlu1 %v1854_v22, %s1707_s24  ;;  %s161_s24 = scalar_lea.vmem [#allocation4], %s1381_s19 }
 0x3f5   : > { %339 = vrot.lane.b32.xlu1 %v1854_v22, %s1708_s25  ;;  %s1318_s25 = sshll.u32 %s161_s24, 4  ;;  %s2069_s25 = int_to_ptr.vmem [resolvable:$true] %s1318_s25 }
 0x3f6   : > { %p1640_p0 = scmp.lt.s32.totalorder %s2069_s25, %s1638_s4 }
 0x3f9   : > { %334 = vrot.lane.b32.xlu1 %v1859_v24, %s1709_s26 }
 0x469   : > { %v649_v49 = vpop.xlane.xlu1 %648 }
 0x46a   : > { %v650_v50 = vsub.f32 %v643_v46, %v649_v49 }
 0x46c   : > { %v651_v51 = vmul.f32 1.442695, %v650_v50 }
 0x46d   : > { %v325_v52 = vpop.permute.xlu1 %324 }
 0x46e   : > { %1619 = vpow2.f32 %v651_v51  ;;  %328 = vst.msk [vmem:[#allocation2 + $0x30] sm:$0xff] %vm290_vm3, %v325_v52 }
 0x471   : > { %v330_v53 = vpop.permute.xlu1 %329 }
 0x472   : > { %333 = vst.msk [vmem:[#allocation2 + $0x50] sm:$0xff] %vm290_vm3, %v330_v53 }
 0x475   : > { %v340_v54 = vpop.permute.xlu1 %339  ;;  %v784_v56 = vld [vmem:[#allocation2 + $0x30] sm:$0xff] }
 0x476   : > { %343 = vst.msk [vmem:[#allocation2 + $0x38] sm:$0xff] %vm290_vm3, %v340_v54 }
 0x478   : > { %v1620_v55 = vpop.eup %1619 }
 0x479   : > { %1496 = vmatmul.mubr.msk.f32.vlgmr.msra.gmra.mrb[6].mxu1 %vm290_vm3, %v1620_v55  ;;  %v335_v57 = vpop.permute.xlu1 %334  ;;  %v785_v59 = vld [vmem:[#allocation2 + $0x50] sm:$0xff]  ;;  %v653_v1 = vsel %vm290_vm3, %v1620_v55, 0.0 }
 0x47a   : > { %1499 = vmatpush3.xpose.msk.msra.mxu1 %vm290_vm3, %v784_v56  ;;  %338 = vst.msk [vmem:[#allocation2 + $0x18] sm:$0xff] %vm290_vm3, %v335_v57  ;;  %1500 = vmatprep.mubr.msk.f32.mxu1 %vm1698_vm2, %v1699_v5 }
 0x47b   : > { %1503 = vmatprep.subr.mxu1 %v1699_v5 }
 0x47d   : > { %1501 = vmatmul.mubr.msk.f32.vlgmr.msra.gmra.mrb[8].mxu1 %vm290_vm3, %v783_v58  ;;  %v999_v10 = vld [vmem:[#allocation2 + $0x38] sm:$0xff] }
 0x47e   : > { %1504 = vmatpush3.msra.mxu1 %v785_v59  ;;  %1505 = vmatprep.mubr.msk.f32.mxu1 %vm1698_vm2, %v1699_v5 }
 0x47f   : > { %1508 = vmatprep.subr.mxu1 %v1699_v5 }
 0x481   : > { %v998_v11 = vld [vmem:[#allocation2 + $0x18] sm:$0xff] }
 0x54c   : > { %v725_v60 = vpop.f32.mrb[6].mxu1 }
 0x54d   : > { %v1497_v61 = vpop.f32.mrb[7].mxu1 }
 0x550   : > { %v858_v62 = vpop.f32.mrb[8].mxu1 }
 0x551   : > { %v1502_v63 = vpop.f32.mrb[9].mxu1  ;;  %v862_v0 = vsel %vm290_vm3, %v858_v62, -inf }
 0x552   : > { %863 = vmax.xlane.f32.xlu0 %v862_v0  ;;  %v1988_v0 = vsub.s32 2, %v1925_v15 }
 0x568   : > { %344 = vrot.lane.b32.xlu0 %v1854_v22, %s1710_s27 }
 0x587   : > { %654 = vadd.xlane.f32.xlu0 %v653_v1 }
 0x5df   : > { %v864_v3 = vpop.xlane.xlu0 %863 }
 0x5e0   : > { %v865_v6 = vsub.f32 %v858_v62, %v864_v3 }
 0x5e2   : > { %v866_v7 = vmul.f32 1.442695, %v865_v6 }
 0x5e3   : > { %v345_v8 = vpop.permute.xlu0 %344 }
 0x5e4   : > { %1621 = vpow2.f32 %v866_v7  ;;  %348 = vst.msk [vmem:[#allocation2 + $0x58] sm:$0xff] %vm290_vm3, %v345_v8 }
 0x5eb   : > { %v1000_v12 = vld [vmem:[#allocation2 + $0x58] sm:$0xff] }
 0x5ee   : > { %v1622_v9 = vpop.eup %1621 }
 0x5ef   : > { %1506 = vmatmul.mubr.msk.f32.vlgmr.msra.gmra.mrb[10].mxu1 %vm290_vm3, %v1622_v9  ;;  %v868_v29 = vsel %vm290_vm3, %v1622_v9, 0.0 }
 0x5f0   : > { %1509 = vmatpush3.xpose.msk.msra.mxu1 %vm290_vm3, %v999_v10  ;;  %1510 = vmatprep.mubr.msk.f32.mxu1 %vm1698_vm2, %v1699_v5 }
 0x5f1   : > { %1513 = vmatprep.subr.mxu1 %v1699_v5 }
 0x5f3   : > { %1511 = vmatmul.mubr.msk.f32.vlgmr.msra.gmra.mrb[12].mxu1 %vm290_vm3, %v998_v11 }
 0x5f4   : > { %1514 = vmatpush3.msra.mxu1 %v1000_v12  ;;  %1515 = vmatprep.mubr.msk.f32.mxu1 %vm1698_vm2, %v1699_v5 }
 0x5f5   : > { %1553 = vmatprep.subr.bf16.mxu1 %v1697_v2 }
 0x614   : > { %v655_v13 = vpop.xlane.xlu0 %654 }
 0x615   : > { %1623 = vrcp.f32 %v655_v13 }
 0x61f   : > { %v1624_v16 = vpop.eup %1623 }
 0x620   : > { %v1927_v17 = vmul.f32 %v1624_v16, %v725_v60 }
 0x622   : > { %v1934_v19 = vcombine.high %v1927_v17, %v1927_v17  ;;  %v736_v20 = vrot.slane %v1927_v17, %v1930_v18  ;;  %v770_v57 = vrot.slane %v1927_v17, %v1958_v47  ;;  %v746_v63 = vrot.slane %v1927_v17, %v1955_v45 }
 0x623   : > { %v758_v9 = vrot.slane %v1927_v17, %v1988_v0 }
 0x624   : > { %v740_v21 = vrot.slane %v1934_v19, %v1930_v18  ;;  %v774_v54 = vrot.slane %v1934_v19, %v1958_v47  ;;  %v750_v62 = vrot.slane %v1934_v19, %v1955_v45  ;;  %v762_v8 = vrot.slane %v1934_v19, %v1988_v0 }
 0x626   : > { %v1941_v22 = vsel %vm522_vm4, %v740_v21, %v736_v20  ;;  %v775_v59 = vsel %vm522_vm4, %v774_v54, %v770_v57  ;;  %v751_v1 = vsel %vm522_vm4, %v750_v62, %v746_v63  ;;  %v763_v10 = vsel %vm522_vm4, %v762_v8, %v758_v9 }
 0x6c2   : > { %v940_v23 = vpop.f32.mrb[10].mxu1 }
 0x6c3   : > { %v1507_v24 = vpop.f32.mrb[11].mxu1 }
 0x6c6   : > { %v1073_v25 = vpop.f32.mrb[12].mxu1 }
 0x6c7   : > { %v1512_v26 = vpop.f32.mrb[13].mxu1  ;;  %v1077_v27 = vsel %vm290_vm3, %v1073_v25, -inf }
 0x6c8   : > { %1078 = vmax.xlane.f32.xlu1 %v1077_v27 }
 0x6cc   : > { %435 = vadd.xlane.f32.xlu1 %v434_v28 }
 0x6d0   : > { %869 = vadd.xlane.f32.xlu1 %v868_v29 }
 0x755   : > { %v1079_v30 = vpop.xlane.xlu1 %1078 }
 0x756   : > { %v1080_v31 = vsub.f32 %v1073_v25, %v1079_v30 }
 0x758   : > { %v1081_v32 = vmul.f32 1.442695, %v1080_v31 }
 0x759   : > { %v436_v33 = vpop.xlane.xlu1 %435 }
 0x75a   : > { %1625 = vpow2.f32 %v1081_v32 }
 0x75b   : > { %1627 = vrcp.f32 %v436_v33 }
 0x75d   : > { %v870_v34 = vpop.xlane.xlu1 %869 }
 0x75e   : > { %1629 = vrcp.f32 %v870_v34 }
 0x764   : > { %v1626_v35 = vpop.eup %1625 }
 0x765   : > { %v1628_v36 = vpop.eup %1627  ;;  %1516 = vmatmul.mubr.msk.f32.vlgmr.msra.gmra.mrb[14].mxu1 %vm290_vm3, %v1626_v35  ;;  %v1083_v37 = vsel %vm290_vm3, %v1626_v35, 0.0  ;;  %v1214_v35 = vld [vmem:[%s2112_s2] sm:$0xff] }
 0x766   : > { %v511_v38 = vmul.f32 %v1628_v36, %v1892_v44  ;;  %1084 = vadd.xlane.f32.xlu1 %v1083_v37  ;;  %1526 = vmatprep.mubr.msk.f32.mxu1 %vm1698_vm2, %v1699_v5  ;;  %v1215_v36 = vld [vmem:[%s2112_s2 + $0x8] sm:$0xff] }
 0x767   : > { %v1554_v37 = vpack.c.bf16 %v1215_v36, %v1214_v35 }
 0x768   : > { %v1630_v39 = vpop.eup %1629  ;;  %v513_v40 = vcombine.high %v511_v38, %v511_v38  ;;  %v517_v42 = vrot.slane %v511_v38, %v1930_v18  ;;  %v528_v60 = vrot.slane %v511_v38, %v1955_v45  ;;  %v540_v6 = vrot.slane %v511_v38, %v1988_v0 }
 0x769   : > { %v945_v41 = vmul.f32 %v1630_v39, %v940_v23  ;;  %v552_v15 = vrot.slane %v511_v38, %v1958_v47  ;;  %1556 = vmatpush3.bf16.xpose.msk.msra.mxu1 %vm1792_vm1, %v1554_v37 }
 0x76a   : > { %v521_v43 = vrot.slane %v513_v40, %v1930_v18  ;;  %v532_v58 = vrot.slane %v513_v40, %v1955_v45  ;;  %v544_v3 = vrot.slane %v513_v40, %v1988_v0  ;;  %v556_v14 = vrot.slane %v513_v40, %v1958_v47  ;;  %1557 = vmatprep.subr.bf16.mxu1 %v1697_v2 }
 0x76b   : > { %v947_v46 = vcombine.high %v945_v41, %v945_v41  ;;  %v961_v48 = vrot.slane %v945_v41, %v1955_v45  ;;  %v951_v49 = vrot.slane %v945_v41, %v1930_v18  ;;  %v985_v51 = vrot.slane %v945_v41, %v1958_v47 }
 0x76c   : > { %v523_v44 = vsel %vm522_vm4, %v521_v43, %v517_v42  ;;  %v533_v61 = vsel %vm522_vm4, %v532_v58, %v528_v60  ;;  %v545_v7 = vsel %vm522_vm4, %v544_v3, %v540_v6  ;;  %v973_v12 = vrot.slane %v945_v41, %v1988_v0 }
 0x76d   : > { %v965_v5 = vrot.slane %v947_v46, %v1955_v45  ;;  %v955_v50 = vrot.slane %v947_v46, %v1930_v18  ;;  %v989_v52 = vrot.slane %v947_v46, %v1958_v47  ;;  %v977_v11 = vrot.slane %v947_v46, %v1988_v0 }
 0x76e   : > { %v557_v16 = vsel %vm522_vm4, %v556_v14, %v552_v15 }
 0x76f   : > { %v966_v53 = vsel %vm522_vm4, %v965_v5, %v961_v48  ;;  %v956_v55 = vsel %vm522_vm4, %v955_v50, %v951_v49  ;;  %v1973_v56 = vsel %vm522_vm4, %v989_v52, %v985_v51  ;;  %v978_v13 = vsel %vm522_vm4, %v977_v11, %v973_v12  ;;  %v1217_v48 = vld [vmem:[%s2112_s2 + $0x18] sm:$0xff] }
 0x770   : > { %967 = vrot.lane.b32.xlu0 %v966_v53, %s1711_s28 }
 0x774   : > { %776 = vrot.lane.b32.xlu0 %v775_v59, %s1712_s29 }
 0x777   : > { %534 = vrot.lane.b32.xlu1 %v533_v61, %s1711_s28 }
 0x77b   : > { %752 = vrot.lane.b32.xlu1 %v751_v1, %s1711_s28 }
 0x77f   : > { %546 = vrot.lane.b32.xlu1 %v545_v7, %s1713_s30 }
 0x783   : > { %764 = vrot.lane.b32.xlu1 %v763_v10, %s1713_s30 }
 0x787   : > { %979 = vrot.lane.b32.xlu1 %v978_v13, %s1713_s30 }
 0x78b   : > { %558 = vrot.lane.b32.xlu1 %v557_v16, %s1712_s29 }
 0x7e2   : > { %v968_v17 = vpop.permute.xlu0 %967 }
 0x7e3   : > { %v994_v19 = vsel %vm290_vm3, %v956_v55, %v968_v17 }
 0x7e6   : > { %v777_v27 = vpop.permute.xlu0 %776 }
 0x7f3   : > { %v1085_v20 = vpop.xlane.xlu1 %1084 }
 0x7f4   : > { %1631 = vrcp.f32 %v1085_v20 }
 0x7f7   : > { %v535_v21 = vpop.permute.xlu1 %534 }
 0x7f8   : > { %v561_v32 = vsel %vm290_vm3, %v523_v44, %v535_v21  ;;  %v1216_v44 = vld [vmem:[%s2112_s2 + $0x10] sm:$0xff] }
 0x7f9   : > { %v1558_v51 = vpack.c.bf16 %v1217_v48, %v1216_v44 }
 0x7fb   : > { %v753_v23 = vpop.permute.xlu1 %752  ;;  %1560 = vmatpush3.bf16.xpose.msk.msra.mxu1 %vm1792_vm1, %v1558_v51 }
 0x7fc   : > { %v779_v25 = vsel %vm290_vm3, %v1941_v22, %v753_v23 }
 0x7fe   : > { %v1632_v38 = vpop.eup %1631 }
 0x7ff   : > { %v547_v24 = vpop.permute.xlu1 %546 }
 0x800   : > { %v563_v33 = vsel %vm562_vm6, %v561_v32, %v547_v24 }
 0x803   : > { %v765_v26 = vpop.permute.xlu1 %764 }
 0x804   : > { %v780_v28 = vsel %vm562_vm6, %v779_v25, %v765_v26 }
 0x805   : > { %v781_v29 = vsel %vm564_vm5, %v780_v28, %v777_v27 }
 0x806   : > { %782 = vst.msk [vmem:[#allocation3 + $0x2] sm:$0x3] %vm566_vm7, %v781_v29 }
 0x807   : > { %v980_v30 = vpop.permute.xlu1 %979 }
 0x808   : > { %v995_v31 = vsel %vm562_vm6, %v994_v19, %v980_v30 }
 0x80b   : > { %v559_v34 = vpop.permute.xlu1 %558 }
 0x80c   : > { %v565_v22 = vsel %vm564_vm5, %v563_v33, %v559_v34 }
 0x80d   : > { %567 = vst.msk [vmem:[#allocation3] sm:$0x3] %vm566_vm7, %v565_v22 }
 0x838   : > { %v1155_v39 = vpop.f32.mrb[14].mxu1 }
 0x839   : > { %v1160_v40 = vmul.f32 %v1632_v38, %v1155_v39  ;;  %v1517_v41 = vpop.f32.mrb[15].mxu1 }
 0x83b   : > { %v1162_v42 = vcombine.high %v1160_v40, %v1160_v40  ;;  %v1200_v43 = vrot.slane %v1160_v40, %v1958_v47  ;;  %v1176_v46 = vrot.slane %v1160_v40, %v1955_v45  ;;  %v1166_v49 = vrot.slane %v1160_v40, %v1930_v18 }
 0x83d   : > { %v1204_v5 = vrot.slane %v1162_v42, %v1958_v47  ;;  %v1180_v2 = vrot.slane %v1162_v42, %v1955_v45  ;;  %v1170_v50 = vrot.slane %v1162_v42, %v1930_v18  ;;  %v1192_v54 = vrot.slane %v1162_v42, %v1988_v0 }
 0x83e   : > { %v1188_v47 = vrot.slane %v1160_v40, %v1988_v0 }
 0x83f   : > { %v1205_v52 = vsel %vm522_vm4, %v1204_v5, %v1200_v43  ;;  %v1181_v53 = vsel %vm522_vm4, %v1180_v2, %v1176_v46  ;;  %v1171_v55 = vsel %vm522_vm4, %v1170_v50, %v1166_v49 }
 0x840   : > { %1206 = vrot.lane.b32.xlu0 %v1205_v52, %s1712_s29  ;;  %1182 = vrot.lane.b32.xlu1 %v1181_v53, %s1711_s28  ;;  %v1193_v18 = vsel %vm522_vm4, %v1192_v54, %v1188_v47  ;;  %s2067_s28 = scalar_lea.hbm %s2113_s3, %s1414_s20 }
 0x844   : > { %1194 = vrot.lane.b32.xlu1 %v1193_v18, %s1713_s30  ;;  %s1633_s30 = scalar_lea.vmem %s2069_s25, 128 }
 0x845   : > { %p1634_p11 = scmp.ne.s32.totalorder %s2069_s25, %s1633_s30  ;;  %p1641_p1 = scmp.lt.s32.totalorder %s1639_s5, %s1633_s30 }
 0x847   : > { %p1635_p12 = pnand %p1634_p11, %p1773_p5  ;;  %p1642_p2 = por %p1641_p1, %p1640_p0 }
 0x848   : > { %991 = vrot.lane.b32.xlu1 %v1973_v56, %s1712_s29  ;;  %s1305_s29 = scalar_lea.sflag [#allocation5], %s159_s17 }
 0x849   : > { %p1636_p13 = pneg %p1635_p12 }
 0x84b   : > { %p1643_p3 = pnand %p1642_p2, %p1636_p13 }
 0x8b2   : > { %v1183_v45 = vpop.permute.xlu1 %1182  ;;  %v1207_v59 = vpop.permute.xlu0 %1206 }
 0x8b3   : > { %v1209_v57 = vsel %vm290_vm3, %v1171_v55, %v1183_v45 }
 0x8b6   : > { %v1195_v58 = vpop.permute.xlu1 %1194 }
 0x8b7   : > { %v1210_v60 = vsel %vm562_vm6, %v1209_v57, %v1195_v58 }
 0x8b8   : > { %v1211_v61 = vsel %vm564_vm5, %v1210_v60, %v1207_v59 }
 0x8b9   : > { %1212 = vst.msk [vmem:[#allocation3 + $0x6] sm:$0x3] %vm566_vm7, %v1211_v61 }
 0x8ba   : > { %v992_v4 = vpop.permute.xlu1 %991 }
 0x8bb   : > { %v996_v62 = vsel %vm564_vm5, %v995_v31, %v992_v4 }
 0x8bc   : > { %997 = vst.msk [vmem:[#allocation3 + $0x4] sm:$0x3] %vm566_vm7, %v996_v62 }
 0x8c3   : > { %v1213_v63 = vld [vmem:[#allocation3] sm:$0xff] }
 0x8c4   : > { %1527 = vmatmul.mubr.msk.f32.vlgmr.msra.gmra.mrb[16].mxu1 %vm179_vm0, %v1213_v63 }
 0x997   : > { %v1299_v56 = vpop.f32.mrb[16].mxu1 }
 0x998   : > { %1303 = vst.msk [vmem:[%s161_s24] sm:$0xff] %vm179_vm0, %v1299_v56  ;;  %v1528_v0 = vpop.f32.mrb[17].mxu1 }
 0x999   : > { %1646 = shalt.err (!%p1643_p3)
}
 0x99a   : > { %s1647_s6 = scalar_lea.hbm %s2067_s28, 128  ;;  %s1651_s9 = scalar_lea.hbm %s2113_s3, 256 }
 0x99b   : > { %p1648_p4 = scmp.ne.s32.totalorder %s2067_s28, %s1647_s6  ;;  %p1652_p9 = scmp.lt.u32.totalorder %s2067_s28, %s2113_s3 }
 0x99c   : > { %p1653_p10 = scmp.lt.u32.totalorder %s1651_s9, %s1647_s6  ;;  %p1655_p12 = scmp.lt.u32.totalorder %s1647_s6, %s2067_s28 }
 0x99d   : > { %p1649_p7 = pnand %p1648_p4, %p1773_p5 }
 0x99e   : > { %p1654_p11 = por %p1653_p10, %p1652_p9 }
 0x99f   : > { %p1650_p8 = pneg %p1649_p7 }
 0x9a0   : > { %p1656_p13 = por %p1655_p12, %p1654_p11 }
 0x9a2   : > { %p1657_p0 = pnand %p1656_p13, %p1650_p8 }
 0x9a4   : > { %1660 = shalt.err (!%p1657_p0)
}
 0x9a5   : > { %1561 = dma.vmem_to_hbm [thread:$0]  (%p1773_p5), %s2069_s25, 128, %s2067_s28, %s1305_s29  }
 0x9a6 PF: > { %p1567_p1 = scmp.ge.s32.totalorder %s1695_s15, 2  ;;  %s1330_s17 = sand.u32 1, %s1683_s12  }
 0x9a7   : > { %s1331_s19 = scalar_lea.sflag [#allocation5], %s1330_s17 }
 0x9a8   : > { %p1564_p2 = pnand %p1567_p1, %p1777_p6 }
 0x9aa   : > { %1678 = dma.done.wait (!%p1564_p2), %s1331_s19, 128  }
 0x9ab   : > { %1680 = vsyncadd (!%p1564_p2), %s1331_s19, 4294967168  ;;  %p13_p3 = scmp.ge.s32.totalorder %s1760_s18, 4   ;;  %s2118_s12 = smov %s1687_s13 }
 0x9ac   : > { %s2119_s13 = smov %s1691_s14  ;;  %s2120_s14 = smov %s1771_s21 }
 0x9ad   : > { %s2121_s15 = smov %s1760_s18  ;;  %15 = sbr.rel (!%p13_p3) target bundleno = 3 (0x3), region = 78 }
 0x9b4   :  { %1336 = vsyncpa [#allocation5], 1 }
 0x9b5   :  { %1338 = vsyncpa [#allocation5 + $0x1], 1 }

// kernel: tpu_custom_call.1
= control target key start
LH: loop header
LB: loop body
LE: loop exit
PB: predicated region body
PF: predicated region fallthrough
CT: control target
= control target key end

     0   :  { %8 = vsyncpa [#allocation5], 0  ;;  %s2110_s0 = inlined_call_operand.vmem [shape: f32[2,8,32], index: 0, kind: input, shape index: {}]   ;;  %s2111_s1 = inlined_call_operand.vmem [shape: f32[96,32], index: 1, kind: input, shape index: {}]   ;;  %s2112_s2 = inlined_call_operand.vmem [shape: f32[32,32], index: 2, kind: input, shape index: {}]   ;;  %s2113_s3 = inlined_call_operand.hbm [shape: f32[2,8,32], index: 3, kind: output, shape index: {}]  }
   0x1   :  { %10 = vsyncpa [#allocation5 + $0x1], 0  ;;  %s1735_s12 = smov 0   ;;  %s1737_s13 = smov 0  }
   0x2   :  { %s1739_s14 = smov 0   ;;  %s1741_s15 = smov 0  }
   0x3 LB: > { %s1756_s16 = sadd.s32 4294967295, %s1695_s15   ;;  %s1377_s17 = sadd.s32 4294967294, %s1695_s15   ;;  %s1695_s15 = sphi %s1741_s15, %s2121_s15   ;;  %s1691_s14 = sphi %s1739_s14, %s2120_s14   ;;  %s1687_s13 = sphi %s1737_s13, %s2119_s13   ;;  %s1683_s12 = sphi %s1735_s12, %s2118_s12  }
   0x4   : > { %s1760_s18 = sadd.s32 1, %s1695_s15   ;;  %s91_s19 = sadd.s32 1, %s1691_s14 }
   0x5   : > { %s88_s20 = ssub.s32 %s1695_s15, %s1760_s18  ;;  %p101_p0 = scmp.ne.s32.totalorder %s1691_s14, %s1687_s13 }
   0x6   : > { %p89_p1 = scmp.eq.s32.totalorder %s88_s20, 0  ;;  %p102_p2 = scmp.eq.s32.totalorder %s1756_s16, 1 }
   0x7   : > { %p107_p3 = scmp.ne.s32.totalorder %s1687_s13, %s1683_s12  ;;  %p108_p4 = scmp.eq.s32.totalorder %s1377_s17, 1 }
   0x8   : > { %s1771_s21 = scalar_select %p89_p1, %s1691_s14, %s91_s19  }
   0x9   : > { %p1773_p5 = por %p102_p2, %p101_p0  ;;  %p1777_p6 = por %p108_p4, %p107_p3 }
   0xa   : > { %p1380_p7 = scmp.ge.s32.totalorder %s1695_s15, 1  ;;  %p139_p8 = scmp.lt.s32.totalorder %s1695_s15, 3 }
   0xc   : > { %p140_p9 = pnand %p1380_p7, %p139_p8 }
   0xd   : > { %v167_v0 = vld [vmem:[%s2111_s1] sm:$0xff] (!%p140_p9)  ;;  %v168_v1 = vld [vmem:[%s2111_s1 + $0x8] sm:$0xff] (!%p140_p9)  ;;  %vm179_vm0 = vcmask (!%p140_p9), 261120   ;;  %v1697_v2 = vmov (!%p140_p9), 0.0|0.0   ;;  %vm1698_vm2 = vmmov (!%p140_p9), 0   ;;  %v1699_v5 = vmov (!%p140_p9), 0.0  }
   0xe   : > { %143 = sbr.rel (%p140_p9) target bundleno = 2470 (0x9a6), region = 32  ;;  %1529 = vmatprep.subr.bf16.mxu0 (!%p140_p9), %v1697_v2  ;;  %v1530_v3 = vpack.c.bf16 (!%p140_p9), %v168_v1, %v167_v0  ;;  %vm1792_vm1 = vmpackc.low (!%p140_p9), %vm179_vm0, %vm179_vm0  ;;  %1475 = vmatprep.mubr.msk.f32.mxu0 (!%p140_p9), %vm1698_vm2, %v1699_v5  ;;  %v169_v6 = vld [vmem:[%s2111_s1 + $0x10] sm:$0xff] (!%p140_p9)  ;;  %v170_v7 = vld [vmem:[%s2111_s1 + $0x18] sm:$0xff] (!%p140_p9)  ;;  %p162_p10 = scmp.lt.s32.totalorder (!%p140_p9), %s1756_s16, 1  ;;  %vm290_vm3 = vcmask (!%p140_p9), 64512   ;;  %vm522_vm4 = vcmask (!%p140_p9), 1041409  }
   0xf   : > { %1478 = vmatprep.subr.mxu1 (!%p140_p9), %v1699_v5  ;;  %1480 = vmatprep.mubr.msk.f32.mxu1 (!%p140_p9), %vm1698_vm2, %v1699_v5  ;;  %v1534_v8 = vpack.c.bf16 (!%p140_p9), %v170_v7, %v169_v6  ;;  %v171_v9 = vld [vmem:[%s2111_s1 + $0x20] sm:$0xff] (!%p140_p9)  ;;  %v172_v10 = vld [vmem:[%s2111_s1 + $0x28] sm:$0xff] (!%p140_p9)  ;;  %v173_v12 = vld [vmem:[%s2111_s1 + $0x30] sm:$0xff] (!%p140_p9)  ;;  %s1700_s8 = smov (!%p140_p9), 64   ;;  %s1701_s9 = smov (!%p140_p9), 96   ;;  %vm564_vm5 = vcmask (!%p140_p9), 195584  }
  0x10   : > { %1532 = vmatpush3.bf16.xpose.msk.msra.mxu0 (!%p140_p9), %vm1792_vm1, %v1530_v3  ;;  %v1538_v11 = vpack.c.bf16 (!%p140_p9), %v172_v10, %v171_v9  ;;  %v174_v13 = vld [vmem:[%s2111_s1 + $0x38] sm:$0xff] (!%p140_p9)  ;;  %v175_v15 = vld [vmem:[%s2111_s1 + $0x40] sm:$0xff] (!%p140_p9)  ;;  %v176_v16 = vld [vmem:[%s2111_s1 + $0x48] sm:$0xff] (!%p140_p9)  ;;  %s1702_s10 = smov (!%p140_p9), 88   ;;  %s1703_s11 = smov (!%p140_p9), 120   ;;  %vm562_vm6 = vcmask (!%p140_p9), 130048  }
  0x11   : > { %1533 = vmatprep.subr.bf16.mxu0 (!%p140_p9), %v1697_v2  ;;  %v1542_v14 = vpack.c.bf16 (!%p140_p9), %v174_v13, %v173_v12  ;;  %v1546_v17 = vpack.c.bf16 (!%p140_p9), %v176_v16, %v175_v15  ;;  %v177_v18 = vld [vmem:[%s2111_s1 + $0x50] sm:$0xff] (!%p140_p9)  ;;  %v178_v19 = vld [vmem:[%s2111_s1 + $0x58] sm:$0xff] (!%p140_p9)  ;;  %s1704_s17 = smov (!%p140_p9), 56   ;;  %s1705_s19 = smov (!%p140_p9), 112   ;;  %vm566_vm7 = vcmask (!%p140_p9), 254976  }
  0x12   : > { %v1550_v20 = vpack.c.bf16 (!%p140_p9), %v178_v19, %v177_v18  ;;  %s1706_s20 = smov (!%p140_p9), 80   ;;  %s1707_s24 = smov (!%p140_p9), 48  }
  0x13   : > { %s1708_s25 = smov (!%p140_p9), 72   ;;  %s1709_s26 = smov (!%p140_p9), 104  }
  0x14   : > { %s1710_s27 = smov (!%p140_p9), 40   ;;  %s1711_s28 = smov (!%p140_p9), 8  }
  0x15   : > { %s163_s30 = scalar_select %p162_p10, %s1756_s16, 1 }
  0x16   : > { %s1712_s29 = smov 24  }
  0x17   : > { %s1382_s4 = sshll.u32 %s163_s30, 3  ;;  %s1713_s30 = smov 16  }
  0x18   : > { %1536 = vmatpush3.bf16.xpose.msk.msra.mxu0 %vm1792_vm1, %v1534_v8  ;;  %s165_s7 = scalar_lea.vmem %s2110_s0, %s1382_s4 }
  0x19   : > { %1537 = vmatprep.subr.bf16.mxu0 %v1697_v2  ;;  %v166_v21 = vld [vmem:[%s165_s7] sm:$0xff] }
  0x20   : > { %1540 = vmatpush3.bf16.xpose.msk.msra.mxu0 %vm1792_vm1, %v1538_v11 }
  0x21   : > { %1541 = vmatprep.subr.bf16.mxu0 %v1697_v2 }
  0x28   : > { %1544 = vmatpush3.bf16.xpose.msk.msra.mxu0 %vm1792_vm1, %v1542_v14  ;;  %v514_v14 = vlaneseq }
  0x29   : > { %1545 = vmatprep.subr.bf16.mxu0 %v1697_v2 }
  0x2a   : > { %v1925_v15 = vshrl.u32 %v514_v14, 7 }
  0x2c   : > { %v1930_v18 = vsub.s32 0, %v1925_v15 }
  0x30   : > { %1548 = vmatpush3.bf16.xpose.msk.msra.mxu0 %vm1792_vm1, %v1546_v17 }
  0x31   : > { %1549 = vmatprep.subr.bf16.mxu0 %v1697_v2 }
  0x38   : > { %1552 = vmatpush3.bf16.xpose.msk.msra.mxu0 %vm1792_vm1, %v1550_v20 }
  0x3f   : > { %1476 = vmatmul.mubr.msk.f32.vlgmr.msra.gmra.mrb[0].mxu0 %vm179_vm0, %v166_v21 }
 0x112   : > { %v1854_v22 = vpop.f32.mrb[0].mxu0 }
 0x113   : > { %298 = vrot.lane.b32.xlu1 %v1854_v22, %s1700_s8  ;;  %293 = vrot.lane.b32.xlu0 %v1854_v22, %s1701_s9  ;;  %v1477_v23 = vpop.f32.mrb[1].mxu0  ;;  %v1859_v24 = vmul.f32 0.35355338, %v1854_v22 }
 0x115   : > { %291 = vst.msk [vmem:[#allocation2] sm:$0xff] %vm290_vm3, %v1859_v24 }
 0x117   : > { %309 = vrot.lane.b32.xlu1 %v1854_v22, %s1702_s10 }
 0x11b   : > { %304 = vrot.lane.b32.xlu1 %v1859_v24, %s1703_s11 }
 0x11c   : > { %v349_v30 = vld [vmem:[#allocation2] sm:$0xff] }
 0x185   : > { %v299_v25 = vpop.permute.xlu1 %298  ;;  %v294_v26 = vpop.permute.xlu0 %293 }
 0x186   : > { %302 = vst.msk [vmem:[#allocation2 + $0x40] sm:$0xff] %vm290_vm3, %v299_v25  ;;  %297 = vst.msk [vmem:[#allocation2 + $0x20] sm:$0xff] %vm290_vm3, %v294_v26 }
 0x189   : > { %v310_v27 = vpop.permute.xlu1 %309 }
 0x18a   : > { %313 = vst.msk [vmem:[#allocation2 + $0x28] sm:$0xff] %vm290_vm3, %v310_v27 }
 0x18d   : > { %v305_v28 = vpop.permute.xlu1 %304  ;;  %v350_v29 = vld [vmem:[#allocation2 + $0x20] sm:$0xff] }
 0x18e   : > { %308 = vst.msk [vmem:[#allocation2 + $0x8] sm:$0xff] %vm290_vm3, %v305_v28  ;;  %1479 = vmatpush3.xpose.msk.msra.mxu1 %vm290_vm3, %v350_v29  ;;  %v351_v31 = vld [vmem:[#allocation2 + $0x40] sm:$0xff] }
 0x18f   : > { %1483 = vmatprep.subr.mxu1 %v1699_v5 }
 0x191   : > { %1481 = vmatmul.mubr.msk.f32.vlgmr.msra.gmra.mrb[0].mxu1 %vm290_vm3, %v349_v30  ;;  %v569_v41 = vld [vmem:[#allocation2 + $0x28] sm:$0xff] }
 0x192   : > { %1484 = vmatpush3.msra.mxu1 %v351_v31  ;;  %1485 = vmatprep.mubr.msk.f32.mxu1 %vm1698_vm2, %v1699_v5 }
 0x193   : > { %1488 = vmatprep.subr.mxu1 %v1699_v5 }
 0x195   : > { %v568_v42 = vld [vmem:[#allocation2 + $0x8] sm:$0xff] }
 0x264   : > { %v424_v32 = vpop.f32.mrb[0].mxu1 }
 0x265   : > { %v1482_v33 = vpop.f32.mrb[1].mxu1  ;;  %v428_v34 = vsel %vm290_vm3, %v424_v32, -inf }
 0x266   : > { %429 = vmax.xlane.f32.xlu0 %v428_v34 }
 0x27c   : > { %314 = vrot.lane.b32.xlu0 %v1854_v22, %s1704_s17  ;;  %s159_s17 = sand.u32 1, %s1687_s13  }
 0x280   : > { %319 = vrot.lane.b32.xlu0 %v1859_v24, %s1705_s19  ;;  %s1381_s19 = sshll.u32 %s159_s17, 3 }
 0x2f3   : > { %v430_v35 = vpop.xlane.xlu0 %429 }
 0x2f4   : > { %v431_v36 = vsub.f32 %v424_v32, %v430_v35 }
 0x2f6   : > { %v432_v37 = vmul.f32 1.442695, %v431_v36 }
 0x2f7   : > { %v315_v38 = vpop.permute.xlu0 %314 }
 0x2f8   : > { %1617 = vpow2.f32 %v432_v37  ;;  %318 = vst.msk [vmem:[#allocation2 + $0x48] sm:$0xff] %vm290_vm3, %v315_v38 }
 0x2fb   : > { %v320_v39 = vpop.permute.xlu0 %319 }
 0x2fc   : > { %323 = vst.msk [vmem:[#allocation2 + $0x10] sm:$0xff] %vm290_vm3, %v320_v39 }
 0x2ff   : > { %v570_v43 = vld [vmem:[#allocation2 + $0x48] sm:$0xff] }
 0x302   : > { %v1880_v40 = vpop.eup %1617 }
 0x303   : > { %1486 = vmatmul.mubr.msk.f32.vlgmr.msra.gmra.mrb[2].mxu1 %vm290_vm3, %v1880_v40  ;;  %v783_v58 = vld [vmem:[#allocation2 + $0x10] sm:$0xff]  ;;  %v434_v28 = vsel %vm290_vm3, %v1880_v40, 0.0 }
 0x304   : > { %1489 = vmatpush3.xpose.msk.msra.mxu1 %vm290_vm3, %v569_v41  ;;  %1490 = vmatprep.mubr.msk.f32.mxu1 %vm1698_vm2, %v1699_v5 }
 0x305   : > { %1493 = vmatprep.subr.mxu1 %v1699_v5 }
 0x307   : > { %1491 = vmatmul.mubr.msk.f32.vlgmr.msra.gmra.mrb[4].mxu1 %vm290_vm3, %v568_v42 }
 0x308   : > { %1494 = vmatpush3.msra.mxu1 %v570_v43  ;;  %1495 = vmatprep.mubr.msk.f32.mxu1 %vm1698_vm2, %v1699_v5 }
 0x309   : > { %1498 = vmatprep.subr.mxu1 %v1699_v5 }
 0x3d6   : > { %v1892_v44 = vpop.f32.mrb[2].mxu1 }
 0x3d7   : > { %v1487_v45 = vpop.f32.mrb[3].mxu1 }
 0x3d8   : > { %v1955_v45 = vsub.s32 1, %v1925_v15 }
 0x3da   : > { %v643_v46 = vpop.f32.mrb[4].mxu1 }
 0x3db   : > { %v1492_v47 = vpop.f32.mrb[5].mxu1  ;;  %v647_v48 = vsel %vm290_vm3, %v643_v46, -inf }
 0x3dc   : > { %648 = vmax.xlane.f32.xlu1 %v647_v48  ;;  %v1958_v47 = vsub.s32 3, %v1925_v15 }
 0x3ed   : > { %324 = vrot.lane.b32.xlu1 %v1854_v22, %s1706_s20  ;;  %s1414_s20 = sshll.u32 %s1756_s16, 7  ;;  %s1714_s16 = smov [#allocation4]  }
 0x3ee   : > { %s1637_s4 = sshll.u32 %s1714_s16, 4  ;;  %s1638_s4 = int_to_ptr.vmem [resolvable:$false] %s1637_s4 }
 0x3ef   : > { %s1639_s5 = scalar_lea.vmem %s1638_s4, 256 }
 0x3f1   : > { %329 = vrot.lane.b32.xlu1 %v1854_v22, %s1707_s24  ;;  %s161_s24 = scalar_lea.vmem [#allocation4], %s1381_s19 }
 0x3f5   : > { %339 = vrot.lane.b32.xlu1 %v1854_v22, %s1708_s25  ;;  %s1318_s25 = sshll.u32 %s161_s24, 4  ;;  %s2069_s25 = int_to_ptr.vmem [resolvable:$true] %s1318_s25 }
 0x3f6   : > { %p1640_p0 = scmp.lt.s32.totalorder %s2069_s25, %s1638_s4 }
 0x3f9   : > { %334 = vrot.lane.b32.xlu1 %v1859_v24, %s1709_s26 }
 0x469   : > { %v649_v49 = vpop.xlane.xlu1 %648 }
 0x46a   : > { %v650_v50 = vsub.f32 %v643_v46, %v649_v49 }
 0x46c   : > { %v651_v51 = vmul.f32 1.442695, %v650_v50 }
 0x46d   : > { %v325_v52 = vpop.permute.xlu1 %324 }
 0x46e   : > { %1619 = vpow2.f32 %v651_v51  ;;  %328 = vst.msk [vmem:[#allocation2 + $0x30] sm:$0xff] %vm290_vm3, %v325_v52 }
 0x471   : > { %v330_v53 = vpop.permute.xlu1 %329 }
 0x472   : > { %333 = vst.msk [vmem:[#allocation2 + $0x50] sm:$0xff] %vm290_vm3, %v330_v53 }
 0x475   : > { %v340_v54 = vpop.permute.xlu1 %339  ;;  %v784_v56 = vld [vmem:[#allocation2 + $0x30] sm:$0xff] }
 0x476   : > { %343 = vst.msk [vmem:[#allocation2 + $0x38] sm:$0xff] %vm290_vm3, %v340_v54 }
 0x478   : > { %v1620_v55 = vpop.eup %1619 }
 0x479   : > { %1496 = vmatmul.mubr.msk.f32.vlgmr.msra.gmra.mrb[6].mxu1 %vm290_vm3, %v1620_v55  ;;  %v335_v57 = vpop.permute.xlu1 %334  ;;  %v785_v59 = vld [vmem:[#allocation2 + $0x50] sm:$0xff]  ;;  %v653_v1 = vsel %vm290_vm3, %v1620_v55, 0.0 }
 0x47a   : > { %1499 = vmatpush3.xpose.msk.msra.mxu1 %vm290_vm3, %v784_v56  ;;  %338 = vst.msk [vmem:[#allocation2 + $0x18] sm:$0xff] %vm290_vm3, %v335_v57  ;;  %1500 = vmatprep.mubr.msk.f32.mxu1 %vm1698_vm2, %v1699_v5 }
 0x47b   : > { %1503 = vmatprep.subr.mxu1 %v1699_v5 }
 0x47d   : > { %1501 = vmatmul.mubr.msk.f32.vlgmr.msra.gmra.mrb[8].mxu1 %vm290_vm3, %v783_v58  ;;  %v999_v10 = vld [vmem:[#allocation2 + $0x38] sm:$0xff] }
 0x47e   : > { %1504 = vmatpush3.msra.mxu1 %v785_v59  ;;  %1505 = vmatprep.mubr.msk.f32.mxu1 %vm1698_vm2, %v1699_v5 }
 0x47f   : > { %1508 = vmatprep.subr.mxu1 %v1699_v5 }
 0x481   : > { %v998_v11 = vld [vmem:[#allocation2 + $0x18] sm:$0xff] }
 0x54c   : > { %v725_v60 = vpop.f32.mrb[6].mxu1 }
 0x54d   : > { %v1497_v61 = vpop.f32.mrb[7].mxu1 }
 0x550   : > { %v858_v62 = vpop.f32.mrb[8].mxu1 }
 0x551   : > { %v1502_v63 = vpop.f32.mrb[9].mxu1  ;;  %v862_v0 = vsel %vm290_vm3, %v858_v62, -inf }
 0x552   : > { %863 = vmax.xlane.f32.xlu0 %v862_v0  ;;  %v1988_v0 = vsub.s32 2, %v1925_v15 }
 0x568   : > { %344 = vrot.lane.b32.xlu0 %v1854_v22, %s1710_s27 }
 0x587   : > { %654 = vadd.xlane.f32.xlu0 %v653_v1 }
 0x5df   : > { %v864_v3 = vpop.xlane.xlu0 %863 }
 0x5e0   : > { %v865_v6 = vsub.f32 %v858_v62, %v864_v3 }
 0x5e2   : > { %v866_v7 = vmul.f32 1.442695, %v865_v6 }
 0x5e3   : > { %v345_v8 = vpop.permute.xlu0 %344 }
 0x5e4   : > { %1621 = vpow2.f32 %v866_v7  ;;  %348 = vst.msk [vmem:[#allocation2 + $0x58] sm:$0xff] %vm290_vm3, %v345_v8 }
 0x5eb   : > { %v1000_v12 = vld [vmem:[#allocation2 + $0x58] sm:$0xff] }
 0x5ee   : > { %v1622_v9 = vpop.eup %1621 }
 0x5ef   : > { %1506 = vmatmul.mubr.msk.f32.vlgmr.msra.gmra.mrb[10].mxu1 %vm290_vm3, %v1622_v9  ;;  %v868_v29 = vsel %vm290_vm3, %v1622_v9, 0.0 }
 0x5f0   : > { %1509 = vmatpush3.xpose.msk.msra.mxu1 %vm290_vm3, %v999_v10  ;;  %1510 = vmatprep.mubr.msk.f32.mxu1 %vm1698_vm2, %v1699_v5 }
 0x5f1   : > { %1513 = vmatprep.subr.mxu1 %v1699_v5 }
 0x5f3   : > { %1511 = vmatmul.mubr.msk.f32.vlgmr.msra.gmra.mrb[12].mxu1 %vm290_vm3, %v998_v11 }
 0x5f4   : > { %1514 = vmatpush3.msra.mxu1 %v1000_v12  ;;  %1515 = vmatprep.mubr.msk.f32.mxu1 %vm1698_vm2, %v1699_v5 }
 0x5f5   : > { %1553 = vmatprep.subr.bf16.mxu1 %v1697_v2 }
 0x614   : > { %v655_v13 = vpop.xlane.xlu0 %654 }
 0x615   : > { %1623 = vrcp.f32 %v655_v13 }
 0x61f   : > { %v1624_v16 = vpop.eup %1623 }
 0x620   : > { %v1927_v17 = vmul.f32 %v1624_v16, %v725_v60 }
 0x622   : > { %v1934_v19 = vcombine.high %v1927_v17, %v1927_v17  ;;  %v736_v20 = vrot.slane %v1927_v17, %v1930_v18  ;;  %v770_v57 = vrot.slane %v1927_v17, %v1958_v47  ;;  %v746_v63 = vrot.slane %v1927_v17, %v1955_v45 }
 0x623   : > { %v758_v9 = vrot.slane %v1927_v17, %v1988_v0 }
 0x624   : > { %v740_v21 = vrot.slane %v1934_v19, %v1930_v18  ;;  %v774_v54 = vrot.slane %v1934_v19, %v1958_v47  ;;  %v750_v62 = vrot.slane %v1934_v19, %v1955_v45  ;;  %v762_v8 = vrot.slane %v1934_v19, %v1988_v0 }
 0x626   : > { %v1941_v22 = vsel %vm522_vm4, %v740_v21, %v736_v20  ;;  %v775_v59 = vsel %vm522_vm4, %v774_v54, %v770_v57  ;;  %v751_v1 = vsel %vm522_vm4, %v750_v62, %v746_v63  ;;  %v763_v10 = vsel %vm522_vm4, %v762_v8, %v758_v9 }
 0x6c2   : > { %v940_v23 = vpop.f32.mrb[10].mxu1 }
 0x6c3   : > { %v1507_v24 = vpop.f32.mrb[11].mxu1 }
 0x6c6   : > { %v1073_v25 = vpop.f32.mrb[12].mxu1 }
 0x6c7   : > { %v1512_v26 = vpop.f32.mrb[13].mxu1  ;;  %v1077_v27 = vsel %vm290_vm3, %v1073_v25, -inf }
 0x6c8   : > { %1078 = vmax.xlane.f32.xlu1 %v1077_v27 }
 0x6cc   : > { %435 = vadd.xlane.f32.xlu1 %v434_v28 }
 0x6d0   : > { %869 = vadd.xlane.f32.xlu1 %v868_v29 }
 0x755   : > { %v1079_v30 = vpop.xlane.xlu1 %1078 }
 0x756   : > { %v1080_v31 = vsub.f32 %v1073_v25, %v1079_v30 }
 0x758   : > { %v1081_v32 = vmul.f32 1.442695, %v1080_v31 }
 0x759   : > { %v436_v33 = vpop.xlane.xlu1 %435 }
 0x75a   : > { %1625 = vpow2.f32 %v1081_v32 }
 0x75b   : > { %1627 = vrcp.f32 %v436_v33 }
 0x75d   : > { %v870_v34 = vpop.xlane.xlu1 %869 }
 0x75e   : > { %1629 = vrcp.f32 %v870_v34 }
 0x764   : > { %v1626_v35 = vpop.eup %1625 }
 0x765   : > { %v1628_v36 = vpop.eup %1627  ;;  %1516 = vmatmul.mubr.msk.f32.vlgmr.msra.gmra.mrb[14].mxu1 %vm290_vm3, %v1626_v35  ;;  %v1083_v37 = vsel %vm290_vm3, %v1626_v35, 0.0  ;;  %v1214_v35 = vld [vmem:[%s2112_s2] sm:$0xff] }
 0x766   : > { %v511_v38 = vmul.f32 %v1628_v36, %v1892_v44  ;;  %1084 = vadd.xlane.f32.xlu1 %v1083_v37  ;;  %1526 = vmatprep.mubr.msk.f32.mxu1 %vm1698_vm2, %v1699_v5  ;;  %v1215_v36 = vld [vmem:[%s2112_s2 + $0x8] sm:$0xff] }
 0x767   : > { %v1554_v37 = vpack.c.bf16 %v1215_v36, %v1214_v35 }
 0x768   : > { %v1630_v39 = vpop.eup %1629  ;;  %v513_v40 = vcombine.high %v511_v38, %v511_v38  ;;  %v517_v42 = vrot.slane %v511_v38, %v1930_v18  ;;  %v528_v60 = vrot.slane %v511_v38, %v1955_v45  ;;  %v540_v6 = vrot.slane %v511_v38, %v1988_v0 }
 0x769   : > { %v945_v41 = vmul.f32 %v1630_v39, %v940_v23  ;;  %v552_v15 = vrot.slane %v511_v38, %v1958_v47  ;;  %1556 = vmatpush3.bf16.xpose.msk.msra.mxu1 %vm1792_vm1, %v1554_v37 }
 0x76a   : > { %v521_v43 = vrot.slane %v513_v40, %v1930_v18  ;;  %v532_v58 = vrot.slane %v513_v40, %v1955_v45  ;;  %v544_v3 = vrot.slane %v513_v40, %v1988_v0  ;;  %v556_v14 = vrot.slane %v513_v40, %v1958_v47  ;;  %1557 = vmatprep.subr.bf16.mxu1 %v1697_v2 }
 0x76b   : > { %v947_v46 = vcombine.high %v945_v41, %v945_v41  ;;  %v961_v48 = vrot.slane %v945_v41, %v1955_v45  ;;  %v951_v49 = vrot.slane %v945_v41, %v1930_v18  ;;  %v985_v51 = vrot.slane %v945_v41, %v1958_v47 }
 0x76c   : > { %v523_v44 = vsel %vm522_vm4, %v521_v43, %v517_v42  ;;  %v533_v61 = vsel %vm522_vm4, %v532_v58, %v528_v60  ;;  %v545_v7 = vsel %vm522_vm4, %v544_v3, %v540_v6  ;;  %v973_v12 = vrot.slane %v945_v41, %v1988_v0 }
 0x76d   : > { %v965_v5 = vrot.slane %v947_v46, %v1955_v45  ;;  %v955_v50 = vrot.slane %v947_v46, %v1930_v18  ;;  %v989_v52 = vrot.slane %v947_v46, %v1958_v47  ;;  %v977_v11 = vrot.slane %v947_v46, %v1988_v0 }
 0x76e   : > { %v557_v16 = vsel %vm522_vm4, %v556_v14, %v552_v15 }
 0x76f   : > { %v966_v53 = vsel %vm522_vm4, %v965_v5, %v961_v48  ;;  %v956_v55 = vsel %vm522_vm4, %v955_v50, %v951_v49  ;;  %v1973_v56 = vsel %vm522_vm4, %v989_v52, %v985_v51  ;;  %v978_v13 = vsel %vm522_vm4, %v977_v11, %v973_v12  ;;  %v1217_v48 = vld [vmem:[%s2112_s2 + $0x18] sm:$0xff] }
 0x770   : > { %967 = vrot.lane.b32.xlu0 %v966_v53, %s1711_s28 }
 0x774   : > { %776 = vrot.lane.b32.xlu0 %v775_v59, %s1712_s29 }
 0x777   : > { %534 = vrot.lane.b32.xlu1 %v533_v61, %s1711_s28 }
 0x77b   : > { %752 = vrot.lane.b32.xlu1 %v751_v1, %s1711_s28 }
 0x77f   : > { %546 = vrot.lane.b32.xlu1 %v545_v7, %s1713_s30 }
 0x783   : > { %764 = vrot.lane.b32.xlu1 %v763_v10, %s1713_s30 }
 0x787   : > { %979 = vrot.lane.b32.xlu1 %v978_v13, %s1713_s30 }
 0x78b   : > { %558 = vrot.lane.b32.xlu1 %v557_v16, %s1712_s29 }
 0x7e2   : > { %v968_v17 = vpop.permute.xlu0 %967 }
 0x7e3   : > { %v994_v19 = vsel %vm290_vm3, %v956_v55, %v968_v17 }
 0x7e6   : > { %v777_v27 = vpop.permute.xlu0 %776 }
 0x7f3   : > { %v1085_v20 = vpop.xlane.xlu1 %1084 }
 0x7f4   : > { %1631 = vrcp.f32 %v1085_v20 }
 0x7f7   : > { %v535_v21 = vpop.permute.xlu1 %534 }
 0x7f8   : > { %v561_v32 = vsel %vm290_vm3, %v523_v44, %v535_v21  ;;  %v1216_v44 = vld [vmem:[%s2112_s2 + $0x10] sm:$0xff] }
 0x7f9   : > { %v1558_v51 = vpack.c.bf16 %v1217_v48, %v1216_v44 }
 0x7fb   : > { %v753_v23 = vpop.permute.xlu1 %752  ;;  %1560 = vmatpush3.bf16.xpose.msk.msra.mxu1 %vm1792_vm1, %v1558_v51 }
 0x7fc   : > { %v779_v25 = vsel %vm290_vm3, %v1941_v22, %v753_v23 }
 0x7fe   : > { %v1632_v38 = vpop.eup %1631 }
 0x7ff   : > { %v547_v24 = vpop.permute.xlu1 %546 }
 0x800   : > { %v563_v33 = vsel %vm562_vm6, %v561_v32, %v547_v24 }
 0x803   : > { %v765_v26 = vpop.permute.xlu1 %764 }
 0x804   : > { %v780_v28 = vsel %vm562_vm6, %v779_v25, %v765_v26 }
 0x805   : > { %v781_v29 = vsel %vm564_vm5, %v780_v28, %v777_v27 }
 0x806   : > { %782 = vst.msk [vmem:[#allocation3 + $0x2] sm:$0x3] %vm566_vm7, %v781_v29 }
 0x807   : > { %v980_v30 = vpop.permute.xlu1 %979 }
 0x808   : > { %v995_v31 = vsel %vm562_vm6, %v994_v19, %v980_v30 }
 0x80b   : > { %v559_v34 = vpop.permute.xlu1 %558 }
 0x80c   : > { %v565_v22 = vsel %vm564_vm5, %v563_v33, %v559_v34 }
 0x80d   : > { %567 = vst.msk [vmem:[#allocation3] sm:$0x3] %vm566_vm7, %v565_v22 }
 0x838   : > { %v1155_v39 = vpop.f32.mrb[14].mxu1 }
 0x839   : > { %v1160_v40 = vmul.f32 %v1632_v38, %v1155_v39  ;;  %v1517_v41 = vpop.f32.mrb[15].mxu1 }
 0x83b   : > { %v1162_v42 = vcombine.high %v1160_v40, %v1160_v40  ;;  %v1200_v43 = vrot.slane %v1160_v40, %v1958_v47  ;;  %v1176_v46 = vrot.slane %v1160_v40, %v1955_v45  ;;  %v1166_v49 = vrot.slane %v1160_v40, %v1930_v18 }
 0x83d   : > { %v1204_v5 = vrot.slane %v1162_v42, %v1958_v47  ;;  %v1180_v2 = vrot.slane %v1162_v42, %v1955_v45  ;;  %v1170_v50 = vrot.slane %v1162_v42, %v1930_v18  ;;  %v1192_v54 = vrot.slane %v1162_v42, %v1988_v0 }
 0x83e   : > { %v1188_v47 = vrot.slane %v1160_v40, %v1988_v0 }
 0x83f   : > { %v1205_v52 = vsel %vm522_vm4, %v1204_v5, %v1200_v43  ;;  %v1181_v53 = vsel %vm522_vm4, %v1180_v2, %v1176_v46  ;;  %v1171_v55 = vsel %vm522_vm4, %v1170_v50, %v1166_v49 }
 0x840   : > { %1206 = vrot.lane.b32.xlu0 %v1205_v52, %s1712_s29  ;;  %1182 = vrot.lane.b32.xlu1 %v1181_v53, %s1711_s28  ;;  %v1193_v18 = vsel %vm522_vm4, %v1192_v54, %v1188_v47  ;;  %s2067_s28 = scalar_lea.hbm %s2113_s3, %s1414_s20 }
 0x844   : > { %1194 = vrot.lane.b32.xlu1 %v1193_v18, %s1713_s30  ;;  %s1633_s30 = scalar_lea.vmem %s2069_s25, 128 }
 0x845   : > { %p1634_p11 = scmp.ne.s32.totalorder %s2069_s25, %s1633_s30  ;;  %p1641_p1 = scmp.lt.s32.totalorder %s1639_s5, %s1633_s30 }
 0x847   : > { %p1635_p12 = pnand %p1634_p11, %p1773_p5  ;;  %p1642_p2 = por %p1641_p1, %p1640_p0 }
 0x848   : > { %991 = vrot.lane.b32.xlu1 %v1973_v56, %s1712_s29  ;;  %s1305_s29 = scalar_lea.sflag [#allocation5], %s159_s17 }
 0x849   : > { %p1636_p13 = pneg %p1635_p12 }
 0x84b   : > { %p1643_p3 = pnand %p1642_p2, %p1636_p13 }
 0x8b2   : > { %v1183_v45 = vpop.permute.xlu1 %1182  ;;  %v1207_v59 = vpop.permute.xlu0 %1206 }
 0x8b3   : > { %v1209_v57 = vsel %vm290_vm3, %v1171_v55, %v1183_v45 }
 0x8b6   : > { %v1195_v58 = vpop.permute.xlu1 %1194 }
 0x8b7   : > { %v1210_v60 = vsel %vm562_vm6, %v1209_v57, %v1195_v58 }
 0x8b8   : > { %v1211_v61 = vsel %vm564_vm5, %v1210_v60, %v1207_v59 }
 0x8b9   : > { %1212 = vst.msk [vmem:[#allocation3 + $0x6] sm:$0x3] %vm566_vm7, %v1211_v61 }
 0x8ba   : > { %v992_v4 = vpop.permute.xlu1 %991 }
 0x8bb   : > { %v996_v62 = vsel %vm564_vm5, %v995_v31, %v992_v4 }
 0x8bc   : > { %997 = vst.msk [vmem:[#allocation3 + $0x4] sm:$0x3] %vm566_vm7, %v996_v62 }
 0x8c3   : > { %v1213_v63 = vld [vmem:[#allocation3] sm:$0xff] }
 0x8c4   : > { %1527 = vmatmul.mubr.msk.f32.vlgmr.msra.gmra.mrb[16].mxu1 %vm179_vm0, %v1213_v63 }
 0x997   : > { %v1299_v56 = vpop.f32.mrb[16].mxu1 }
 0x998   : > { %1303 = vst.msk [vmem:[%s161_s24] sm:$0xff] %vm179_vm0, %v1299_v56  ;;  %v1528_v0 = vpop.f32.mrb[17].mxu1 }
 0x999   : > { %1646 = shalt.err (!%p1643_p3)
}
 0x99a   : > { %s1647_s6 = scalar_lea.hbm %s2067_s28, 128  ;;  %s1651_s9 = scalar_lea.hbm %s2113_s3, 256 }
 0x99b   : > { %p1648_p4 = scmp.ne.s32.totalorder %s2067_s28, %s1647_s6  ;;  %p1652_p9 = scmp.lt.u32.totalorder %s2067_s28, %s2113_s3 }
 0x99c   : > { %p1653_p10 = scmp.lt.u32.totalorder %s1651_s9, %s1647_s6  ;;  %p1655_p12 = scmp.lt.u32.totalorder %s1647_s6, %s2067_s28 }
 0x99d   : > { %p1649_p7 = pnand %p1648_p4, %p1773_p5 }
 0x99e   : > { %p1654_p11 = por %p1653_p10, %p1652_p9 }
 0x99f   : > { %p1650_p8 = pneg %p1649_p7 }
 0x9a0   : > { %p1656_p13 = por %p1655_p12, %p1654_p11 }
 0x9a2   : > { %p1657_p0 = pnand %p1656_p13, %p1650_p8 }
 0x9a4   : > { %1660 = shalt.err (!%p1657_p0)
}
 0x9a5   : > { %1561 = dma.vmem_to_hbm [thread:$0]  (%p1773_p5), %s2069_s25, 128, %s2067_s28, %s1305_s29  }
 0x9a6 PF: > { %p1567_p1 = scmp.ge.s32.totalorder %s1695_s15, 2  ;;  %s1330_s17 = sand.u32 1, %s1683_s12  }
 0x9a7   : > { %s1331_s19 = scalar_lea.sflag [#allocation5], %s1330_s17 }
 0x9a8   : > { %p1564_p2 = pnand %p1567_p1, %p1777_p6 }
 0x9aa   : > { %1678 = dma.done.wait (!%p1564_p2), %s1331_s19, 128  }
 0x9ab   : > { %1680 = vsyncadd (!%p1564_p2), %s1331_s19, 4294967168  ;;  %p13_p3 = scmp.ge.s32.totalorder %s1760_s18, 4   ;;  %s2118_s12 = smov %s1687_s13 }
 0x9ac   : > { %s2119_s13 = smov %s1691_s14  ;;  %s2120_s14 = smov %s1771_s21 }
 0x9ad   : > { %s2121_s15 = smov %s1760_s18  ;;  %15 = sbr.rel (!%p13_p3) target bundleno = 3 (0x3), region = 78 }
 0x9b4   :  { %1336 = vsyncpa [#allocation5], 1 }
 0x9b5   :  { %1338 = vsyncpa [#allocation5 + $0x1], 1 }

// kernel: tpu_custom_call.1
= control target key start
LH: loop header
LB: loop body
LE: loop exit
PB: predicated region body
PF: predicated region fallthrough
CT: control target
= control target key end

     0   :  { %7 = vsyncpa [#allocation3], 0  ;;  %s1571_s0 = inlined_call_operand.vmem [shape: f32[2,8,32], index: 0, kind: input, shape index: {}]   ;;  %s1572_s1 = inlined_call_operand.vmem [shape: f32[96,32], index: 1, kind: input, shape index: {}]   ;;  %s1573_s2 = inlined_call_operand.hbm [shape: f32[2,4,8,8], index: 2, kind: output, shape index: {}]  }
   0x1   :  { %9 = vsyncpa [#allocation3 + $0x1], 0  ;;  %s1334_s9 = smov 0   ;;  %s1336_s10 = smov 0  }
   0x2   :  { %s1338_s11 = smov 0   ;;  %s1340_s12 = smov 0  }
   0x3 LB: > { %s1355_s13 = sadd.s32 4294967295, %s1300_s12   ;;  %s1007_s14 = sadd.s32 4294967294, %s1300_s12   ;;  %s1300_s12 = sphi %s1340_s12, %s1581_s12   ;;  %s1296_s11 = sphi %s1338_s11, %s1580_s11   ;;  %s1292_s10 = sphi %s1336_s10, %s1579_s10   ;;  %s1288_s9 = sphi %s1334_s9, %s1578_s9  }
   0x4   : > { %s1359_s15 = sadd.s32 1, %s1300_s12   ;;  %s69_s16 = sadd.s32 1, %s1296_s11 }
   0x5   : > { %s66_s17 = ssub.s32 %s1300_s12, %s1359_s15  ;;  %p79_p0 = scmp.ne.s32.totalorder %s1296_s11, %s1292_s10 }
   0x6   : > { %p67_p1 = scmp.eq.s32.totalorder %s66_s17, 0  ;;  %p80_p2 = scmp.eq.s32.totalorder %s1355_s13, 1 }
   0x7   : > { %p85_p3 = scmp.ne.s32.totalorder %s1292_s10, %s1288_s9  ;;  %p86_p4 = scmp.eq.s32.totalorder %s1007_s14, 1 }
   0x8   : > { %s1370_s18 = scalar_select %p67_p1, %s1296_s11, %s69_s16  }
   0x9   : > { %p1372_p5 = por %p80_p2, %p79_p0  ;;  %p1376_p6 = por %p86_p4, %p85_p3 }
   0xa   : > { %p1010_p7 = scmp.ge.s32.totalorder %s1300_s12, 1  ;;  %p114_p8 = scmp.lt.s32.totalorder %s1300_s12, 3 }
   0xc   : > { %p115_p9 = pnand %p1010_p7, %p114_p8 }
   0xd   : > { %v140_v0 = vld [vmem:[%s1572_s1] sm:$0xff] (!%p115_p9)  ;;  %v141_v1 = vld [vmem:[%s1572_s1 + $0x8] sm:$0xff] (!%p115_p9)  ;;  %vm152_vm0 = vcmask (!%p115_p9), 261120   ;;  %v1302_v2 = vmov (!%p115_p9), 0.0|0.0   ;;  %vm1303_vm2 = vmmov (!%p115_p9), 0   ;;  %v1304_v5 = vmov (!%p115_p9), 0.0  }
   0xe   : > { %118 = sbr.rel (%p115_p9) target bundleno = 2114 (0x842), region = 28  ;;  %1143 = vmatprep.subr.bf16.mxu0 (!%p115_p9), %v1302_v2  ;;  %v1144_v3 = vpack.c.bf16 (!%p115_p9), %v141_v1, %v140_v0  ;;  %vm1390_vm1 = vmpackc.low (!%p115_p9), %vm152_vm0, %vm152_vm0  ;;  %1100 = vmatprep.mubr.msk.f32.mxu0 (!%p115_p9), %vm1303_vm2, %v1304_v5  ;;  %v142_v6 = vld [vmem:[%s1572_s1 + $0x10] sm:$0xff] (!%p115_p9)  ;;  %v143_v7 = vld [vmem:[%s1572_s1 + $0x18] sm:$0xff] (!%p115_p9)  ;;  %p135_p10 = scmp.lt.s32.totalorder (!%p115_p9), %s1355_s13, 1  ;;  %vm266_vm3 = vcmask (!%p115_p9), 64512  }
   0xf   : > { %1103 = vmatprep.subr.mxu1 (!%p115_p9), %v1304_v5  ;;  %1105 = vmatprep.mubr.msk.f32.mxu1 (!%p115_p9), %vm1303_vm2, %v1304_v5  ;;  %v1148_v8 = vpack.c.bf16 (!%p115_p9), %v143_v7, %v142_v6  ;;  %v144_v9 = vld [vmem:[%s1572_s1 + $0x20] sm:$0xff] (!%p115_p9)  ;;  %v145_v10 = vld [vmem:[%s1572_s1 + $0x28] sm:$0xff] (!%p115_p9)  ;;  %v146_v12 = vld [vmem:[%s1572_s1 + $0x30] sm:$0xff] (!%p115_p9)  ;;  %s1305_s3 = smov (!%p115_p9), 64   ;;  %s1306_s4 = smov (!%p115_p9), 96  }
  0x10   : > { %1146 = vmatpush3.bf16.xpose.msk.msra.mxu0 (!%p115_p9), %vm1390_vm1, %v1144_v3  ;;  %v1152_v11 = vpack.c.bf16 (!%p115_p9), %v145_v10, %v144_v9  ;;  %v147_v13 = vld [vmem:[%s1572_s1 + $0x38] sm:$0xff] (!%p115_p9)  ;;  %v148_v15 = vld [vmem:[%s1572_s1 + $0x40] sm:$0xff] (!%p115_p9)  ;;  %v149_v16 = vld [vmem:[%s1572_s1 + $0x48] sm:$0xff] (!%p115_p9)  ;;  %s1307_s5 = smov (!%p115_p9), 88   ;;  %s1308_s6 = smov (!%p115_p9), 120  }
  0x11   : > { %1147 = vmatprep.subr.bf16.mxu0 (!%p115_p9), %v1302_v2  ;;  %v1156_v14 = vpack.c.bf16 (!%p115_p9), %v147_v13, %v146_v12  ;;  %v1160_v17 = vpack.c.bf16 (!%p115_p9), %v149_v16, %v148_v15  ;;  %v150_v18 = vld [vmem:[%s1572_s1 + $0x50] sm:$0xff] (!%p115_p9)  ;;  %v151_v19 = vld [vmem:[%s1572_s1 + $0x58] sm:$0xff] (!%p115_p9)  ;;  %s1309_s7 = smov (!%p115_p9), 56   ;;  %s1310_s8 = smov (!%p115_p9), 112  }
  0x12   : > { %v1164_v20 = vpack.c.bf16 (!%p115_p9), %v151_v19, %v150_v18  ;;  %s1311_s14 = smov (!%p115_p9), 80   ;;  %s1312_s16 = smov (!%p115_p9), 48  }
  0x13   : > { %s1313_s17 = smov (!%p115_p9), 72   ;;  %s1314_s21 = smov (!%p115_p9), 104  }
  0x14   : > { %s1315_s22 = smov (!%p115_p9), 40   ;;  %s132_s23 = sand.u32 (!%p115_p9), 1, %s1292_s10  }
  0x15   : > { %s136_s26 = scalar_select %p135_p10, %s1355_s13, 1 }
  0x16   : > { %s1011_s24 = sshll.u32 %s132_s23, 5 }
  0x17   : > { %s1012_s27 = sshll.u32 %s136_s26, 3  ;;  %s1502_s25 = scalar_lea.vmem [#allocation2], %s1011_s24 }
  0x18   : > { %1150 = vmatpush3.bf16.xpose.msk.msra.mxu0 %vm1390_vm1, %v1148_v8  ;;  %s138_s30 = scalar_lea.vmem %s1571_s0, %s1012_s27  ;;  %s945_s26 = sshll.u32 %s1502_s25, 4  ;;  %s1519_s26 = int_to_ptr.vmem [resolvable:$true] %s945_s26 }
  0x19   : > { %1151 = vmatprep.subr.bf16.mxu0 %v1302_v2  ;;  %v139_v21 = vld [vmem:[%s138_s30] sm:$0xff]  ;;  %s1046_s27 = sshll.u32 %s1355_s13, 9  ;;  %s1238_s13 = scalar_lea.vmem %s1519_s26, 512 }
  0x1a   : > { %s1524_s30 = scalar_lea.hbm %s1573_s2, %s1046_s27  ;;  %p1239_p11 = scmp.ne.s32.totalorder %s1519_s26, %s1238_s13 }
  0x1c   : > { %p1240_p12 = pnand %p1239_p11, %p1372_p5 }
  0x1e   : > { %p1241_p13 = pneg %p1240_p12 }
  0x20   : > { %1154 = vmatpush3.bf16.xpose.msk.msra.mxu0 %vm1390_vm1, %v1152_v11 }
  0x21   : > { %1155 = vmatprep.subr.bf16.mxu0 %v1302_v2 }
  0x28   : > { %1158 = vmatpush3.bf16.xpose.msk.msra.mxu0 %vm1390_vm1, %v1156_v14 }
  0x29   : > { %1159 = vmatprep.subr.bf16.mxu0 %v1302_v2 }
  0x30   : > { %1162 = vmatpush3.bf16.xpose.msk.msra.mxu0 %vm1390_vm1, %v1160_v17 }
  0x31   : > { %1163 = vmatprep.subr.bf16.mxu0 %v1302_v2 }
  0x38   : > { %1166 = vmatpush3.bf16.xpose.msk.msra.mxu0 %vm1390_vm1, %v1164_v20 }
  0x3f   : > { %1101 = vmatmul.mubr.msk.f32.vlgmr.msra.gmra.mrb[0].mxu0 %vm152_vm0, %v139_v21 }
 0x112   : > { %v1447_v22 = vpop.f32.mrb[0].mxu0 }
 0x113   : > { %351 = vrot.lane.b32.xlu1 %v1447_v22, %s1305_s3  ;;  %264 = vrot.lane.b32.xlu0 %v1447_v22, %s1306_s4  ;;  %v1102_v23 = vpop.f32.mrb[1].mxu0  ;;  %v262_v24 = vmul.f32 0.35355338, %v1447_v22  ;;  %s1530_s3 = scalar_lea.sflag [#allocation3], %s132_s23  ;;  %s1316_s4 = smov [#allocation2]  }
 0x117   : > { %432 = vrot.lane.b32.xlu1 %v1447_v22, %s1307_s5  ;;  %s1242_s5 = sshll.u32 %s1316_s4, 4  ;;  %s1243_s5 = int_to_ptr.vmem [resolvable:$false] %s1242_s5 }
 0x118   : > { %p1245_p0 = scmp.lt.s32.totalorder %s1519_s26, %s1243_s5 }
 0x11b   : > { %430 = vrot.lane.b32.xlu1 %v262_v24, %s1308_s6  ;;  %s1244_s6 = scalar_lea.vmem %s1243_s5, 1024 }
 0x11c   : > { %p1246_p1 = scmp.lt.s32.totalorder %s1244_s6, %s1238_s13 }
 0x11e   : > { %p1247_p2 = por %p1246_p1, %p1245_p0 }
 0x120   : > { %p1248_p3 = pnand %p1247_p2, %p1241_p13 }
 0x185   : > { %v265_v25 = vpop.permute.xlu0 %264  ;;  %v352_v26 = vpop.permute.xlu1 %351 }
 0x186   : > { %1104 = vmatpush3.xpose.msk.msra.mxu1 %vm266_vm3, %v265_v25 }
 0x187   : > { %1108 = vmatprep.subr.mxu1 %v1304_v5 }
 0x189   : > { %1106 = vmatmul.mubr.msk.f32.vlgmr.msra.gmra.mrb[0].mxu1 %vm266_vm3, %v262_v24  ;;  %v433_v33 = vpop.permute.xlu1 %432 }
 0x18a   : > { %1109 = vmatpush3.msra.mxu1 %v352_v26  ;;  %1110 = vmatprep.mubr.msk.f32.mxu1 %vm1303_vm2, %v1304_v5 }
 0x18b   : > { %1113 = vmatprep.subr.mxu1 %v1304_v5 }
 0x18d   : > { %v431_v35 = vpop.permute.xlu1 %430 }
 0x25c   : > { %v338_v27 = vpop.f32.mrb[0].mxu1 }
 0x25d   : > { %v1107_v28 = vpop.f32.mrb[1].mxu1  ;;  %v342_v29 = vsel %vm266_vm3, %v338_v27, -inf }
 0x25e   : > { %343 = vmax.xlane.f32.xlu0 %v342_v29 }
 0x274   : > { %517 = vrot.lane.b32.xlu0 %v1447_v22, %s1309_s7 }
 0x278   : > { %597 = vrot.lane.b32.xlu0 %v262_v24, %s1310_s8 }
 0x2eb   : > { %v344_v30 = vpop.xlane.xlu0 %343 }
 0x2ec   : > { %v345_v31 = vsub.f32 %v338_v27, %v344_v30 }
 0x2ee   : > { %v346_v32 = vmul.f32 1.442695, %v345_v31 }
 0x2ef   : > { %v518_v36 = vpop.permute.xlu0 %517 }
 0x2f0   : > { %1222 = vpow2.f32 %v346_v32 }
 0x2f3   : > { %v598_v47 = vpop.permute.xlu0 %597 }
 0x2fa   : > { %v1461_v34 = vpop.eup %1222 }
 0x2fb   : > { %1111 = vmatmul.mubr.msk.f32.vlgmr.msra.gmra.mrb[2].mxu1 %vm266_vm3, %v1461_v34 }
 0x2fc   : > { %1114 = vmatpush3.xpose.msk.msra.mxu1 %vm266_vm3, %v433_v33  ;;  %1115 = vmatprep.mubr.msk.f32.mxu1 %vm1303_vm2, %v1304_v5 }
 0x2fd   : > { %1118 = vmatprep.subr.mxu1 %v1304_v5 }
 0x2ff   : > { %1116 = vmatmul.mubr.msk.f32.vlgmr.msra.gmra.mrb[4].mxu1 %vm266_vm3, %v431_v35 }
 0x300   : > { %1119 = vmatpush3.msra.mxu1 %v518_v36  ;;  %1120 = vmatprep.mubr.msk.f32.mxu1 %vm1303_vm2, %v1304_v5 }
 0x301   : > { %1123 = vmatprep.subr.mxu1 %v1304_v5 }
 0x3ce   : > { %v1473_v37 = vpop.f32.mrb[2].mxu1 }
 0x3cf   : > { %v1112_v38 = vpop.f32.mrb[3].mxu1 }
 0x3d2   : > { %v504_v39 = vpop.f32.mrb[4].mxu1 }
 0x3d3   : > { %v1117_v40 = vpop.f32.mrb[5].mxu1  ;;  %v508_v41 = vsel %vm266_vm3, %v504_v39, -inf }
 0x3d4   : > { %509 = vmax.xlane.f32.xlu1 %v508_v41 }
 0x3e5   : > { %599 = vrot.lane.b32.xlu1 %v1447_v22, %s1311_s14 }
 0x3e9   : > { %684 = vrot.lane.b32.xlu1 %v1447_v22, %s1312_s16 }
 0x3ed   : > { %766 = vrot.lane.b32.xlu1 %v1447_v22, %s1313_s17 }
 0x3f1   : > { %764 = vrot.lane.b32.xlu1 %v262_v24, %s1314_s21 }
 0x461   : > { %v510_v42 = vpop.xlane.xlu1 %509 }
 0x462   : > { %v511_v43 = vsub.f32 %v504_v39, %v510_v42 }
 0x464   : > { %v512_v44 = vmul.f32 1.442695, %v511_v43 }
 0x465   : > { %v600_v45 = vpop.permute.xlu1 %599 }
 0x466   : > { %1224 = vpow2.f32 %v512_v44 }
 0x469   : > { %v685_v48 = vpop.permute.xlu1 %684 }
 0x46d   : > { %v767_v58 = vpop.permute.xlu1 %766 }
 0x470   : > { %v1225_v46 = vpop.eup %1224 }
 0x471   : > { %1121 = vmatmul.mubr.msk.f32.vlgmr.msra.gmra.mrb[6].mxu1 %vm266_vm3, %v1225_v46  ;;  %v514_v54 = vsel %vm266_vm3, %v1225_v46, 0.0  ;;  %v765_v60 = vpop.permute.xlu1 %764 }
 0x472   : > { %1124 = vmatpush3.xpose.msk.msra.mxu1 %vm266_vm3, %v600_v45  ;;  %1125 = vmatprep.mubr.msk.f32.mxu1 %vm1303_vm2, %v1304_v5 }
 0x473   : > { %1128 = vmatprep.subr.mxu1 %v1304_v5 }
 0x475   : > { %1126 = vmatmul.mubr.msk.f32.vlgmr.msra.gmra.mrb[8].mxu1 %vm266_vm3, %v598_v47 }
 0x476   : > { %1129 = vmatpush3.msra.mxu1 %v685_v48  ;;  %1130 = vmatprep.mubr.msk.f32.mxu1 %vm1303_vm2, %v1304_v5 }
 0x477   : > { %1133 = vmatprep.subr.mxu1 %v1304_v5 }
 0x544   : > { %v589_v49 = vpop.f32.mrb[6].mxu1 }
 0x545   : > { %v1122_v50 = vpop.f32.mrb[7].mxu1 }
 0x548   : > { %v671_v51 = vpop.f32.mrb[8].mxu1 }
 0x549   : > { %v1127_v52 = vpop.f32.mrb[9].mxu1  ;;  %v675_v53 = vsel %vm266_vm3, %v671_v51, -inf }
 0x54a   : > { %676 = vmax.xlane.f32.xlu0 %v675_v53 }
 0x560   : > { %851 = vrot.lane.b32.xlu0 %v1447_v22, %s1315_s22 }
 0x57f   : > { %515 = vadd.xlane.f32.xlu0 %v514_v54 }
 0x5d7   : > { %v677_v55 = vpop.xlane.xlu0 %676 }
 0x5d8   : > { %v678_v56 = vsub.f32 %v671_v51, %v677_v55 }
 0x5da   : > { %v679_v57 = vmul.f32 1.442695, %v678_v56 }
 0x5db   : > { %v852_v61 = vpop.permute.xlu0 %851 }
 0x5dc   : > { %1226 = vpow2.f32 %v679_v57 }
 0x5e6   : > { %v1227_v59 = vpop.eup %1226 }
 0x5e7   : > { %1131 = vmatmul.mubr.msk.f32.vlgmr.msra.gmra.mrb[10].mxu1 %vm266_vm3, %v1227_v59  ;;  %v681_v7 = vsel %vm266_vm3, %v1227_v59, 0.0 }
 0x5e8   : > { %1134 = vmatpush3.xpose.msk.msra.mxu1 %vm266_vm3, %v767_v58  ;;  %1135 = vmatprep.mubr.msk.f32.mxu1 %vm1303_vm2, %v1304_v5 }
 0x5e9   : > { %1138 = vmatprep.subr.mxu1 %v1304_v5 }
 0x5eb   : > { %1136 = vmatmul.mubr.msk.f32.vlgmr.msra.gmra.mrb[12].mxu1 %vm266_vm3, %v765_v60 }
 0x5ec   : > { %1139 = vmatpush3.msra.mxu1 %v852_v61  ;;  %1140 = vmatprep.mubr.msk.f32.mxu1 %vm1303_vm2, %v1304_v5  ;;  %v348_v5 = vsel %vm266_vm3, %v1461_v34, 0.0 }
 0x60c   : > { %v516_v62 = vpop.xlane.xlu0 %515 }
 0x60d   : > { %1228 = vrcp.f32 %v516_v62 }
 0x617   : > { %v1229_v63 = vpop.eup %1228 }
 0x618   : > { %v594_v0 = vmul.f32 %v1229_v63, %v589_v49 }
 0x61a   : > { %1032 = vst.msk [vmem:[%s1502_s25 + $0x8] sm:$0xff] %vm266_vm3, %v594_v0 }
 0x6ba   : > { %v756_v1 = vpop.f32.mrb[10].mxu1 }
 0x6bb   : > { %v1132_v2 = vpop.f32.mrb[11].mxu1 }
 0x6be   : > { %v838_v3 = vpop.f32.mrb[12].mxu1 }
 0x6bf   : > { %v1137_v4 = vpop.f32.mrb[13].mxu1  ;;  %v842_v6 = vsel %vm266_vm3, %v838_v3, -inf }
 0x6c0   : > { %843 = vmax.xlane.f32.xlu1 %v842_v6 }
 0x6c4   : > { %349 = vadd.xlane.f32.xlu1 %v348_v5 }
 0x6c8   : > { %682 = vadd.xlane.f32.xlu1 %v681_v7 }
 0x74d   : > { %v844_v8 = vpop.xlane.xlu1 %843 }
 0x74e   : > { %v845_v9 = vsub.f32 %v838_v3, %v844_v8 }
 0x750   : > { %v846_v10 = vmul.f32 1.442695, %v845_v9 }
 0x751   : > { %v350_v11 = vpop.xlane.xlu1 %349 }
 0x752   : > { %1230 = vpow2.f32 %v846_v10 }
 0x753   : > { %1232 = vrcp.f32 %v350_v11 }
 0x755   : > { %v683_v12 = vpop.xlane.xlu1 %682 }
 0x756   : > { %1234 = vrcp.f32 %v683_v12 }
 0x75c   : > { %v1231_v13 = vpop.eup %1230 }
 0x75d   : > { %v1233_v14 = vpop.eup %1232  ;;  %1141 = vmatmul.mubr.msk.f32.vlgmr.msra.gmra.mrb[14].mxu1 %vm266_vm3, %v1231_v13  ;;  %v848_v15 = vsel %vm266_vm3, %v1231_v13, 0.0 }
 0x75e   : > { %v428_v16 = vmul.f32 %v1233_v14, %v1473_v37  ;;  %849 = vadd.xlane.f32.xlu1 %v848_v15 }
 0x760   : > { %v1235_v17 = vpop.eup %1234  ;;  %429 = vst.msk [vmem:[%s1502_s25] sm:$0xff] %vm266_vm3, %v428_v16 }
 0x761   : > { %v761_v18 = vmul.f32 %v1235_v17, %v756_v1 }
 0x763   : > { %1036 = vst.msk [vmem:[%s1502_s25 + $0x10] sm:$0xff] %vm266_vm3, %v761_v18 }
 0x7eb   : > { %v850_v19 = vpop.xlane.xlu1 %849 }
 0x7ec   : > { %1236 = vrcp.f32 %v850_v19 }
 0x7f6   : > { %v1237_v20 = vpop.eup %1236 }
 0x830   : > { %v923_v21 = vpop.f32.mrb[14].mxu1 }
 0x831   : > { %v928_v22 = vmul.f32 %v1237_v20, %v923_v21  ;;  %v1142_v23 = vpop.f32.mrb[15].mxu1 }
 0x833   : > { %1040 = vst.msk [vmem:[%s1502_s25 + $0x18] sm:$0xff] %vm266_vm3, %v928_v22 }
 0x834   : > { %1251 = shalt.err (!%p1248_p3)
}
 0x835   : > { %s1252_s7 = scalar_lea.hbm %s1524_s30, 512  ;;  %s1256_s16 = scalar_lea.hbm %s1573_s2, 1024 }
 0x836   : > { %p1253_p4 = scmp.ne.s32.totalorder %s1524_s30, %s1252_s7  ;;  %p1257_p9 = scmp.lt.u32.totalorder %s1524_s30, %s1573_s2 }
 0x837   : > { %p1258_p10 = scmp.lt.u32.totalorder %s1256_s16, %s1252_s7  ;;  %p1260_p12 = scmp.lt.u32.totalorder %s1252_s7, %s1524_s30 }
 0x838   : > { %p1254_p7 = pnand %p1253_p4, %p1372_p5 }
 0x839   : > { %p1259_p11 = por %p1258_p10, %p1257_p9 }
 0x83a   : > { %p1255_p8 = pneg %p1254_p7 }
 0x83b   : > { %p1261_p13 = por %p1260_p12, %p1259_p11 }
 0x83d   : > { %p1262_p0 = pnand %p1261_p13, %p1255_p8 }
 0x83f   : > { %1265 = shalt.err (!%p1262_p0)
}
 0x840   : > { %s1317_s22 = smov 128   ;;  %s1318_s23 = smov 8  }
 0x841   : > { %1167 = dma.vmem_to_hbm [thread:$0]  (%p1372_p5), %s1519_s26, 512, %s1524_s30, %s1530_s3, %s1317_s22, %s1317_s22, %s1318_s23  }
 0x842 PF: > { %p1173_p1 = scmp.ge.s32.totalorder %s1300_s12, 2  ;;  %s960_s24 = sand.u32 1, %s1288_s9  }
 0x843   : > { %s961_s25 = scalar_lea.sflag [#allocation3], %s960_s24 }
 0x844   : > { %p1170_p2 = pnand %p1173_p1, %p1376_p6 }
 0x846   : > { %1283 = dma.done.wait (!%p1170_p2), %s961_s25, 512  }
 0x847   : > { %1285 = vsyncadd (!%p1170_p2), %s961_s25, 4294966784  ;;  %p12_p3 = scmp.ge.s32.totalorder %s1359_s15, 4   ;;  %s1578_s9 = smov %s1292_s10 }
 0x848   : > { %s1579_s10 = smov %s1296_s11  ;;  %s1580_s11 = smov %s1370_s18 }
 0x849   : > { %s1581_s12 = smov %s1359_s15  ;;  %14 = sbr.rel (!%p12_p3) target bundleno = 3 (0x3), region = 66 }
 0x850   :  { %966 = vsyncpa [#allocation3], 1 }
 0x851   :  { %968 = vsyncpa [#allocation3 + $0x1], 1 }

</bundles_post_ra>
